<compile_context>
chip_gen: v7x
topology: tpu7x:2x2x1
jax: 0.10.0
libtpu: 0.0.40
codegen_flags: <defaults>
</compile_context>

<pallas_src>
import jax
import jax.numpy as jnp
from jax import lax
from jax.experimental import pallas as pl
from jax.experimental.pallas import tpu as pltpu

COND_WINDOW = 8      # condition_window -> fc_embedding = Linear(18*8=144, 16)
INPUT_SIZE = 64      # LSTM input size  (20 + 72 + 16 + 16 = 124 -> Linear -> 64)
HIDDEN_SIZE = 32
N_LAYERS = 2
SUBLANE = 8          # fp32 sublane tile

# MXU operand dtype.  fp32 (default) keeps the kernel numerically tight against
# the fp32 reference.  On v6e/v7x set to jnp.bfloat16 for fewer MXU passes per
# serial-loop dot (accumulation stays fp32 via preferred_element_type); keep
# all gate/activation math fp32 either way (v5e VPU/EUP have no bf16 path).
MXU_DTYPE = jnp.float32


def pg_chord_kernel(xin_ref,
                    w_fold, b_fold, wbig, bl1, w_heads, b_heads,
                    out_ref, hn_ref, cn_ref,
                    gx_ref, h1seq_ref, hs_ref):
    SBP = gx_ref.shape[0]
    BP = hs_ref.shape[0]              # batch padded to the sublane tile (8)
    H = h1seq_ref.shape[1]            # 32 ; 4*H = 128 = one fp32 vreg of lanes
    G = 4 * H                         # 128
    S = SBP // BP

    # ---- Phase 1: whole-sequence layer-0 gate preactivations, ONE matmul ----
    # gx = [chord | note | emb] @ W_fold + b_fold   (all Phase-1 linears folded)
    gx_ref[...] = jnp.dot(xin_ref[...], w_fold[...],
                          preferred_element_type=jnp.float32) + b_fold[...]

    # ---- Phase 2: serial recurrence, one MXU dot per step (skewed) ----------
    wbig_v = wbig[...]                # (2H, 2G) = (64, 256), loop-invariant
    bl1_v = bl1[...]                  # (1, 128)
    hs_ref[...] = jnp.zeros_like(hs_ref)   # [h0 | h1] combined state = 0

    def lstm_act(gates, c):
        # Full 128-lane vreg activations, then aligned 32-lane slices (i,f,g,o).
        s = jax.nn.sigmoid(gates)
        th = jnp.tanh(gates)
        i = s[:, 0:H]
        f = s[:, H:2 * H]
        g = th[:, 2 * H:3 * H]
        o = s[:, 3 * H:4 * H]
        c_new = f * c + i * g
        return o * jnp.tanh(c_new), c_new

    def step(t, carry):
        r0, c0, c1 = carry            # r0 = h0(t-1) @ Whh0, carried from t-1
        base = pl.multiple_of(t * BP, SUBLANE)
        # Layer 0: x-part precomputed; recurrent part carried from last step.
        gates0 = gx_ref[pl.ds(base, BP), :] + r0
        h0, c0 = lstm_act(gates0, c0)
        # Aligned half-write: lanes 0:H of the combined state <- h0(t).
        hs_ref[:, 0:H] = h0
        # One dot: [h0(t) | h1(t-1)] @ [[Whh0|Wih1],[0|Whh1]]  -> (BP, 256)
        big = jnp.dot(hs_ref[...].astype(wbig_v.dtype), wbig_v,
                      preferred_element_type=jnp.float32)
        gates1 = big[:, G:2 * G] + bl1_v
        h1, c1 = lstm_act(gates1, c1)
        # Aligned half-write: lanes H:2H <- h1(t)   (read next step as h1(t-1))
        hs_ref[:, H:2 * H] = h1
        h1seq_ref[pl.ds(base, BP), :] = h1
        return big[:, 0:G], c0, c1    # big[:, 0:G] = h0(t) @ Whh0 for step t+1

    r0_init = jnp.zeros((BP, G), jnp.float32)
    zH = jnp.zeros((BP, H), jnp.float32)
    r0, c0, c1 = lax.fori_loop(0, S, step, (r0_init, zH, zH),
                               unroll=min(S, 8))
    hn_ref[0] = hs_ref[:, 0:H]
    hn_ref[1] = hs_ref[:, H:2 * H]
    cn_ref[0] = c0
    cn_ref[1] = c1

    # ---- Phase 3: batched output heads (single matmul + packed store) -------
    y = jnp.dot(h1seq_ref[...].astype(w_heads.dtype), w_heads[...],
                preferred_element_type=jnp.float32) + b_heads[...]  # (SBP, 20)
    lane = lax.broadcasted_iota(jnp.int32, y.shape, 1)
    neg = jnp.float32(-1e30)

    def seg_logsumexp(lo, hi):
        m = (lane >= lo) & (lane < hi)
        seg_max = jnp.max(jnp.where(m, y, neg), axis=-1, keepdims=True)
        seg_sum = jnp.sum(jnp.exp(jnp.where(m, y - seg_max, neg)),
                          axis=-1, keepdims=True)
        return m, seg_max + jnp.log(seg_sum)

    m2, lse2 = seg_logsumexp(1, 3)      # output_2  -> lanes [1, 3)
    m4, lse4 = seg_logsumexp(3, 7)      # output_4  -> lanes [3, 7)
    m13, lse13 = seg_logsumexp(7, 20)   # output_13 -> lanes [7, 20)
    offset = (jnp.where(m2, lse2, 0.0) + jnp.where(m4, lse4, 0.0)
              + jnp.where(m13, lse13, 0.0))
    out_ref[...] = jnp.where(lane == 0, jax.nn.sigmoid(y), y - offset)


def init_params(key, hidden=HIDDEN_SIZE):
    H = hidden
    ks = jax.random.split(key, 24)

    def rn(k, shape, scale=0.1):
        return (scale * jax.random.normal(k, shape)).astype(jnp.float32)

    p = {}
    # embedding tables (nn.Embedding)
    p['p_table'] = rn(ks[0], (49, 6))
    p['d_table'] = rn(ks[1], (12, 4))
    p['b_table'] = rn(ks[2], (72, 8))
    # fc_embedding: Linear(144, 16)
    p['w_emb'] = rn(ks[3], (18 * COND_WINDOW, 16))
    p['b_emb'] = rn(ks[4], (1, 16))
    # fc_t: Linear(133, 16)
    p['w_t'] = rn(ks[5], (133, 16))
    p['b_t'] = rn(ks[6], (1, 16))
    # input_linear: Linear(124, 64), stored transposed, split by input block
    w_in = rn(ks[7], (124, 64))
    p['b_in'] = rn(ks[8], (1, 64))
    p['w_in_c'] = w_in[0:20]       # pre_chord  (20)
    p['w_in_b'] = w_in[20:92]      # b_note     (72)
    p['w_in_e'] = w_in[92:108]     # embeddings (16)
    p['w_in_n'] = w_in[108:124]    # note_t fc  (16)
    # LSTM (2 layers), gate order i,f,g,o; biases b_ih+b_hh pre-summed
    p['wih0'] = rn(ks[9], (INPUT_SIZE, 4 * H))
    p['whh0'] = rn(ks[10], (H, 4 * H))
    p['bl0'] = rn(ks[11], (1, 4 * H))
    p['wih1'] = rn(ks[12], (H, 4 * H))
    p['whh1'] = rn(ks[13], (H, 4 * H))
    p['bl1'] = rn(ks[14], (1, 4 * H))
    # output heads
    p['wo1'] = rn(ks[15], (H, 1));   p['bo1'] = rn(ks[16], (1, 1))
    p['wo2'] = rn(ks[17], (H, 2));   p['bo2'] = rn(ks[18], (1, 2))
    p['wo4'] = rn(ks[19], (H, 4));   p['bo4'] = rn(ks[20], (1, 4))
    p['wo13'] = rn(ks[21], (H, 13)); p['bo13'] = rn(ks[22], (1, 13))
    return p


def _prepare_inputs(state, params):
    """Glue: split state, do the nn.Embedding gathers in plain JAX."""
    S, B, _ = state.shape
    cond = state[..., :24].astype(jnp.int32)
    p_idx, d_idx, b_idx = cond[..., 0:8], cond[..., 8:16], cond[..., 16:24]
    p_e = jnp.take(params['p_table'], p_idx, axis=0)   # (S,B,8,6)
    d_e = jnp.take(params['d_table'], d_idx, axis=0)   # (S,B,8,4)
    b_e = jnp.take(params['b_table'], b_idx, axis=0)   # (S,B,8,8)
    emb = jnp.concatenate([p_e, d_e, b_e], axis=-1).reshape(S, B, 18 * COND_WINDOW)
    note = state[..., 24:157]     # (S,B,133)  [pitch 49 | dur 12 | pos 72]
    chord = state[..., 157:177]   # chord_t_1 (S,B,20)
    return emb, note, chord


def _fold_params(params):
    """One-time weight prep (exact algebra; free layout plumbing off-device path).

    gx = x @ Wih0 + b0 with x = [chord|b_note|emb_fc|note_fc] @ W_in + b_in,
    emb_fc = emb @ W_emb + b_emb, note_fc = note @ W_t + b_t   (all linear)
      ==>  gx = [chord | note | emb] @ W_fold + b_fold
    Also builds the skewed recurrent weight and the concatenated head weights.
    """
    H = params['whh0'].shape[0]
    wih0 = params['wih0']
    w_chord = params['w_in_c'] @ wih0                               # (20, 4H)
    w_note = (params['w_t'] @ params['w_in_n']) @ wih0              # (133, 4H)
    w_note = w_note.at[61:133].add(params['w_in_b'] @ wih0)         # + b_note path
    w_embf = (params['w_emb'] @ params['w_in_e']) @ wih0            # (144, 4H)
    w_fold = jnp.concatenate([w_chord, w_note, w_embf], axis=0)     # (297, 4H)
    b_fold = ((params['b_in'] + params['b_emb'] @ params['w_in_e']
               + params['b_t'] @ params['w_in_n']) @ wih0
              + params['bl0'])                                      # (1, 4H)
    # Skew: [h0(t) | h1(t-1)] @ wbig = [h0(t)@Whh0 | gates1(t)-b1]
    wbig = jnp.concatenate([
        jnp.concatenate([params['whh0'], params['wih1']], axis=1),
        jnp.concatenate([jnp.zeros((H, 4 * H), jnp.float32),
                         params['whh1']], axis=1)], axis=0)          # (2H, 8H)
    w_heads = jnp.concatenate([params['wo1'], params['wo2'],
                               params['wo4'], params['wo13']], axis=1)  # (32,20)
    b_heads = jnp.concatenate([params['bo1'], params['bo2'],
                               params['bo4'], params['bo13']], axis=1)  # (1,20)
    return (w_fold.astype(MXU_DTYPE), b_fold.astype(jnp.float32),
            wbig.astype(MXU_DTYPE), params['bl1'].astype(jnp.float32),
            w_heads.astype(MXU_DTYPE), b_heads.astype(jnp.float32))


def pg_chord_forward(state, params):
    S, B, _ = state.shape
    H = params['whh0'].shape[0]
    BP = ((B + SUBLANE - 1) // SUBLANE) * SUBLANE     # batch padded to 8-row tile
    SBP = S * BP

    emb, note, chord = _prepare_inputs(state, params)
    # Single folded input slab, padded so every per-step tile is sublane-aligned.
    xin = jnp.concatenate([chord, note, emb], axis=-1)              # (S, B, 297)
    xin = jnp.pad(xin, ((0, 0), (0, BP - B), (0, 0)))               # (S, BP, 297)
    xin = xin.reshape(SBP, -1).astype(MXU_DTYPE)                    # (SBP, 297)

    w_fold, b_fold, wbig, bl1, w_heads, b_heads = _fold_params(params)

    vmem = pl.BlockSpec(memory_space=pltpu.MemorySpace.VMEM)
    out_shapes = (jax.ShapeDtypeStruct((SBP, 20), jnp.float32),
                  jax.ShapeDtypeStruct((N_LAYERS, BP, H), jnp.float32),
                  jax.ShapeDtypeStruct((N_LAYERS, BP, H), jnp.float32))

    packed, hn, cn = pl.pallas_call(
        pg_chord_kernel,
        out_shape=out_shapes,
        in_specs=[vmem] * 7,
        out_specs=(vmem, vmem, vmem),
        scratch_shapes=[pltpu.VMEM((SBP, 4 * H), jnp.float32),   # gate preacts
                        pltpu.VMEM((SBP, H), jnp.float32),       # h1 sequence
                        pltpu.VMEM((BP, 2 * H), jnp.float32)],   # [h0 | h1] state
    )(xin, w_fold, b_fold, wbig, bl1, w_heads, b_heads)

    # Split the lane-packed head output & drop batch padding in the wrapper.
    packed = packed.reshape(S, BP, 20)[:, :B]
    out1 = packed[..., 0:1]
    out2 = packed[..., 1:3]
    out4 = packed[..., 3:7]
    out13 = packed[..., 7:20]
    return out1, out2, out4, out13, (hn[:, :B], cn[:, :B])


def pg_chord_reference(state, params):
    """Pure-JAX reference mirroring the PyTorch forward (unfolded)."""
    S, B, _ = state.shape
    H = params['whh0'].shape[0]
    emb, note, chord = _prepare_inputs(state, params)
    bnote = note[..., 61:133]                                         # (S,B,72)
    emb_fc = emb @ params['w_emb'] + params['b_emb']
    note_fc = note @ params['w_t'] + params['b_t']
    inp = jnp.concatenate([chord, bnote, emb_fc, note_fc], axis=-1)   # (S,B,124)
    w_in = jnp.concatenate([params['w_in_c'], params['w_in_b'],
                            params['w_in_e'], params['w_in_n']], axis=0)
    x = inp @ w_in + params['b_in']                                   # (S,B,64)

    def cell(x_t, h, c, wih, whh, b):
        g = x_t @ wih + h @ whh + b
        i, f, gg, o = (jax.nn.sigmoid(g[:, 0:H]), jax.nn.sigmoid(g[:, H:2*H]),
                       jnp.tanh(g[:, 2*H:3*H]), jax.nn.sigmoid(g[:, 3*H:4*H]))
        c = f * c + i * gg
        return o * jnp.tanh(c), c

    h0 = c0 = h1 = c1 = jnp.zeros((B, H), jnp.float32)
    hs = []
    for t in range(S):
        h0, c0 = cell(x[t], h0, c0, params['wih0'], params['whh0'], params['bl0'])
        h1, c1 = cell(h0, h1, c1, params['wih1'], params['whh1'], params['bl1'])
        hs.append(h1)
    hseq = jnp.stack(hs)                                              # (S,B,H)
    o1 = jax.nn.sigmoid(hseq @ params['wo1'] + params['bo1'])
    o2 = jax.nn.log_softmax(hseq @ params['wo2'] + params['bo2'], axis=-1)
    o4 = jax.nn.log_softmax(hseq @ params['wo4'] + params['bo4'], axis=-1)
    o13 = jax.nn.log_softmax(hseq @ params['wo13'] + params['bo13'], axis=-1)
    hn = jnp.stack([h0, h1]); cn = jnp.stack([c0, c1])
    return o1, o2, o4, o13, (hn, cn)


if __name__ == "__main__":
    S, B = 8, 2  # seq_len, batch
    key = jax.random.PRNGKey(0)
    k1, k2, k3, k4, k5, kp = jax.random.split(key, 6)

    # state = [condition(24 int indices) | note one-hot-ish(133) | prev chord(20)]
    pitch = jax.random.randint(k1, (S, B, 8), 0, 49).astype(jnp.float32)
    dur = jax.random.randint(k2, (S, B, 8), 0, 12).astype(jnp.float32)
    pos = jax.random.randint(k3, (S, B, 8), 0, 72).astype(jnp.float32)
    note_part = jax.random.uniform(k4, (S, B, 133), dtype=jnp.float32)
    chord_part = jax.random.uniform(k5, (S, B, 20), dtype=jnp.float32)
    state = jnp.concatenate([pitch, dur, pos, note_part, chord_part], axis=-1)

    params = init_params(kp, HIDDEN_SIZE)

    out1, out2, out4, out13, (hn, cn) = jax.block_until_ready(
        pg_chord_forward(state, params))

    r1, r2, r4, r13, (rhn, rcn) = pg_chord_reference(state, params)
    for a, b in [(out1, r1), (out2, r2), (out4, r4), (out13, r13),
                 (hn, rhn), (cn, rcn)]:
        assert a.shape == b.shape
        assert jnp.all(jnp.isfinite(a))
        assert jnp.max(jnp.abs(a - b)) < 1e-3, float(jnp.max(jnp.abs(a - b)))

    print("KERNEL_OK")
</pallas_src>

<mosaic_0001>
module attributes {stable_mosaic.version = 11 : i64} {
  func.func @pg_chord_kernel(%arg0: memref<64x297xf32, #tpu.memory_space<vmem>>, %arg1: memref<297x128xf32, #tpu.memory_space<vmem>>, %arg2: memref<1x128xf32, #tpu.memory_space<vmem>>, %arg3: memref<64x256xf32, #tpu.memory_space<vmem>>, %arg4: memref<1x128xf32, #tpu.memory_space<vmem>>, %arg5: memref<32x20xf32, #tpu.memory_space<vmem>>, %arg6: memref<1x20xf32, #tpu.memory_space<vmem>>, %arg7: memref<64x20xf32, #tpu.memory_space<vmem>>, %arg8: memref<2x8x32xf32, #tpu.memory_space<vmem>>, %arg9: memref<2x8x32xf32, #tpu.memory_space<vmem>>, %arg10: memref<64x128xf32, #tpu.memory_space<vmem>>, %arg11: memref<64x32xf32, #tpu.memory_space<vmem>>, %arg12: memref<8x64xf32, #tpu.memory_space<vmem>>) attributes {dimension_semantics = [], scalar_prefetch = 0 : i64, scratch_operands = 3 : i64, tpu.core_type = #tpu.core_type<tc>} {
    %c0 = arith.constant 0 : index
    %c0_0 = arith.constant 0 : index
    %0 = vector.load %arg0[%c0, %c0_0] : memref<64x297xf32, #tpu.memory_space<vmem>>, vector<64x297xf32>
    %c0_1 = arith.constant 0 : index
    %c0_2 = arith.constant 0 : index
    %1 = vector.load %arg1[%c0_1, %c0_2] : memref<297x128xf32, #tpu.memory_space<vmem>>, vector<297x128xf32>
    %cst = arith.constant dense<0.000000e+00> : vector<64x128xf32>
    %2 = tpu.matmul %0, %1, %cst {dimension_numbers = #tpu.dot_dimension_numbers<[1], [0], [0], [1], [0, 0, 1, 1], [], []>} : vector<64x297xf32>, vector<297x128xf32>, vector<64x128xf32> -> vector<64x128xf32>
    %c0_3 = arith.constant 0 : index
    %c0_4 = arith.constant 0 : index
    %3 = vector.load %arg2[%c0_3, %c0_4] : memref<1x128xf32, #tpu.memory_space<vmem>>, vector<1x128xf32>
    %4 = vector.broadcast %3 : vector<1x128xf32> to vector<64x128xf32>
    %5 = arith.addf %2, %4 : vector<64x128xf32>
    %c0_5 = arith.constant 0 : index
    %c0_6 = arith.constant 0 : index
    %6 = vector.load %arg10[%c0_5, %c0_6] : memref<64x128xf32, #tpu.memory_space<vmem>>, vector<64x128xf32>
    tpu.vector_store %arg10[%c0_5, %c0_6], %5 {strides = array<i32>} : memref<64x128xf32, #tpu.memory_space<vmem>>, vector<64x128xf32>,
    %c0_7 = arith.constant 0 : index
    %c0_8 = arith.constant 0 : index
    %7 = vector.load %arg3[%c0_7, %c0_8] : memref<64x256xf32, #tpu.memory_space<vmem>>, vector<64x256xf32>
    %c0_9 = arith.constant 0 : index
    %c0_10 = arith.constant 0 : index
    %8 = vector.load %arg4[%c0_9, %c0_10] : memref<1x128xf32, #tpu.memory_space<vmem>>, vector<1x128xf32>
    %cst_11 = arith.constant 0.000000e+00 : f32
    %9 = vector.broadcast %cst_11 : f32 to vector<8x64xf32>
    %c0_12 = arith.constant 0 : index
    %c0_13 = arith.constant 0 : index
    %10 = vector.load %arg12[%c0_12, %c0_13] : memref<8x64xf32, #tpu.memory_space<vmem>>, vector<8x64xf32>
    tpu.vector_store %arg12[%c0_12, %c0_13], %9 {strides = array<i32>} : memref<8x64xf32, #tpu.memory_space<vmem>>, vector<8x64xf32>,
    %cst_14 = arith.constant 0.000000e+00 : f32
    %11 = vector.broadcast %cst_14 : f32 to vector<8x128xf32>
    %cst_15 = arith.constant 0.000000e+00 : f32
    %12 = vector.broadcast %cst_15 : f32 to vector<8x32xf32>
    %c0_i32 = arith.constant 0 : i32
    %c8_i32 = arith.constant 8 : i32
    %13 = arith.muli %c0_i32, %c8_i32 : i32
    %14 = tpu.assume_multiple %13, 8 : i32
    %15 = arith.index_cast %14 : i32 to index
    %c0_16 = arith.constant 0 : index
    %16 = vector.load %arg10[%15, %c0_16] : memref<64x128xf32, #tpu.memory_space<vmem>>, vector<8x128xf32>
    %17 = arith.addf %16, %11 : vector<8x128xf32>
    %18 = arith.negf %17 : vector<8x128xf32>
    %19 = math.exp %18 : vector<8x128xf32>
    %cst_17 = arith.constant 1.000000e+00 : f32
    %20 = vector.broadcast %cst_17 : f32 to vector<8x128xf32>
    %21 = arith.addf %20, %19 : vector<8x128xf32>
    %22 = arith.divf %20, %21 : vector<8x128xf32>
    %23 = math.tanh %17 : vector<8x128xf32>
    %24 = vector.extract_strided_slice %22 {offsets = [0, 0], sizes = [8, 32], strides = [1, 1]} : vector<8x128xf32> to vector<8x32xf32>
    %25 = vector.extract_strided_slice %22 {offsets = [0, 32], sizes = [8, 32], strides = [1, 1]} : vector<8x128xf32> to vector<8x32xf32>
    %26 = vector.extract_strided_slice %23 {offsets = [0, 64], sizes = [8, 32], strides = [1, 1]} : vector<8x128xf32> to vector<8x32xf32>
    %27 = vector.extract_strided_slice %22 {offsets = [0, 96], sizes = [8, 32], strides = [1, 1]} : vector<8x128xf32> to vector<8x32xf32>
    %28 = arith.mulf %25, %12 : vector<8x32xf32>
    %29 = arith.mulf %24, %26 : vector<8x32xf32>
    %30 = arith.addf %28, %29 : vector<8x32xf32>
    %31 = math.tanh %30 : vector<8x32xf32>
    %32 = arith.mulf %27, %31 : vector<8x32xf32>
    %c0_18 = arith.constant 0 : index
    %c0_19 = arith.constant 0 : index
    %33 = vector.load %arg12[%c0_18, %c0_19] : memref<8x64xf32, #tpu.memory_space<vmem>>, vector<8x32xf32>
    tpu.vector_store %arg12[%c0_18, %c0_19], %32 {strides = array<i32>} : memref<8x64xf32, #tpu.memory_space<vmem>>, vector<8x32xf32>,
    %c0_20 = arith.constant 0 : index
    %c0_21 = arith.constant 0 : index
    %34 = vector.load %arg12[%c0_20, %c0_21] : memref<8x64xf32, #tpu.memory_space<vmem>>, vector<8x64xf32>
    %cst_22 = arith.constant dense<0.000000e+00> : vector<8x256xf32>
    %35 = tpu.matmul %34, %7, %cst_22 {dimension_numbers = #tpu.dot_dimension_numbers<[1], [0], [0], [1], [0, 0, 1, 1], [], []>} : vector<8x64xf32>, vector<64x256xf32>, vector<8x256xf32> -> vector<8x256xf32>
    %36 = vector.extract_strided_slice %35 {offsets = [0, 128], sizes = [8, 128], strides = [1, 1]} : vector<8x256xf32> to vector<8x128xf32>
    %37 = vector.broadcast %8 : vector<1x128xf32> to vector<8x128xf32>
    %38 = arith.addf %36, %37 : vector<8x128xf32>
    %39 = arith.negf %38 : vector<8x128xf32>
    %40 = math.exp %39 : vector<8x128xf32>
    %cst_23 = arith.constant 1.000000e+00 : f32
    %41 = vector.broadcast %cst_23 : f32 to vector<8x128xf32>
    %42 = arith.addf %41, %40 : vector<8x128xf32>
    %43 = arith.divf %41, %42 : vector<8x128xf32>
    %44 = math.tanh %38 : vector<8x128xf32>
    %45 = vector.extract_strided_slice %43 {offsets = [0, 0], sizes = [8, 32], strides = [1, 1]} : vector<8x128xf32> to vector<8x32xf32>
    %46 = vector.extract_strided_slice %43 {offsets = [0, 32], sizes = [8, 32], strides = [1, 1]} : vector<8x128xf32> to vector<8x32xf32>
    %47 = vector.extract_strided_slice %44 {offsets = [0, 64], sizes = [8, 32], strides = [1, 1]} : vector<8x128xf32> to vector<8x32xf32>
    %48 = vector.extract_strided_slice %43 {offsets = [0, 96], sizes = [8, 32], strides = [1, 1]} : vector<8x128xf32> to vector<8x32xf32>
    %49 = arith.mulf %46, %12 : vector<8x32xf32>
    %50 = arith.mulf %45, %47 : vector<8x32xf32>
    %51 = arith.addf %49, %50 : vector<8x32xf32>
    %52 = math.tanh %51 : vector<8x32xf32>
    %53 = arith.mulf %48, %52 : vector<8x32xf32>
    %c0_24 = arith.constant 0 : index
    %c32 = arith.constant 32 : index
    %54 = vector.load %arg12[%c0_24, %c32] : memref<8x64xf32, #tpu.memory_space<vmem>>, vector<8x32xf32>
    tpu.vector_store %arg12[%c0_24, %c32], %53 {strides = array<i32>} : memref<8x64xf32, #tpu.memory_space<vmem>>, vector<8x32xf32>,
    %55 = arith.index_cast %14 : i32 to index
    %c0_25 = arith.constant 0 : index
    %56 = vector.load %arg11[%55, %c0_25] : memref<64x32xf32, #tpu.memory_space<vmem>>, vector<8x32xf32>
    tpu.vector_store %arg11[%55, %c0_25], %53 {strides = array<i32>} : memref<64x32xf32, #tpu.memory_space<vmem>>, vector<8x32xf32>,
    %57 = vector.extract_strided_slice %35 {offsets = [0, 0], sizes = [8, 128], strides = [1, 1]} : vector<8x256xf32> to vector<8x128xf32>
    %c1_i32 = arith.constant 1 : i32
    %c8_i32_26 = arith.constant 8 : i32
    %58 = arith.muli %c1_i32, %c8_i32_26 : i32
    %59 = tpu.assume_multiple %58, 8 : i32
    %60 = arith.index_cast %59 : i32 to index
    %c0_27 = arith.constant 0 : index
    %61 = vector.load %arg10[%60, %c0_27] : memref<64x128xf32, #tpu.memory_space<vmem>>, vector<8x128xf32>
    %62 = arith.addf %61, %57 : vector<8x128xf32>
    %63 = arith.negf %62 : vector<8x128xf32>
    %64 = math.exp %63 : vector<8x128xf32>
    %cst_28 = arith.constant 1.000000e+00 : f32
    %65 = vector.broadcast %cst_28 : f32 to vector<8x128xf32>
    %66 = arith.addf %65, %64 : vector<8x128xf32>
    %67 = arith.divf %65, %66 : vector<8x128xf32>
    %68 = math.tanh %62 : vector<8x128xf32>
    %69 = vector.extract_strided_slice %67 {offsets = [0, 0], sizes = [8, 32], strides = [1, 1]} : vector<8x128xf32> to vector<8x32xf32>
    %70 = vector.extract_strided_slice %67 {offsets = [0, 32], sizes = [8, 32], strides = [1, 1]} : vector<8x128xf32> to vector<8x32xf32>
    %71 = vector.extract_strided_slice %68 {offsets = [0, 64], sizes = [8, 32], strides = [1, 1]} : vector<8x128xf32> to vector<8x32xf32>
    %72 = vector.extract_strided_slice %67 {offsets = [0, 96], sizes = [8, 32], strides = [1, 1]} : vector<8x128xf32> to vector<8x32xf32>
    %73 = arith.mulf %70, %30 : vector<8x32xf32>
    %74 = arith.mulf %69, %71 : vector<8x32xf32>
    %75 = arith.addf %73, %74 : vector<8x32xf32>
    %76 = math.tanh %75 : vector<8x32xf32>
    %77 = arith.mulf %72, %76 : vector<8x32xf32>
    %c0_29 = arith.constant 0 : index
    %c0_30 = arith.constant 0 : index
    %78 = vector.load %arg12[%c0_29, %c0_30] : memref<8x64xf32, #tpu.memory_space<vmem>>, vector<8x32xf32>
    tpu.vector_store %arg12[%c0_29, %c0_30], %77 {strides = array<i32>} : memref<8x64xf32, #tpu.memory_space<vmem>>, vector<8x32xf32>,
    %c0_31 = arith.constant 0 : index
    %c0_32 = arith.constant 0 : index
    %79 = vector.load %arg12[%c0_31, %c0_32] : memref<8x64xf32, #tpu.memory_space<vmem>>, vector<8x64xf32>
    %cst_33 = arith.constant dense<0.000000e+00> : vector<8x256xf32>
    %80 = tpu.matmul %79, %7, %cst_33 {dimension_numbers = #tpu.dot_dimension_numbers<[1], [0], [0], [1], [0, 0, 1, 1], [], []>} : vector<8x64xf32>, vector<64x256xf32>, vector<8x256xf32> -> vector<8x256xf32>
    %81 = vector.extract_strided_slice %80 {offsets = [0, 128], sizes = [8, 128], strides = [1, 1]} : vector<8x256xf32> to vector<8x128xf32>
    %82 = vector.broadcast %8 : vector<1x128xf32> to vector<8x128xf32>
    %83 = arith.addf %81, %82 : vector<8x128xf32>
    %84 = arith.negf %83 : vector<8x128xf32>
    %85 = math.exp %84 : vector<8x128xf32>
    %cst_34 = arith.constant 1.000000e+00 : f32
    %86 = vector.broadcast %cst_34 : f32 to vector<8x128xf32>
    %87 = arith.addf %86, %85 : vector<8x128xf32>
    %88 = arith.divf %86, %87 : vector<8x128xf32>
    %89 = math.tanh %83 : vector<8x128xf32>
    %90 = vector.extract_strided_slice %88 {offsets = [0, 0], sizes = [8, 32], strides = [1, 1]} : vector<8x128xf32> to vector<8x32xf32>
    %91 = vector.extract_strided_slice %88 {offsets = [0, 32], sizes = [8, 32], strides = [1, 1]} : vector<8x128xf32> to vector<8x32xf32>
    %92 = vector.extract_strided_slice %89 {offsets = [0, 64], sizes = [8, 32], strides = [1, 1]} : vector<8x128xf32> to vector<8x32xf32>
    %93 = vector.extract_strided_slice %88 {offsets = [0, 96], sizes = [8, 32], strides = [1, 1]} : vector<8x128xf32> to vector<8x32xf32>
    %94 = arith.mulf %91, %51 : vector<8x32xf32>
    %95 = arith.mulf %90, %92 : vector<8x32xf32>
    %96 = arith.addf %94, %95 : vector<8x32xf32>
    %97 = math.tanh %96 : vector<8x32xf32>
    %98 = arith.mulf %93, %97 : vector<8x32xf32>
    %c0_35 = arith.constant 0 : index
    %c32_36 = arith.constant 32 : index
    %99 = vector.load %arg12[%c0_35, %c32_36] : memref<8x64xf32, #tpu.memory_space<vmem>>, vector<8x32xf32>
    tpu.vector_store %arg12[%c0_35, %c32_36], %98 {strides = array<i32>} : memref<8x64xf32, #tpu.memory_space<vmem>>, vector<8x32xf32>,
    %100 = arith.index_cast %59 : i32 to index
    %c0_37 = arith.constant 0 : index
    %101 = vector.load %arg11[%100, %c0_37] : memref<64x32xf32, #tpu.memory_space<vmem>>, vector<8x32xf32>
    tpu.vector_store %arg11[%100, %c0_37], %98 {strides = array<i32>} : memref<64x32xf32, #tpu.memory_space<vmem>>, vector<8x32xf32>,
    %102 = vector.extract_strided_slice %80 {offsets = [0, 0], sizes = [8, 128], strides = [1, 1]} : vector<8x256xf32> to vector<8x128xf32>
    %c2_i32 = arith.constant 2 : i32
    %c8_i32_38 = arith.constant 8 : i32
    %103 = arith.muli %c2_i32, %c8_i32_38 : i32
    %104 = tpu.assume_multiple %103, 8 : i32
    %105 = arith.index_cast %104 : i32 to index
    %c0_39 = arith.constant 0 : index
    %106 = vector.load %arg10[%105, %c0_39] : memref<64x128xf32, #tpu.memory_space<vmem>>, vector<8x128xf32>
    %107 = arith.addf %106, %102 : vector<8x128xf32>
    %108 = arith.negf %107 : vector<8x128xf32>
    %109 = math.exp %108 : vector<8x128xf32>
    %cst_40 = arith.constant 1.000000e+00 : f32
    %110 = vector.broadcast %cst_40 : f32 to vector<8x128xf32>
    %111 = arith.addf %110, %109 : vector<8x128xf32>
    %112 = arith.divf %110, %111 : vector<8x128xf32>
    %113 = math.tanh %107 : vector<8x128xf32>
    %114 = vector.extract_strided_slice %112 {offsets = [0, 0], sizes = [8, 32], strides = [1, 1]} : vector<8x128xf32> to vector<8x32xf32>
    %115 = vector.extract_strided_slice %112 {offsets = [0, 32], sizes = [8, 32], strides = [1, 1]} : vector<8x128xf32> to vector<8x32xf32>
    %116 = vector.extract_strided_slice %113 {offsets = [0, 64], sizes = [8, 32], strides = [1, 1]} : vector<8x128xf32> to vector<8x32xf32>
    %117 = vector.extract_strided_slice %112 {offsets = [0, 96], sizes = [8, 32], strides = [1, 1]} : vector<8x128xf32> to vector<8x32xf32>
    %118 = arith.mulf %115, %75 : vector<8x32xf32>
    %119 = arith.mulf %114, %116 : vector<8x32xf32>
    %120 = arith.addf %118, %119 : vector<8x32xf32>
    %121 = math.tanh %120 : vector<8x32xf32>
    %122 = arith.mulf %117, %121 : vector<8x32xf32>
    %c0_41 = arith.constant 0 : index
    %c0_42 = arith.constant 0 : index
    %123 = vector.load %arg12[%c0_41, %c0_42] : memref<8x64xf32, #tpu.memory_space<vmem>>, vector<8x32xf32>
    tpu.vector_store %arg12[%c0_41, %c0_42], %122 {strides = array<i32>} : memref<8x64xf32, #tpu.memory_space<vmem>>, vector<8x32xf32>,
    %c0_43 = arith.constant 0 : index
    %c0_44 = arith.constant 0 : index
    %124 = vector.load %arg12[%c0_43, %c0_44] : memref<8x64xf32, #tpu.memory_space<vmem>>, vector<8x64xf32>
    %cst_45 = arith.constant dense<0.000000e+00> : vector<8x256xf32>
    %125 = tpu.matmul %124, %7, %cst_45 {dimension_numbers = #tpu.dot_dimension_numbers<[1], [0], [0], [1], [0, 0, 1, 1], [], []>} : vector<8x64xf32>, vector<64x256xf32>, vector<8x256xf32> -> vector<8x256xf32>
    %126 = vector.extract_strided_slice %125 {offsets = [0, 128], sizes = [8, 128], strides = [1, 1]} : vector<8x256xf32> to vector<8x128xf32>
    %127 = vector.broadcast %8 : vector<1x128xf32> to vector<8x128xf32>
    %128 = arith.addf %126, %127 : vector<8x128xf32>
    %129 = arith.negf %128 : vector<8x128xf32>
    %130 = math.exp %129 : vector<8x128xf32>
    %cst_46 = arith.constant 1.000000e+00 : f32
    %131 = vector.broadcast %cst_46 : f32 to vector<8x128xf32>
    %132 = arith.addf %131, %130 : vector<8x128xf32>
    %133 = arith.divf %131, %132 : vector<8x128xf32>
    %134 = math.tanh %128 : vector<8x128xf32>
    %135 = vector.extract_strided_slice %133 {offsets = [0, 0], sizes = [8, 32], strides = [1, 1]} : vector<8x128xf32> to vector<8x32xf32>
    %136 = vector.extract_strided_slice %133 {offsets = [0, 32], sizes = [8, 32], strides = [1, 1]} : vector<8x128xf32> to vector<8x32xf32>
    %137 = vector.extract_strided_slice %134 {offsets = [0, 64], sizes = [8, 32], strides = [1, 1]} : vector<8x128xf32> to vector<8x32xf32>
    %138 = vector.extract_strided_slice %133 {offsets = [0, 96], sizes = [8, 32], strides = [1, 1]} : vector<8x128xf32> to vector<8x32xf32>
    %139 = arith.mulf %136, %96 : vector<8x32xf32>
    %140 = arith.mulf %135, %137 : vector<8x32xf32>
    %141 = arith.addf %139, %140 : vector<8x32xf32>
    %142 = math.tanh %141 : vector<8x32xf32>
    %143 = arith.mulf %138, %142 : vector<8x32xf32>
    %c0_47 = arith.constant 0 : index
    %c32_48 = arith.constant 32 : index
    %144 = vector.load %arg12[%c0_47, %c32_48] : memref<8x64xf32, #tpu.memory_space<vmem>>, vector<8x32xf32>
    tpu.vector_store %arg12[%c0_47, %c32_48], %143 {strides = array<i32>} : memref<8x64xf32, #tpu.memory_space<vmem>>, vector<8x32xf32>,
    %145 = arith.index_cast %104 : i32 to index
    %c0_49 = arith.constant 0 : index
    %146 = vector.load %arg11[%145, %c0_49] : memref<64x32xf32, #tpu.memory_space<vmem>>, vector<8x32xf32>
    tpu.vector_store %arg11[%145, %c0_49], %143 {strides = array<i32>} : memref<64x32xf32, #tpu.memory_space<vmem>>, vector<8x32xf32>,
    %147 = vector.extract_strided_slice %125 {offsets = [0, 0], sizes = [8, 128], strides = [1, 1]} : vector<8x256xf32> to vector<8x128xf32>
    %c3_i32 = arith.constant 3 : i32
    %c8_i32_50 = arith.constant 8 : i32
    %148 = arith.muli %c3_i32, %c8_i32_50 : i32
    %149 = tpu.assume_multiple %148, 8 : i32
    %150 = arith.index_cast %149 : i32 to index
    %c0_51 = arith.constant 0 : index
    %151 = vector.load %arg10[%150, %c0_51] : memref<64x128xf32, #tpu.memory_space<vmem>>, vector<8x128xf32>
    %152 = arith.addf %151, %147 : vector<8x128xf32>
    %153 = arith.negf %152 : vector<8x128xf32>
    %154 = math.exp %153 : vector<8x128xf32>
    %cst_52 = arith.constant 1.000000e+00 : f32
    %155 = vector.broadcast %cst_52 : f32 to vector<8x128xf32>
    %156 = arith.addf %155, %154 : vector<8x128xf32>
    %157 = arith.divf %155, %156 : vector<8x128xf32>
    %158 = math.tanh %152 : vector<8x128xf32>
    %159 = vector.extract_strided_slice %157 {offsets = [0, 0], sizes = [8, 32], strides = [1, 1]} : vector<8x128xf32> to vector<8x32xf32>
    %160 = vector.extract_strided_slice %157 {offsets = [0, 32], sizes = [8, 32], strides = [1, 1]} : vector<8x128xf32> to vector<8x32xf32>
    %161 = vector.extract_strided_slice %158 {offsets = [0, 64], sizes = [8, 32], strides = [1, 1]} : vector<8x128xf32> to vector<8x32xf32>
    %162 = vector.extract_strided_slice %157 {offsets = [0, 96], sizes = [8, 32], strides = [1, 1]} : vector<8x128xf32> to vector<8x32xf32>
    %163 = arith.mulf %160, %120 : vector<8x32xf32>
    %164 = arith.mulf %159, %161 : vector<8x32xf32>
    %165 = arith.addf %163, %164 : vector<8x32xf32>
    %166 = math.tanh %165 : vector<8x32xf32>
    %167 = arith.mulf %162, %166 : vector<8x32xf32>
    %c0_53 = arith.constant 0 : index
    %c0_54 = arith.constant 0 : index
    %168 = vector.load %arg12[%c0_53, %c0_54] : memref<8x64xf32, #tpu.memory_space<vmem>>, vector<8x32xf32>
    tpu.vector_store %arg12[%c0_53, %c0_54], %167 {strides = array<i32>} : memref<8x64xf32, #tpu.memory_space<vmem>>, vector<8x32xf32>,
    %c0_55 = arith.constant 0 : index
    %c0_56 = arith.constant 0 : index
    %169 = vector.load %arg12[%c0_55, %c0_56] : memref<8x64xf32, #tpu.memory_space<vmem>>, vector<8x64xf32>
    %cst_57 = arith.constant dense<0.000000e+00> : vector<8x256xf32>
    %170 = tpu.matmul %169, %7, %cst_57 {dimension_numbers = #tpu.dot_dimension_numbers<[1], [0], [0], [1], [0, 0, 1, 1], [], []>} : vector<8x64xf32>, vector<64x256xf32>, vector<8x256xf32> -> vector<8x256xf32>
    %171 = vector.extract_strided_slice %170 {offsets = [0, 128], sizes = [8, 128], strides = [1, 1]} : vector<8x256xf32> to vector<8x128xf32>
    %172 = vector.broadcast %8 : vector<1x128xf32> to vector<8x128xf32>
    %173 = arith.addf %171, %172 : vector<8x128xf32>
    %174 = arith.negf %173 : vector<8x128xf32>
    %175 = math.exp %174 : vector<8x128xf32>
    %cst_58 = arith.constant 1.000000e+00 : f32
    %176 = vector.broadcast %cst_58 : f32 to vector<8x128xf32>
    %177 = arith.addf %176, %175 : vector<8x128xf32>
    %178 = arith.divf %176, %177 : vector<8x128xf32>
    %179 = math.tanh %173 : vector<8x128xf32>
    %180 = vector.extract_strided_slice %178 {offsets = [0, 0], sizes = [8, 32], strides = [1, 1]} : vector<8x128xf32> to vector<8x32xf32>
    %181 = vector.extract_strided_slice %178 {offsets = [0, 32], sizes = [8, 32], strides = [1, 1]} : vector<8x128xf32> to vector<8x32xf32>
    %182 = vector.extract_strided_slice %179 {offsets = [0, 64], sizes = [8, 32], strides = [1, 1]} : vector<8x128xf32> to vector<8x32xf32>
    %183 = vector.extract_strided_slice %178 {offsets = [0, 96], sizes = [8, 32], strides = [1, 1]} : vector<8x128xf32> to vector<8x32xf32>
    %184 = arith.mulf %181, %141 : vector<8x32xf32>
    %185 = arith.mulf %180, %182 : vector<8x32xf32>
    %186 = arith.addf %184, %185 : vector<8x32xf32>
    %187 = math.tanh %186 : vector<8x32xf32>
    %188 = arith.mulf %183, %187 : vector<8x32xf32>
    %c0_59 = arith.constant 0 : index
    %c32_60 = arith.constant 32 : index
    %189 = vector.load %arg12[%c0_59, %c32_60] : memref<8x64xf32, #tpu.memory_space<vmem>>, vector<8x32xf32>
    tpu.vector_store %arg12[%c0_59, %c32_60], %188 {strides = array<i32>} : memref<8x64xf32, #tpu.memory_space<vmem>>, vector<8x32xf32>,
    %190 = arith.index_cast %149 : i32 to index
    %c0_61 = arith.constant 0 : index
    %191 = vector.load %arg11[%190, %c0_61] : memref<64x32xf32, #tpu.memory_space<vmem>>, vector<8x32xf32>
    tpu.vector_store %arg11[%190, %c0_61], %188 {strides = array<i32>} : memref<64x32xf32, #tpu.memory_space<vmem>>, vector<8x32xf32>,
    %192 = vector.extract_strided_slice %170 {offsets = [0, 0], sizes = [8, 128], strides = [1, 1]} : vector<8x256xf32> to vector<8x128xf32>
    %c4_i32 = arith.constant 4 : i32
    %c8_i32_62 = arith.constant 8 : i32
    %193 = arith.muli %c4_i32, %c8_i32_62 : i32
    %194 = tpu.assume_multiple %193, 8 : i32
    %195 = arith.index_cast %194 : i32 to index
    %c0_63 = arith.constant 0 : index
    %196 = vector.load %arg10[%195, %c0_63] : memref<64x128xf32, #tpu.memory_space<vmem>>, vector<8x128xf32>
    %197 = arith.addf %196, %192 : vector<8x128xf32>
    %198 = arith.negf %197 : vector<8x128xf32>
    %199 = math.exp %198 : vector<8x128xf32>
    %cst_64 = arith.constant 1.000000e+00 : f32
    %200 = vector.broadcast %cst_64 : f32 to vector<8x128xf32>
    %201 = arith.addf %200, %199 : vector<8x128xf32>
    %202 = arith.divf %200, %201 : vector<8x128xf32>
    %203 = math.tanh %197 : vector<8x128xf32>
    %204 = vector.extract_strided_slice %202 {offsets = [0, 0], sizes = [8, 32], strides = [1, 1]} : vector<8x128xf32> to vector<8x32xf32>
    %205 = vector.extract_strided_slice %202 {offsets = [0, 32], sizes = [8, 32], strides = [1, 1]} : vector<8x128xf32> to vector<8x32xf32>
    %206 = vector.extract_strided_slice %203 {offsets = [0, 64], sizes = [8, 32], strides = [1, 1]} : vector<8x128xf32> to vector<8x32xf32>
    %207 = vector.extract_strided_slice %202 {offsets = [0, 96], sizes = [8, 32], strides = [1, 1]} : vector<8x128xf32> to vector<8x32xf32>
    %208 = arith.mulf %205, %165 : vector<8x32xf32>
    %209 = arith.mulf %204, %206 : vector<8x32xf32>
    %210 = arith.addf %208, %209 : vector<8x32xf32>
    %211 = math.tanh %210 : vector<8x32xf32>
    %212 = arith.mulf %207, %211 : vector<8x32xf32>
    %c0_65 = arith.constant 0 : index
    %c0_66 = arith.constant 0 : index
    %213 = vector.load %arg12[%c0_65, %c0_66] : memref<8x64xf32, #tpu.memory_space<vmem>>, vector<8x32xf32>
    tpu.vector_store %arg12[%c0_65, %c0_66], %212 {strides = array<i32>} : memref<8x64xf32, #tpu.memory_space<vmem>>, vector<8x32xf32>,
    %c0_67 = arith.constant 0 : index
    %c0_68 = arith.constant 0 : index
    %214 = vector.load %arg12[%c0_67, %c0_68] : memref<8x64xf32, #tpu.memory_space<vmem>>, vector<8x64xf32>
    %cst_69 = arith.constant dense<0.000000e+00> : vector<8x256xf32>
    %215 = tpu.matmul %214, %7, %cst_69 {dimension_numbers = #tpu.dot_dimension_numbers<[1], [0], [0], [1], [0, 0, 1, 1], [], []>} : vector<8x64xf32>, vector<64x256xf32>, vector<8x256xf32> -> vector<8x256xf32>
    %216 = vector.extract_strided_slice %215 {offsets = [0, 128], sizes = [8, 128], strides = [1, 1]} : vector<8x256xf32> to vector<8x128xf32>
    %217 = vector.broadcast %8 : vector<1x128xf32> to vector<8x128xf32>
    %218 = arith.addf %216, %217 : vector<8x128xf32>
    %219 = arith.negf %218 : vector<8x128xf32>
    %220 = math.exp %219 : vector<8x128xf32>
    %cst_70 = arith.constant 1.000000e+00 : f32
    %221 = vector.broadcast %cst_70 : f32 to vector<8x128xf32>
    %222 = arith.addf %221, %220 : vector<8x128xf32>
    %223 = arith.divf %221, %222 : vector<8x128xf32>
    %224 = math.tanh %218 : vector<8x128xf32>
    %225 = vector.extract_strided_slice %223 {offsets = [0, 0], sizes = [8, 32], strides = [1, 1]} : vector<8x128xf32> to vector<8x32xf32>
    %226 = vector.extract_strided_slice %223 {offsets = [0, 32], sizes = [8, 32], strides = [1, 1]} : vector<8x128xf32> to vector<8x32xf32>
    %227 = vector.extract_strided_slice %224 {offsets = [0, 64], sizes = [8, 32], strides = [1, 1]} : vector<8x128xf32> to vector<8x32xf32>
    %228 = vector.extract_strided_slice %223 {offsets = [0, 96], sizes = [8, 32], strides = [1, 1]} : vector<8x128xf32> to vector<8x32xf32>
    %229 = arith.mulf %226, %186 : vector<8x32xf32>
    %230 = arith.mulf %225, %227 : vector<8x32xf32>
    %231 = arith.addf %229, %230 : vector<8x32xf32>
    %232 = math.tanh %231 : vector<8x32xf32>
    %233 = arith.mulf %228, %232 : vector<8x32xf32>
    %c0_71 = arith.constant 0 : index
    %c32_72 = arith.constant 32 : index
    %234 = vector.load %arg12[%c0_71, %c32_72] : memref<8x64xf32, #tpu.memory_space<vmem>>, vector<8x32xf32>
    tpu.vector_store %arg12[%c0_71, %c32_72], %233 {strides = array<i32>} : memref<8x64xf32, #tpu.memory_space<vmem>>, vector<8x32xf32>,
    %235 = arith.index_cast %194 : i32 to index
    %c0_73 = arith.constant 0 : index
    %236 = vector.load %arg11[%235, %c0_73] : memref<64x32xf32, #tpu.memory_space<vmem>>, vector<8x32xf32>
    tpu.vector_store %arg11[%235, %c0_73], %233 {strides = array<i32>} : memref<64x32xf32, #tpu.memory_space<vmem>>, vector<8x32xf32>,
    %237 = vector.extract_strided_slice %215 {offsets = [0, 0], sizes = [8, 128], strides = [1, 1]} : vector<8x256xf32> to vector<8x128xf32>
    %c5_i32 = arith.constant 5 : i32
    %c8_i32_74 = arith.constant 8 : i32
    %238 = arith.muli %c5_i32, %c8_i32_74 : i32
    %239 = tpu.assume_multiple %238, 8 : i32
    %240 = arith.index_cast %239 : i32 to index
    %c0_75 = arith.constant 0 : index
    %241 = vector.load %arg10[%240, %c0_75] : memref<64x128xf32, #tpu.memory_space<vmem>>, vector<8x128xf32>
    %242 = arith.addf %241, %237 : vector<8x128xf32>
    %243 = arith.negf %242 : vector<8x128xf32>
    %244 = math.exp %243 : vector<8x128xf32>
    %cst_76 = arith.constant 1.000000e+00 : f32
    %245 = vector.broadcast %cst_76 : f32 to vector<8x128xf32>
    %246 = arith.addf %245, %244 : vector<8x128xf32>
    %247 = arith.divf %245, %246 : vector<8x128xf32>
    %248 = math.tanh %242 : vector<8x128xf32>
    %249 = vector.extract_strided_slice %247 {offsets = [0, 0], sizes = [8, 32], strides = [1, 1]} : vector<8x128xf32> to vector<8x32xf32>
    %250 = vector.extract_strided_slice %247 {offsets = [0, 32], sizes = [8, 32], strides = [1, 1]} : vector<8x128xf32> to vector<8x32xf32>
    %251 = vector.extract_strided_slice %248 {offsets = [0, 64], sizes = [8, 32], strides = [1, 1]} : vector<8x128xf32> to vector<8x32xf32>
    %252 = vector.extract_strided_slice %247 {offsets = [0, 96], sizes = [8, 32], strides = [1, 1]} : vector<8x128xf32> to vector<8x32xf32>
    %253 = arith.mulf %250, %210 : vector<8x32xf32>
    %254 = arith.mulf %249, %251 : vector<8x32xf32>
    %255 = arith.addf %253, %254 : vector<8x32xf32>
    %256 = math.tanh %255 : vector<8x32xf32>
    %257 = arith.mulf %252, %256 : vector<8x32xf32>
    %c0_77 = arith.constant 0 : index
    %c0_78 = arith.constant 0 : index
    %258 = vector.load %arg12[%c0_77, %c0_78] : memref<8x64xf32, #tpu.memory_space<vmem>>, vector<8x32xf32>
    tpu.vector_store %arg12[%c0_77, %c0_78], %257 {strides = array<i32>} : memref<8x64xf32, #tpu.memory_space<vmem>>, vector<8x32xf32>,
    %c0_79 = arith.constant 0 : index
    %c0_80 = arith.constant 0 : index
    %259 = vector.load %arg12[%c0_79, %c0_80] : memref<8x64xf32, #tpu.memory_space<vmem>>, vector<8x64xf32>
    %cst_81 = arith.constant dense<0.000000e+00> : vector<8x256xf32>
    %260 = tpu.matmul %259, %7, %cst_81 {dimension_numbers = #tpu.dot_dimension_numbers<[1], [0], [0], [1], [0, 0, 1, 1], [], []>} : vector<8x64xf32>, vector<64x256xf32>, vector<8x256xf32> -> vector<8x256xf32>
    %261 = vector.extract_strided_slice %260 {offsets = [0, 128], sizes = [8, 128], strides = [1, 1]} : vector<8x256xf32> to vector<8x128xf32>
    %262 = vector.broadcast %8 : vector<1x128xf32> to vector<8x128xf32>
    %263 = arith.addf %261, %262 : vector<8x128xf32>
    %264 = arith.negf %263 : vector<8x128xf32>
    %265 = math.exp %264 : vector<8x128xf32>
    %cst_82 = arith.constant 1.000000e+00 : f32
    %266 = vector.broadcast %cst_82 : f32 to vector<8x128xf32>
    %267 = arith.addf %266, %265 : vector<8x128xf32>
    %268 = arith.divf %266, %267 : vector<8x128xf32>
    %269 = math.tanh %263 : vector<8x128xf32>
    %270 = vector.extract_strided_slice %268 {offsets = [0, 0], sizes = [8, 32], strides = [1, 1]} : vector<8x128xf32> to vector<8x32xf32>
    %271 = vector.extract_strided_slice %268 {offsets = [0, 32], sizes = [8, 32], strides = [1, 1]} : vector<8x128xf32> to vector<8x32xf32>
    %272 = vector.extract_strided_slice %269 {offsets = [0, 64], sizes = [8, 32], strides = [1, 1]} : vector<8x128xf32> to vector<8x32xf32>
    %273 = vector.extract_strided_slice %268 {offsets = [0, 96], sizes = [8, 32], strides = [1, 1]} : vector<8x128xf32> to vector<8x32xf32>
    %274 = arith.mulf %271, %231 : vector<8x32xf32>
    %275 = arith.mulf %270, %272 : vector<8x32xf32>
    %276 = arith.addf %274, %275 : vector<8x32xf32>
    %277 = math.tanh %276 : vector<8x32xf32>
    %278 = arith.mulf %273, %277 : vector<8x32xf32>
    %c0_83 = arith.constant 0 : index
    %c32_84 = arith.constant 32 : index
    %279 = vector.load %arg12[%c0_83, %c32_84] : memref<8x64xf32, #tpu.memory_space<vmem>>, vector<8x32xf32>
    tpu.vector_store %arg12[%c0_83, %c32_84], %278 {strides = array<i32>} : memref<8x64xf32, #tpu.memory_space<vmem>>, vector<8x32xf32>,
    %280 = arith.index_cast %239 : i32 to index
    %c0_85 = arith.constant 0 : index
    %281 = vector.load %arg11[%280, %c0_85] : memref<64x32xf32, #tpu.memory_space<vmem>>, vector<8x32xf32>
    tpu.vector_store %arg11[%280, %c0_85], %278 {strides = array<i32>} : memref<64x32xf32, #tpu.memory_space<vmem>>, vector<8x32xf32>,
    %282 = vector.extract_strided_slice %260 {offsets = [0, 0], sizes = [8, 128], strides = [1, 1]} : vector<8x256xf32> to vector<8x128xf32>
    %c6_i32 = arith.constant 6 : i32
    %c8_i32_86 = arith.constant 8 : i32
    %283 = arith.muli %c6_i32, %c8_i32_86 : i32
    %284 = tpu.assume_multiple %283, 8 : i32
    %285 = arith.index_cast %284 : i32 to index
    %c0_87 = arith.constant 0 : index
    %286 = vector.load %arg10[%285, %c0_87] : memref<64x128xf32, #tpu.memory_space<vmem>>, vector<8x128xf32>
    %287 = arith.addf %286, %282 : vector<8x128xf32>
    %288 = arith.negf %287 : vector<8x128xf32>
    %289 = math.exp %288 : vector<8x128xf32>
    %cst_88 = arith.constant 1.000000e+00 : f32
    %290 = vector.broadcast %cst_88 : f32 to vector<8x128xf32>
    %291 = arith.addf %290, %289 : vector<8x128xf32>
    %292 = arith.divf %290, %291 : vector<8x128xf32>
    %293 = math.tanh %287 : vector<8x128xf32>
    %294 = vector.extract_strided_slice %292 {offsets = [0, 0], sizes = [8, 32], strides = [1, 1]} : vector<8x128xf32> to vector<8x32xf32>
    %295 = vector.extract_strided_slice %292 {offsets = [0, 32], sizes = [8, 32], strides = [1, 1]} : vector<8x128xf32> to vector<8x32xf32>
    %296 = vector.extract_strided_slice %293 {offsets = [0, 64], sizes = [8, 32], strides = [1, 1]} : vector<8x128xf32> to vector<8x32xf32>
    %297 = vector.extract_strided_slice %292 {offsets = [0, 96], sizes = [8, 32], strides = [1, 1]} : vector<8x128xf32> to vector<8x32xf32>
    %298 = arith.mulf %295, %255 : vector<8x32xf32>
    %299 = arith.mulf %294, %296 : vector<8x32xf32>
    %300 = arith.addf %298, %299 : vector<8x32xf32>
    %301 = math.tanh %300 : vector<8x32xf32>
    %302 = arith.mulf %297, %301 : vector<8x32xf32>
    %c0_89 = arith.constant 0 : index
    %c0_90 = arith.constant 0 : index
    %303 = vector.load %arg12[%c0_89, %c0_90] : memref<8x64xf32, #tpu.memory_space<vmem>>, vector<8x32xf32>
    tpu.vector_store %arg12[%c0_89, %c0_90], %302 {strides = array<i32>} : memref<8x64xf32, #tpu.memory_space<vmem>>, vector<8x32xf32>,
    %c0_91 = arith.constant 0 : index
    %c0_92 = arith.constant 0 : index
    %304 = vector.load %arg12[%c0_91, %c0_92] : memref<8x64xf32, #tpu.memory_space<vmem>>, vector<8x64xf32>
    %cst_93 = arith.constant dense<0.000000e+00> : vector<8x256xf32>
    %305 = tpu.matmul %304, %7, %cst_93 {dimension_numbers = #tpu.dot_dimension_numbers<[1], [0], [0], [1], [0, 0, 1, 1], [], []>} : vector<8x64xf32>, vector<64x256xf32>, vector<8x256xf32> -> vector<8x256xf32>
    %306 = vector.extract_strided_slice %305 {offsets = [0, 128], sizes = [8, 128], strides = [1, 1]} : vector<8x256xf32> to vector<8x128xf32>
    %307 = vector.broadcast %8 : vector<1x128xf32> to vector<8x128xf32>
    %308 = arith.addf %306, %307 : vector<8x128xf32>
    %309 = arith.negf %308 : vector<8x128xf32>
    %310 = math.exp %309 : vector<8x128xf32>
    %cst_94 = arith.constant 1.000000e+00 : f32
    %311 = vector.broadcast %cst_94 : f32 to vector<8x128xf32>
    %312 = arith.addf %311, %310 : vector<8x128xf32>
    %313 = arith.divf %311, %312 : vector<8x128xf32>
    %314 = math.tanh %308 : vector<8x128xf32>
    %315 = vector.extract_strided_slice %313 {offsets = [0, 0], sizes = [8, 32], strides = [1, 1]} : vector<8x128xf32> to vector<8x32xf32>
    %316 = vector.extract_strided_slice %313 {offsets = [0, 32], sizes = [8, 32], strides = [1, 1]} : vector<8x128xf32> to vector<8x32xf32>
    %317 = vector.extract_strided_slice %314 {offsets = [0, 64], sizes = [8, 32], strides = [1, 1]} : vector<8x128xf32> to vector<8x32xf32>
    %318 = vector.extract_strided_slice %313 {offsets = [0, 96], sizes = [8, 32], strides = [1, 1]} : vector<8x128xf32> to vector<8x32xf32>
    %319 = arith.mulf %316, %276 : vector<8x32xf32>
    %320 = arith.mulf %315, %317 : vector<8x32xf32>
    %321 = arith.addf %319, %320 : vector<8x32xf32>
    %322 = math.tanh %321 : vector<8x32xf32>
    %323 = arith.mulf %318, %322 : vector<8x32xf32>
    %c0_95 = arith.constant 0 : index
    %c32_96 = arith.constant 32 : index
    %324 = vector.load %arg12[%c0_95, %c32_96] : memref<8x64xf32, #tpu.memory_space<vmem>>, vector<8x32xf32>
    tpu.vector_store %arg12[%c0_95, %c32_96], %323 {strides = array<i32>} : memref<8x64xf32, #tpu.memory_space<vmem>>, vector<8x32xf32>,
    %325 = arith.index_cast %284 : i32 to index
    %c0_97 = arith.constant 0 : index
    %326 = vector.load %arg11[%325, %c0_97] : memref<64x32xf32, #tpu.memory_space<vmem>>, vector<8x32xf32>
    tpu.vector_store %arg11[%325, %c0_97], %323 {strides = array<i32>} : memref<64x32xf32, #tpu.memory_space<vmem>>, vector<8x32xf32>,
    %327 = vector.extract_strided_slice %305 {offsets = [0, 0], sizes = [8, 128], strides = [1, 1]} : vector<8x256xf32> to vector<8x128xf32>
    %c7_i32 = arith.constant 7 : i32
    %c8_i32_98 = arith.constant 8 : i32
    %328 = arith.muli %c7_i32, %c8_i32_98 : i32
    %329 = tpu.assume_multiple %328, 8 : i32
    %330 = arith.index_cast %329 : i32 to index
    %c0_99 = arith.constant 0 : index
    %331 = vector.load %arg10[%330, %c0_99] : memref<64x128xf32, #tpu.memory_space<vmem>>, vector<8x128xf32>
    %332 = arith.addf %331, %327 : vector<8x128xf32>
    %333 = arith.negf %332 : vector<8x128xf32>
    %334 = math.exp %333 : vector<8x128xf32>
    %cst_100 = arith.constant 1.000000e+00 : f32
    %335 = vector.broadcast %cst_100 : f32 to vector<8x128xf32>
    %336 = arith.addf %335, %334 : vector<8x128xf32>
    %337 = arith.divf %335, %336 : vector<8x128xf32>
    %338 = math.tanh %332 : vector<8x128xf32>
    %339 = vector.extract_strided_slice %337 {offsets = [0, 0], sizes = [8, 32], strides = [1, 1]} : vector<8x128xf32> to vector<8x32xf32>
    %340 = vector.extract_strided_slice %337 {offsets = [0, 32], sizes = [8, 32], strides = [1, 1]} : vector<8x128xf32> to vector<8x32xf32>
    %341 = vector.extract_strided_slice %338 {offsets = [0, 64], sizes = [8, 32], strides = [1, 1]} : vector<8x128xf32> to vector<8x32xf32>
    %342 = vector.extract_strided_slice %337 {offsets = [0, 96], sizes = [8, 32], strides = [1, 1]} : vector<8x128xf32> to vector<8x32xf32>
    %343 = arith.mulf %340, %300 : vector<8x32xf32>
    %344 = arith.mulf %339, %341 : vector<8x32xf32>
    %345 = arith.addf %343, %344 : vector<8x32xf32>
    %346 = math.tanh %345 : vector<8x32xf32>
    %347 = arith.mulf %342, %346 : vector<8x32xf32>
    %c0_101 = arith.constant 0 : index
    %c0_102 = arith.constant 0 : index
    %348 = vector.load %arg12[%c0_101, %c0_102] : memref<8x64xf32, #tpu.memory_space<vmem>>, vector<8x32xf32>
    tpu.vector_store %arg12[%c0_101, %c0_102], %347 {strides = array<i32>} : memref<8x64xf32, #tpu.memory_space<vmem>>, vector<8x32xf32>,
    %c0_103 = arith.constant 0 : index
    %c0_104 = arith.constant 0 : index
    %349 = vector.load %arg12[%c0_103, %c0_104] : memref<8x64xf32, #tpu.memory_space<vmem>>, vector<8x64xf32>
    %cst_105 = arith.constant dense<0.000000e+00> : vector<8x256xf32>
    %350 = tpu.matmul %349, %7, %cst_105 {dimension_numbers = #tpu.dot_dimension_numbers<[1], [0], [0], [1], [0, 0, 1, 1], [], []>} : vector<8x64xf32>, vector<64x256xf32>, vector<8x256xf32> -> vector<8x256xf32>
    %351 = vector.extract_strided_slice %350 {offsets = [0, 128], sizes = [8, 128], strides = [1, 1]} : vector<8x256xf32> to vector<8x128xf32>
    %352 = vector.broadcast %8 : vector<1x128xf32> to vector<8x128xf32>
    %353 = arith.addf %351, %352 : vector<8x128xf32>
    %354 = arith.negf %353 : vector<8x128xf32>
    %355 = math.exp %354 : vector<8x128xf32>
    %cst_106 = arith.constant 1.000000e+00 : f32
    %356 = vector.broadcast %cst_106 : f32 to vector<8x128xf32>
    %357 = arith.addf %356, %355 : vector<8x128xf32>
    %358 = arith.divf %356, %357 : vector<8x128xf32>
    %359 = math.tanh %353 : vector<8x128xf32>
    %360 = vector.extract_strided_slice %358 {offsets = [0, 0], sizes = [8, 32], strides = [1, 1]} : vector<8x128xf32> to vector<8x32xf32>
    %361 = vector.extract_strided_slice %358 {offsets = [0, 32], sizes = [8, 32], strides = [1, 1]} : vector<8x128xf32> to vector<8x32xf32>
    %362 = vector.extract_strided_slice %359 {offsets = [0, 64], sizes = [8, 32], strides = [1, 1]} : vector<8x128xf32> to vector<8x32xf32>
    %363 = vector.extract_strided_slice %358 {offsets = [0, 96], sizes = [8, 32], strides = [1, 1]} : vector<8x128xf32> to vector<8x32xf32>
    %364 = arith.mulf %361, %321 : vector<8x32xf32>
    %365 = arith.mulf %360, %362 : vector<8x32xf32>
    %366 = arith.addf %364, %365 : vector<8x32xf32>
    %367 = math.tanh %366 : vector<8x32xf32>
    %368 = arith.mulf %363, %367 : vector<8x32xf32>
    %c0_107 = arith.constant 0 : index
    %c32_108 = arith.constant 32 : index
    %369 = vector.load %arg12[%c0_107, %c32_108] : memref<8x64xf32, #tpu.memory_space<vmem>>, vector<8x32xf32>
    tpu.vector_store %arg12[%c0_107, %c32_108], %368 {strides = array<i32>} : memref<8x64xf32, #tpu.memory_space<vmem>>, vector<8x32xf32>,
    %370 = arith.index_cast %329 : i32 to index
    %c0_109 = arith.constant 0 : index
    %371 = vector.load %arg11[%370, %c0_109] : memref<64x32xf32, #tpu.memory_space<vmem>>, vector<8x32xf32>
    tpu.vector_store %arg11[%370, %c0_109], %368 {strides = array<i32>} : memref<64x32xf32, #tpu.memory_space<vmem>>, vector<8x32xf32>,
    %372 = vector.extract_strided_slice %350 {offsets = [0, 0], sizes = [8, 128], strides = [1, 1]} : vector<8x256xf32> to vector<8x128xf32>
    %c8_i32_110 = arith.constant 8 : i32
    %c0_111 = arith.constant 0 : index
    %c0_112 = arith.constant 0 : index
    %373 = vector.load %arg12[%c0_111, %c0_112] : memref<8x64xf32, #tpu.memory_space<vmem>>, vector<8x32xf32>
    %c0_113 = arith.constant 0 : index
    %c0_114 = arith.constant 0 : index
    %c0_115 = arith.constant 0 : index
    %374 = vector.load %arg8[%c0_113, %c0_114, %c0_115] : memref<2x8x32xf32, #tpu.memory_space<vmem>>, vector<1x8x32xf32>
    %375 = vector.shape_cast %374 : vector<1x8x32xf32> to vector<8x32xf32>
    %376 = vector.shape_cast %373 : vector<8x32xf32> to vector<1x8x32xf32>
    tpu.vector_store %arg8[%c0_113, %c0_114, %c0_115], %376 {strides = array<i32>} : memref<2x8x32xf32, #tpu.memory_space<vmem>>, vector<1x8x32xf32>,
    %c0_116 = arith.constant 0 : index
    %c32_117 = arith.constant 32 : index
    %377 = vector.load %arg12[%c0_116, %c32_117] : memref<8x64xf32, #tpu.memory_space<vmem>>, vector<8x32xf32>
    %c1 = arith.constant 1 : index
    %c0_118 = arith.constant 0 : index
    %c0_119 = arith.constant 0 : index
    %378 = vector.load %arg8[%c1, %c0_118, %c0_119] : memref<2x8x32xf32, #tpu.memory_space<vmem>>, vector<1x8x32xf32>
    %379 = vector.shape_cast %378 : vector<1x8x32xf32> to vector<8x32xf32>
    %380 = vector.shape_cast %377 : vector<8x32xf32> to vector<1x8x32xf32>
    tpu.vector_store %arg8[%c1, %c0_118, %c0_119], %380 {strides = array<i32>} : memref<2x8x32xf32, #tpu.memory_space<vmem>>, vector<1x8x32xf32>,
    %c0_120 = arith.constant 0 : index
    %c0_121 = arith.constant 0 : index
    %c0_122 = arith.constant 0 : index
    %381 = vector.load %arg9[%c0_120, %c0_121, %c0_122] : memref<2x8x32xf32, #tpu.memory_space<vmem>>, vector<1x8x32xf32>
    %382 = vector.shape_cast %381 : vector<1x8x32xf32> to vector<8x32xf32>
    %383 = vector.shape_cast %345 : vector<8x32xf32> to vector<1x8x32xf32>
    tpu.vector_store %arg9[%c0_120, %c0_121, %c0_122], %383 {strides = array<i32>} : memref<2x8x32xf32, #tpu.memory_space<vmem>>, vector<1x8x32xf32>,
    %c1_123 = arith.constant 1 : index
    %c0_124 = arith.constant 0 : index
    %c0_125 = arith.constant 0 : index
    %384 = vector.load %arg9[%c1_123, %c0_124, %c0_125] : memref<2x8x32xf32, #tpu.memory_space<vmem>>, vector<1x8x32xf32>
    %385 = vector.shape_cast %384 : vector<1x8x32xf32> to vector<8x32xf32>
    %386 = vector.shape_cast %366 : vector<8x32xf32> to vector<1x8x32xf32>
    tpu.vector_store %arg9[%c1_123, %c0_124, %c0_125], %386 {strides = array<i32>} : memref<2x8x32xf32, #tpu.memory_space<vmem>>, vector<1x8x32xf32>,
    %c0_126 = arith.constant 0 : index
    %c0_127 = arith.constant 0 : index
    %387 = vector.load %arg11[%c0_126, %c0_127] : memref<64x32xf32, #tpu.memory_space<vmem>>, vector<64x32xf32>
    %c0_128 = arith.constant 0 : index
    %c0_129 = arith.constant 0 : index
    %388 = vector.load %arg5[%c0_128, %c0_129] : memref<32x20xf32, #tpu.memory_space<vmem>>, vector<32x20xf32>
    %cst_130 = arith.constant dense<0.000000e+00> : vector<64x20xf32>
    %389 = tpu.matmul %387, %388, %cst_130 {dimension_numbers = #tpu.dot_dimension_numbers<[1], [0], [0], [1], [0, 0, 1, 1], [], []>} : vector<64x32xf32>, vector<32x20xf32>, vector<64x20xf32> -> vector<64x20xf32>
    %c0_131 = arith.constant 0 : index
    %c0_132 = arith.constant 0 : index
    %390 = vector.load %arg6[%c0_131, %c0_132] : memref<1x20xf32, #tpu.memory_space<vmem>>, vector<1x20xf32>
    %391 = vector.broadcast %390 : vector<1x20xf32> to vector<64x20xf32>
    %392 = arith.addf %389, %391 : vector<64x20xf32>
    %393 = tpu.iota {dimensions = array<i32: 1>} : vector<64x20xi32>
    %c1_i32_133 = arith.constant 1 : i32
    %394 = vector.broadcast %c1_i32_133 : i32 to vector<64x20xi32>
    %395 = arith.cmpi sge, %393, %394 : vector<64x20xi32>
    %c3_i32_134 = arith.constant 3 : i32
    %396 = vector.broadcast %c3_i32_134 : i32 to vector<64x20xi32>
    %397 = arith.cmpi slt, %393, %396 : vector<64x20xi32>
    %398 = arith.andi %395, %397 : vector<64x20xi1>
    %cst_135 = arith.constant -1.000000e+30 : f32
    %399 = vector.broadcast %cst_135 : f32 to vector<64x20xf32>
    %400 = arith.select %398, %392, %399 : vector<64x20xi1>, vector<64x20xf32>
    %cst_136 = arith.constant dense<0xFF800000> : vector<64xf32>
    %401 = vector.multi_reduction <maximumf>, %400, %cst_136 [1] : vector<64x20xf32> to vector<64xf32>
    %402 = vector.shape_cast %401 : vector<64xf32> to vector<64x1xf32>
    %403 = vector.broadcast %402 : vector<64x1xf32> to vector<64x20xf32>
    %404 = arith.subf %392, %403 : vector<64x20xf32>
    %cst_137 = arith.constant -1.000000e+30 : f32
    %405 = vector.broadcast %cst_137 : f32 to vector<64x20xf32>
    %406 = arith.select %398, %404, %405 : vector<64x20xi1>, vector<64x20xf32>
    %407 = math.exp %406 : vector<64x20xf32>
    %cst_138 = arith.constant dense<0.000000e+00> : vector<64xf32>
    %408 = vector.multi_reduction <add>, %407, %cst_138 [1] : vector<64x20xf32> to vector<64xf32>
    %409 = vector.shape_cast %408 : vector<64xf32> to vector<64x1xf32>
    %410 = math.log %409 : vector<64x1xf32>
    %411 = arith.addf %402, %410 : vector<64x1xf32>
    %c3_i32_139 = arith.constant 3 : i32
    %412 = vector.broadcast %c3_i32_139 : i32 to vector<64x20xi32>
    %413 = arith.cmpi sge, %393, %412 : vector<64x20xi32>
    %c7_i32_140 = arith.constant 7 : i32
    %414 = vector.broadcast %c7_i32_140 : i32 to vector<64x20xi32>
    %415 = arith.cmpi slt, %393, %414 : vector<64x20xi32>
    %416 = arith.andi %413, %415 : vector<64x20xi1>
    %cst_141 = arith.constant -1.000000e+30 : f32
    %417 = vector.broadcast %cst_141 : f32 to vector<64x20xf32>
    %418 = arith.select %416, %392, %417 : vector<64x20xi1>, vector<64x20xf32>
    %cst_142 = arith.constant dense<0xFF800000> : vector<64xf32>
    %419 = vector.multi_reduction <maximumf>, %418, %cst_142 [1] : vector<64x20xf32> to vector<64xf32>
    %420 = vector.shape_cast %419 : vector<64xf32> to vector<64x1xf32>
    %421 = vector.broadcast %420 : vector<64x1xf32> to vector<64x20xf32>
    %422 = arith.subf %392, %421 : vector<64x20xf32>
    %cst_143 = arith.constant -1.000000e+30 : f32
    %423 = vector.broadcast %cst_143 : f32 to vector<64x20xf32>
    %424 = arith.select %416, %422, %423 : vector<64x20xi1>, vector<64x20xf32>
    %425 = math.exp %424 : vector<64x20xf32>
    %cst_144 = arith.constant dense<0.000000e+00> : vector<64xf32>
    %426 = vector.multi_reduction <add>, %425, %cst_144 [1] : vector<64x20xf32> to vector<64xf32>
    %427 = vector.shape_cast %426 : vector<64xf32> to vector<64x1xf32>
    %428 = math.log %427 : vector<64x1xf32>
    %429 = arith.addf %420, %428 : vector<64x1xf32>
    %c7_i32_145 = arith.constant 7 : i32
    %430 = vector.broadcast %c7_i32_145 : i32 to vector<64x20xi32>
    %431 = arith.cmpi sge, %393, %430 : vector<64x20xi32>
    %c20_i32 = arith.constant 20 : i32
    %432 = vector.broadcast %c20_i32 : i32 to vector<64x20xi32>
    %433 = arith.cmpi slt, %393, %432 : vector<64x20xi32>
    %434 = arith.andi %431, %433 : vector<64x20xi1>
    %cst_146 = arith.constant -1.000000e+30 : f32
    %435 = vector.broadcast %cst_146 : f32 to vector<64x20xf32>
    %436 = arith.select %434, %392, %435 : vector<64x20xi1>, vector<64x20xf32>
    %cst_147 = arith.constant dense<0xFF800000> : vector<64xf32>
    %437 = vector.multi_reduction <maximumf>, %436, %cst_147 [1] : vector<64x20xf32> to vector<64xf32>
    %438 = vector.shape_cast %437 : vector<64xf32> to vector<64x1xf32>
    %439 = vector.broadcast %438 : vector<64x1xf32> to vector<64x20xf32>
    %440 = arith.subf %392, %439 : vector<64x20xf32>
    %cst_148 = arith.constant -1.000000e+30 : f32
    %441 = vector.broadcast %cst_148 : f32 to vector<64x20xf32>
    %442 = arith.select %434, %440, %441 : vector<64x20xi1>, vector<64x20xf32>
    %443 = math.exp %442 : vector<64x20xf32>
    %cst_149 = arith.constant dense<0.000000e+00> : vector<64xf32>
    %444 = vector.multi_reduction <add>, %443, %cst_149 [1] : vector<64x20xf32> to vector<64xf32>
    %445 = vector.shape_cast %444 : vector<64xf32> to vector<64x1xf32>
    %446 = math.log %445 : vector<64x1xf32>
    %447 = arith.addf %438, %446 : vector<64x1xf32>
    %cst_150 = arith.constant 0.000000e+00 : f32
    %448 = vector.shape_cast %411 : vector<64x1xf32> to vector<64x1xf32>
    %449 = vector.broadcast %448 : vector<64x1xf32> to vector<64x20xf32>
    %450 = vector.broadcast %cst_150 : f32 to vector<64x20xf32>
    %451 = arith.select %398, %449, %450 : vector<64x20xi1>, vector<64x20xf32>
    %cst_151 = arith.constant 0.000000e+00 : f32
    %452 = vector.shape_cast %429 : vector<64x1xf32> to vector<64x1xf32>
    %453 = vector.broadcast %452 : vector<64x1xf32> to vector<64x20xf32>
    %454 = vector.broadcast %cst_151 : f32 to vector<64x20xf32>
    %455 = arith.select %416, %453, %454 : vector<64x20xi1>, vector<64x20xf32>
    %456 = arith.addf %451, %455 : vector<64x20xf32>
    %cst_152 = arith.constant 0.000000e+00 : f32
    %457 = vector.shape_cast %447 : vector<64x1xf32> to vector<64x1xf32>
    %458 = vector.broadcast %457 : vector<64x1xf32> to vector<64x20xf32>
    %459 = vector.broadcast %cst_152 : f32 to vector<64x20xf32>
    %460 = arith.select %434, %458, %459 : vector<64x20xi1>, vector<64x20xf32>
    %461 = arith.addf %456, %460 : vector<64x20xf32>
    %c0_i32_153 = arith.constant 0 : i32
    %462 = vector.broadcast %c0_i32_153 : i32 to vector<64x20xi32>
    %463 = arith.cmpi eq, %393, %462 : vector<64x20xi32>
    %464 = arith.negf %392 : vector<64x20xf32>
    %465 = math.exp %464 : vector<64x20xf32>
    %cst_154 = arith.constant 1.000000e+00 : f32
    %466 = vector.broadcast %cst_154 : f32 to vector<64x20xf32>
    %467 = arith.addf %466, %465 : vector<64x20xf32>
    %468 = arith.divf %466, %467 : vector<64x20xf32>
    %469 = arith.subf %392, %461 : vector<64x20xf32>
    %470 = arith.select %463, %468, %469 : vector<64x20xi1>, vector<64x20xf32>
    %c0_155 = arith.constant 0 : index
    %c0_156 = arith.constant 0 : index
    %471 = vector.load %arg7[%c0_155, %c0_156] : memref<64x20xf32, #tpu.memory_space<vmem>>, vector<64x20xf32>
    tpu.vector_store %arg7[%c0_155, %c0_156], %470 {strides = array<i32>} : memref<64x20xf32, #tpu.memory_space<vmem>>, vector<64x20xf32>,
    return
  }
}

</mosaic_0001>

<bundles_post_ra>
// kernel: tpu_custom_call.1
= control target key start
LH: loop header
LB: loop body
LE: loop exit
PB: predicated region body
PF: predicated region fallthrough
CT: control target
= control target key end

     0   :  { %15 = vsyncpa [#allocation6], 0  ;;  %s3884_s0 = inlined_call_operand.hbm [shape: f32[64,297], index: 0, kind: input, shape index: {}]   ;;  %s3885_s1 = inlined_call_operand.hbm [shape: f32[297,128], index: 1, kind: input, shape index: {}]   ;;  %s3886_s2 = inlined_call_operand.vmem [shape: f32[1,128], index: 2, kind: input, shape index: {}]   ;;  %s3887_s3 = inlined_call_operand.hbm [shape: f32[64,256], index: 3, kind: input, shape index: {}]   ;;  %s3888_s4 = inlined_call_operand.vmem [shape: f32[1,128], index: 4, kind: input, shape index: {}]   ;;  %s3889_s5 = inlined_call_operand.vmem [shape: f32[32,20], index: 5, kind: input, shape index: {}]   ;;  %s3890_s6 = inlined_call_operand.vmem [shape: f32[1,20], index: 6, kind: input, shape index: {}]   ;;  %s3891_s7 = inlined_call_operand.vmem [shape: f32[64,20], index: 7, kind: output, shape index: {0}]   ;;  %s3892_s8 = inlined_call_operand.hbm [shape: f32[2,8,32], index: 8, kind: output, shape index: {1}]   ;;  %s3893_s9 = inlined_call_operand.hbm [shape: f32[2,8,32], index: 9, kind: output, shape index: {2}]  }
   0x1   :  { %16 = vsyncpa [#allocation9], 0 }
   0x2   :  { %17 = vsyncpa [#allocation7], 0 }
   0x3   :  { %18 = vsyncpa [#allocation13], 0  ;;  %s2969_s30 = smov [#allocation8]   ;;  %s2851_s13 = scalar_lea.hbm %s3885_s1, 4864 }
   0x4   :  { %s36_s10 = sshll.u32 %s2969_s30, 4  ;;  %p2852_p0 = scmp.ne.s32.totalorder %s3885_s1, %s2851_s13  ;;  %s37_s10 = int_to_ptr.vmem [resolvable:$true] %s36_s10 }
   0x5   :  { %p2855_p1 = scmp.lt.u32.totalorder %s2851_s13, %s3885_s1 }
   0x7   :  { %p2857_p2 = pnand %p2855_p1, %p2852_p0 }
   0x9   :  { %2860 = shalt.err (!%p2857_p2)
}
   0xa   :  { %s2861_s18 = scalar_lea.vmem %s37_s10, 4864  ;;  %p2866_p4 = scmp.lt.s32.totalorder %s37_s10, %s37_s10 }
   0xb   :  { %p2862_p3 = scmp.ne.s32.totalorder %s37_s10, %s2861_s18  ;;  %p2867_p5 = scmp.lt.s32.totalorder %s2861_s18, %s2861_s18 }
   0xd   :  { %p2868_p6 = por %p2867_p5, %p2866_p4 }
   0xf   :  { %p2869_p7 = pnand %p2868_p6, %p2862_p3 }
  0x11   :  { %2872 = shalt.err (!%p2869_p7)
}
  0x12   :  { %s2970_s19 = smov 128   ;;  %s2971_s20 = smov 8  }
  0x13   :  { %42 = dma.hbm_to_vmem [thread:$0]  %s3885_s1, 4864, %s37_s10, [#allocation9], %s2970_s19, %s2970_s19, %s2971_s20  }
  0x14   :  { %s2972_s23 = smov [#allocation5]   ;;  %s2873_s27 = scalar_lea.hbm %s3884_s0, 3072 }
  0x15   :  { %s24_s24 = sshll.u32 %s2972_s23, 4  ;;  %p2874_p8 = scmp.ne.s32.totalorder %s3884_s0, %s2873_s27  ;;  %s25_s24 = int_to_ptr.vmem [resolvable:$true] %s24_s24 }
  0x16   :  { %p2877_p9 = scmp.lt.u32.totalorder %s2873_s27, %s3884_s0 }
  0x18   :  { %p2879_p10 = pnand %p2877_p9, %p2874_p8 }
  0x1a   :  { %2882 = shalt.err (!%p2879_p10)
}
  0x1b   :  { %s2883_s12 = scalar_lea.vmem %s25_s24, 3072  ;;  %p2888_p12 = scmp.lt.s32.totalorder %s25_s24, %s25_s24 }
  0x1c   :  { %p2884_p11 = scmp.ne.s32.totalorder %s25_s24, %s2883_s12  ;;  %p2889_p13 = scmp.lt.s32.totalorder %s2883_s12, %s2883_s12 }
  0x1e   :  { %p2890_p0 = por %p2889_p13, %p2888_p12 }
  0x20   :  { %p2891_p1 = pnand %p2890_p0, %p2884_p11 }
  0x22   :  { %2894 = shalt.err (!%p2891_p1)
}
  0x23   :  { %s2973_s1 = smov 384   ;;  %s2974_s10 = smov 24  }
  0x24   :  { %30 = dma.hbm_to_vmem [thread:$0]  %s3884_s0, 3072, %s25_s24, [#allocation6], %s2973_s1, %s2973_s1, %s2974_s10  }
  0x25   :  { %s2975_s15 = smov [#allocation10]   ;;  %s2895_s21 = scalar_lea.hbm %s3887_s3, 2048 }
  0x26   :  { %s50_s16 = sshll.u32 %s2975_s15, 4  ;;  %p2896_p2 = scmp.ne.s32.totalorder %s3887_s3, %s2895_s21  ;;  %s51_s16 = int_to_ptr.vmem [resolvable:$true] %s50_s16 }
  0x27   :  { %p2899_p3 = scmp.lt.u32.totalorder %s2895_s21, %s3887_s3 }
  0x29   :  { %p2901_p4 = pnand %p2899_p3, %p2896_p2 }
  0x2b   :  { %2904 = shalt.err (!%p2901_p4)
}
  0x2c   :  { %s2905_s27 = scalar_lea.vmem %s51_s16, 2048  ;;  %p2910_p6 = scmp.lt.s32.totalorder %s51_s16, %s51_s16 }
  0x2d   :  { %p2906_p5 = scmp.ne.s32.totalorder %s51_s16, %s2905_s27  ;;  %p2911_p7 = scmp.lt.s32.totalorder %s2905_s27, %s2905_s27 }
  0x2f   :  { %p2912_p8 = por %p2911_p7, %p2910_p6 }
  0x31   :  { %p2913_p9 = pnand %p2912_p8, %p2906_p5 }
  0x33   :  { %2916 = shalt.err (!%p2913_p9)
}
  0x34   :  { %s2976_s0 = smov 256   ;;  %s2977_s24 = smov 16  }
  0x35   :  { %56 = dma.hbm_to_vmem [thread:$0]  %s3887_s3, 2048, %s51_s16, [#allocation9], %s2976_s0, %s2976_s0, %s2977_s24  }
  0x36   :  { %2961 = dma.done.wait [#allocation6], 3072  }
  0x37   :  { %2962 = vsyncadd [#allocation6], 4294964224 }
  0x38   :  { %2963 = dma.done.wait [#allocation9], 6912  }
  0x39   :  { %2964 = vsyncadd [#allocation9], 4294960384  ;;  %v112_v0 = vld [vmem:[#allocation8 + $0x80] sm:$0xff]  ;;  %v113_v1 = vld [vmem:[#allocation8 + $0x88] sm:$0xff]  ;;  %vm166_vm0 = vcmask 1040384   ;;  %vm141_vm1 = vcmask 334848  }
  0x3a   :  { %v96_v2 = vld [vmem:[#allocation8] sm:$0xff]  ;;  %v2393_v3 = vpack.c.bf16 %v113_v1, %v112_v0  ;;  %v97_v4 = vld [vmem:[#allocation8 + $0x8] sm:$0xff]  ;;  %v114_v5 = vld [vmem:[#allocation8 + $0x90] sm:$0xff]  ;;  %vm2978_vm2 = vmmov 1   ;;  %s2979_s11 = smov 64   ;;  %vm405_vm4 = vcmask 523264  }
  0x3b   :  { %v115_v6 = vld [vmem:[#allocation8 + $0x98] sm:$0xff]  ;;  %v2395_v7 = vpack.c.bf16 %v97_v4, %v96_v2  ;;  %v98_v9 = vld [vmem:[#allocation8 + $0x10] sm:$0xff]  ;;  %v116_v11 = vld [vmem:[#allocation8 + $0xa0] sm:$0xff]  ;;  %vm437_vm5 = vcmask 261120   ;;  %vm549_vm6 = vcmask 523520   ;;  %vm1729_vm10 = vcmask 162816  }
  0x3c   :  { %v2397_v8 = vpack.c.bf16 %v115_v6, %v114_v5  ;;  %v99_v10 = vld [vmem:[#allocation8 + $0x18] sm:$0xff]  ;;  %2394 = vmatprep.subr.bf16.mxu0 %v2393_v3  ;;  %v117_v12 = vld [vmem:[#allocation8 + $0xa8] sm:$0xff]  ;;  %v100_v15 = vld [vmem:[#allocation8 + $0x20] sm:$0xff]  ;;  %s2984_s1 = smov [#allocation12]  }
  0x3d   :  { %2396 = vmatpush3.bf16.msra.mxu0 %v2395_v7  ;;  %v2399_v13 = vpack.c.bf16 %v99_v10, %v98_v9  ;;  %v2401_v14 = vpack.c.bf16 %v117_v12, %v116_v11  ;;  %v101_v16 = vld [vmem:[#allocation8 + $0x28] sm:$0xff]  ;;  %v118_v17 = vld [vmem:[#allocation8 + $0xb0] sm:$0xff]  ;;  %v119_v18 = vld [vmem:[#allocation8 + $0xb8] sm:$0xff] }
  0x3e   :  { %2398 = vmatprep.subr.bf16.mxu0 %v2397_v8  ;;  %v2403_v19 = vpack.c.bf16 %v101_v16, %v100_v15  ;;  %v128_v20 = vld [vmem:[#allocation8 + $0x100] sm:$0xff]  ;;  %v129_v21 = vld [vmem:[#allocation8 + $0x108] sm:$0xff]  ;;  %v2405_v22 = vpack.c.bf16 %v119_v18, %v118_v17  ;;  %v102_v23 = vld [vmem:[#allocation8 + $0x30] sm:$0xff] }
  0x3f   :  { %v103_v24 = vld [vmem:[#allocation8 + $0x38] sm:$0xff]  ;;  %v120_v25 = vld [vmem:[#allocation8 + $0xc0] sm:$0xff]  ;;  %v2425_v26 = vpack.c.bf16 %v129_v21, %v128_v20  ;;  %v121_v27 = vld [vmem:[#allocation8 + $0xc8] sm:$0xff] }
  0x40   :  { %v130_v28 = vld [vmem:[#allocation8 + $0x110] sm:$0xff]  ;;  %v131_v29 = vld [vmem:[#allocation8 + $0x118] sm:$0xff]  ;;  %v2407_v31 = vpack.c.bf16 %v103_v24, %v102_v23  ;;  %v73_v32 = vld [vmem:[#allocation5 + $0x8] sm:$0xff]  ;;  %v2409_v35 = vpack.c.bf16 %v121_v27, %v120_v25  ;;  %v2981_v25 = vmov 0.0  }
  0x41   :  { %2400 = vmatpush3.bf16.msra.mxu0 %v2399_v13  ;;  %2426 = vmatprep.subr.bf16.mxu1 %v2425_v26  ;;  %v2429_v30 = vpack.c.bf16 %v131_v29, %v130_v28  ;;  %v132_v33 = vld [vmem:[#allocation8 + $0x120] sm:$0xff]  ;;  %v133_v34 = vld [vmem:[#allocation8 + $0x128] sm:$0x1]  ;;  %v74_v39 = vld [vmem:[#allocation5 + $0x10] sm:$0xff]  ;;  %406 = vst.msk [vmem:[#allocation4] sm:$0xff] %vm405_vm4, %v2981_v25 }
  0x42   :  { %2402 = vmatprep.subr.bf16.mxu0 %v2401_v14  ;;  %2428 = vmatpush3.bf16.msra.mxu1 %v2425_v26  ;;  %v104_v36 = vld [vmem:[#allocation8 + $0x40] sm:$0xff]  ;;  %v105_v37 = vld [vmem:[#allocation8 + $0x48] sm:$0xff]  ;;  %v2433_v38 = vpack.c.bf16 %v133_v34, %v132_v33  ;;  %v122_v40 = vld [vmem:[#allocation8 + $0xd0] sm:$0xff] }
  0x43   :  { %2430 = vmatprep.subr.bf16.mxu1 %v2429_v30  ;;  %v123_v41 = vld [vmem:[#allocation8 + $0xd8] sm:$0xff]  ;;  %234 = vmatprep.mubr.f32.mxu0 %v73_v32  ;;  %vm2434_vm3 = vmpackc.low %vm166_vm0, %vm2978_vm2  ;;  %v2411_v42 = vpack.c.bf16 %v105_v37, %v104_v36  ;;  %v106_v44 = vld [vmem:[#allocation8 + $0x50] sm:$0xff] }
  0x44   :  { %2361 = vmatprep.mubr.msk.f32.mxu1 %vm141_vm1, %v74_v39  ;;  %v2413_v43 = vpack.c.bf16 %v123_v41, %v122_v40  ;;  %v107_v45 = vld [vmem:[#allocation8 + $0x58] sm:$0xff]  ;;  %v124_v46 = vld [vmem:[#allocation8 + $0xe0] sm:$0xff]  ;;  %v125_v47 = vld [vmem:[#allocation8 + $0xe8] sm:$0xff] }
  0x45   :  { %2404 = vmatpush3.bf16.msra.mxu0 %v2403_v19  ;;  %v2415_v48 = vpack.c.bf16 %v107_v45, %v106_v44  ;;  %v77_v49 = vld [vmem:[#allocation5 + $0x28] sm:$0xff]  ;;  %v2417_v50 = vpack.c.bf16 %v125_v47, %v124_v46  ;;  %v108_v51 = vld [vmem:[#allocation8 + $0x60] sm:$0xff]  ;;  %v126_v53 = vld [vmem:[#allocation8 + $0xf0] sm:$0xff] }
  0x46   :  { %2406 = vmatprep.subr.bf16.mxu0 %v2405_v22  ;;  %2432 = vmatpush3.bf16.msra.mxu1 %v2429_v30  ;;  %v109_v52 = vld [vmem:[#allocation8 + $0x68] sm:$0xff]  ;;  %v127_v54 = vld [vmem:[#allocation8 + $0xf8] sm:$0xff]  ;;  %v110_v57 = vld [vmem:[#allocation8 + $0x70] sm:$0xff] }
  0x47   :  { %2435 = vmatprep.subr.msk.bf16.mxu1 %vm2434_vm3, %v2433_v38  ;;  %v2419_v55 = vpack.c.bf16 %v109_v52, %v108_v51  ;;  %v2421_v56 = vpack.c.bf16 %v127_v54, %v126_v53  ;;  %v111_v58 = vld [vmem:[#allocation8 + $0x78] sm:$0xff]  ;;  %v72_v60 = vld [vmem:[#allocation5] sm:$0xff]  ;;  %v78_v23 = vld [vmem:[#allocation5 + $0x30] sm:$0xff] }
  0x48   :  { %v2423_v59 = vpack.c.bf16 %v111_v58, %v110_v57  ;;  %v76_v61 = vld [vmem:[#allocation5 + $0x20] sm:$0xff]  ;;  %v75_v62 = vld [vmem:[#allocation5 + $0x18] sm:$0xff]  ;;  %v82_v24 = vld [vmem:[#allocation5 + $0x50] sm:$0xff] }
  0x49   :  { %2408 = vmatpush3.bf16.msra.mxu0 %v2407_v31  ;;  %v3080_v3 = vld [vmem:[%s3886_s2] ss:$0 sm:$0xff]  ;;  %s2980_s2 = smov 32   ;;  %v81_v26 = vld [vmem:[#allocation5 + $0x48] sm:$0xff]  ;;  %v388_v29 = vld [vmem:[#allocation10] sm:$0xff] }
  0x4a   :  { %2410 = vmatprep.subr.bf16.mxu0 %v2409_v35  ;;  %2438 = vmatpush3.bf16.msk.msra.mxu1 %vm2434_vm3, %v2433_v38  ;;  %v79_v22 = vld [vmem:[#allocation5 + $0x38] sm:$0xff]  ;;  %v391_v28 = vld [vmem:[#allocation10 + $0x18] sm:$0xff]  ;;  %v390_v30 = vld [vmem:[#allocation10 + $0x10] sm:$0xff] }
  0x4b   :  { %v389_v27 = vld [vmem:[#allocation10 + $0x8] sm:$0xff]  ;;  %v85_v31 = vld [vmem:[#allocation5 + $0x68] sm:$0xff]  ;;  %v3099_v33 = vpack.c.bf16 %v390_v30, %v388_v29  ;;  %v80_v34 = vld [vmem:[#allocation5 + $0x40] sm:$0xff] }
  0x4c   :  { %v3097_v32 = vpack.c.bf16 %v391_v28, %v389_v27  ;;  %v83_v35 = vld [vmem:[#allocation5 + $0x58] sm:$0xff]  ;;  %v395_v37 = vld [vmem:[#allocation10 + $0x38] sm:$0xff]  ;;  %v392_v39 = vld [vmem:[#allocation10 + $0x20] sm:$0xff] }
  0x4d   :  { %2412 = vmatpush3.bf16.msra.mxu0 %v2411_v42  ;;  %2362 = vmatmul.mubr.msk.f32.vlgmr.msra.gmra.mrb[0].mxu1 %vm141_vm1, %v77_v49  ;;  %v393_v36 = vld [vmem:[#allocation10 + $0x28] sm:$0xff]  ;;  %v394_v40 = vld [vmem:[#allocation10 + $0x30] sm:$0xff]  ;;  %v86_v42 = vld [vmem:[#allocation5 + $0x70] sm:$0xff] }
  0x4e   :  { %2414 = vmatprep.subr.bf16.mxu0 %v2413_v43  ;;  %2364 = vmatprep.mubr.msk.f32.mxu1 %vm141_vm1, %v80_v34  ;;  %v3103_v38 = vpack.c.bf16 %v395_v37, %v393_v36  ;;  %v84_v41 = vld [vmem:[#allocation5 + $0x60] sm:$0xff]  ;;  %v3108_v44 = vpack.c.bf16 %v394_v40, %v392_v39  ;;  %v397_v45 = vld [vmem:[#allocation10 + $0x48] sm:$0xff]  ;;  %v399_v46 = vld [vmem:[#allocation10 + $0x58] sm:$0xff] }
  0x4f   :  { %2440 = vmatprep.subr.bf16.mxu1 %v3097_v32  ;;  %v88_v43 = vld [vmem:[#allocation5 + $0x80] sm:$0xff]  ;;  %v3111_v47 = vpack.c.bf16 %v399_v46, %v397_v45  ;;  %v89_v49 = vld [vmem:[#allocation5 + $0x88] sm:$0xff]  ;;  %v91_v51 = vld [vmem:[#allocation5 + $0x98] sm:$0xff] }
  0x50   :  { %2442 = vmatpush1.bf16.msra.mxu1 %v3099_v33  ;;  %v90_v52 = vld [vmem:[#allocation5 + $0x90] sm:$0xff]  ;;  %v93_v54 = vld [vmem:[#allocation5 + $0xa8] sm:$0xff]  ;;  %v92_v58 = vld [vmem:[#allocation5 + $0xa0] sm:$0xff] }
  0x51   :  { %2416 = vmatpush3.bf16.msra.mxu0 %v2415_v48  ;;  %2365 = vmatmul.mubr.msk.f32.gmra.mrb[2].mxu1 %vm141_vm1, %v83_v35  ;;  %v94_v53 = vld [vmem:[#allocation5 + $0xb0] sm:$0xff] }
  0x52   :  { %2418 = vmatprep.subr.bf16.mxu0 %v2417_v50  ;;  %2444 = vmatprep.subr.bf16.mxu1 %v3103_v38  ;;  %v87_v50 = vld [vmem:[#allocation5 + $0x78] sm:$0xff] }
  0x53   :  { %2367 = vmatprep.mubr.msk.f32.mxu1 %vm141_vm1, %v86_v42 }
  0x54   :  { %2446 = vmatpush1.bf16.msra.mxu1 %v3108_v44 }
  0x55   :  { %2420 = vmatpush3.bf16.msra.mxu0 %v2419_v55  ;;  %2368 = vmatmul.mubr.msk.f32.gmra.mrb[4].mxu1 %vm141_vm1, %v89_v49  ;;  %v396_v55 = vld [vmem:[#allocation10 + $0x40] sm:$0xff] }
  0x56   :  { %2422 = vmatprep.subr.bf16.mxu0 %v2421_v56  ;;  %2448 = vmatprep.subr.bf16.mxu1 %v3111_v47  ;;  %v398_v56 = vld [vmem:[#allocation10 + $0x50] sm:$0xff] }
  0x57   :  { %v3123_v57 = vpack.c.bf16 %v398_v56, %v396_v55  ;;  %2370 = vmatprep.mubr.msk.f32.mxu1 %vm141_vm1, %v92_v58 }
  0x59   :  { %2424 = vmatpush3.bf16.msra.mxu0 %v2423_v59  ;;  %v95_v59 = vld [vmem:[#allocation5 + $0xb8] sm:$0xff]  ;;  %2450 = vmatpush1.bf16.msra.mxu1 %v3123_v57 }
  0x5a   :  { %2488 = vmatprep.subr.bf16.mxu0 %v3097_v32  ;;  %2371 = vmatmul.mubr.msk.f32.gmra.mrb[6].mxu1 %vm141_vm1, %v95_v59 }
  0x5b   :  { %507 = vmatprep.mubr.f32.mxu1 %v2981_v25 }
  0x5c   :  { %235 = vmatmul.mubr.f32.vlgmr.msra.gmra.mrb[0].mxu0 %v72_v60  ;;  %v401_v60 = vld [vmem:[#allocation10 + $0x68] sm:$0xff] }
  0x5d   :  { %239 = vmatprep.mubr.f32.mxu0 %v76_v61  ;;  %2490 = vmatpush1.bf16.msra.mxu0 %v3099_v33  ;;  %v403_v61 = vld [vmem:[#allocation10 + $0x78] sm:$0xff] }
  0x5e   :  { %2492 = vmatprep.subr.bf16.mxu0 %v3103_v38 }
  0x60   :  { %240 = vmatmul.mubr.f32.gmra.mrb[2].mxu0 %v75_v62  ;;  %v400_v62 = vld [vmem:[#allocation10 + $0x60] sm:$0xff] }
  0x61   :  { %244 = vmatprep.mubr.f32.mxu0 %v79_v22  ;;  %2494 = vmatpush1.bf16.msra.mxu0 %v3108_v44 }
  0x62   :  { %2496 = vmatprep.subr.bf16.mxu0 %v3111_v47 }
  0x64   :  { %245 = vmatmul.mubr.f32.gmra.mrb[4].mxu0 %v78_v23 }
  0x65   :  { %249 = vmatprep.mubr.f32.mxu0 %v82_v24  ;;  %2498 = vmatpush1.bf16.msra.mxu0 %v3123_v57 }
  0x68   :  { %250 = vmatmul.mubr.f32.gmra.mrb[6].mxu0 %v81_v26 }
  0x69   :  { %254 = vmatprep.mubr.f32.mxu0 %v85_v31 }
  0x6c   :  { %255 = vmatmul.mubr.f32.gmra.mrb[8].mxu0 %v84_v41 }
  0x6d   :  { %259 = vmatprep.mubr.f32.mxu0 %v88_v43 }
  0x70   :  { %260 = vmatmul.mubr.f32.gmra.mrb[10].mxu0 %v87_v50 }
  0x71   :  { %264 = vmatprep.mubr.f32.mxu0 %v91_v51  ;;  %v3174_v51 = vld [vmem:[%s3888_s4] ss:$0 sm:$0xff]  ;;  %s2196_s4 = sshll.u32 %s2984_s1, 4  ;;  %s3814_s4 = int_to_ptr.vmem [resolvable:$true] %s2196_s4 }
  0x74   :  { %265 = vmatmul.mubr.f32.gmra.mrb[12].mxu0 %v90_v52 }
  0x75   :  { %269 = vmatprep.mubr.f32.mxu0 %v94_v53 }
  0x78   :  { %270 = vmatmul.mubr.f32.gmra.mrb[14].mxu0 %v93_v54 }
  0x79   :  { %939 = vmatprep.mubr.f32.mxu0 %v2981_v25 }
 0x120   :  { %v2363_v63 = vpop.f32.mrb[0].mxu1 }
 0x121   :  { %v341_v0 = vpop.f32.mrb[1].mxu1 }
 0x12f   :  { %v2299_v1 = vpop.f32.mrb[0].mxu0 }
 0x130   :  { %v2300_v2 = vpop.f32.mrb[1].mxu0 }
 0x131   :  { %v2301_v4 = vadd.f32 %v2300_v2, %v2299_v1 }
 0x133   :  { %v2302_v5 = vpop.f32.mrb[2].mxu0  ;;  %v237_v6 = vadd.f32 %v2301_v4, %v3080_v3 }
 0x134   :  { %v2303_v7 = vpop.f32.mrb[3].mxu0 }
 0x135   :  { %v342_v8 = vadd.f32 %v341_v0, %v237_v6  ;;  %v2304_v9 = vadd.f32 %v2303_v7, %v2302_v5  ;;  %v3128_v0 = vpack.c.bf16 %v403_v61, %v401_v60 }
 0x137   :  { %2595 = vtanh.f32 %v342_v8  ;;  %v242_v10 = vadd.f32 %v2304_v9, %v3080_v3  ;;  %v2225_v13 = vmul.f32 -1.442695, %v342_v8  ;;  %2452 = vmatprep.subr.bf16.mxu1 %v3128_v0  ;;  %2500 = vmatprep.subr.bf16.mxu0 %v3128_v0  ;;  %v2305_v5 = vpop.f32.mrb[4].mxu0 }
 0x138   :  { %v2306_v6 = vpop.f32.mrb[5].mxu0 }
 0x139   :  { %v3084_v11 = vadd.f32 %v2363_v63, %v242_v10  ;;  %2597 = vpow2.f32 %v2225_v13  ;;  %v402_v63 = vld [vmem:[#allocation10 + $0x70] sm:$0xff]  ;;  %v2307_v7 = vadd.f32 %v2306_v6, %v2305_v5  ;;  %v2366_v13 = vpop.f32.mrb[2].mxu1 }
 0x13a   :  { %v3130_v1 = vpack.c.bf16 %v402_v63, %v400_v62 }
 0x13b   :  { %v2308_v8 = vpop.f32.mrb[6].mxu0  ;;  %v247_v9 = vadd.f32 %v2307_v7, %v3080_v3 }
 0x13c   :  { %2454 = vmatpush1.bf16.msra.mxu1 %v3130_v1  ;;  %2502 = vmatpush1.bf16.msra.mxu0 %v3130_v1  ;;  %v2309_v10 = vpop.f32.mrb[7].mxu0 }
 0x13d   :  { %2456 = vmatprep.subr.bf16.mxu1 %v3097_v32  ;;  %2520 = vmatprep.subr.bf16.mxu0 %v3097_v32 }
 0x141   :  { %v2596_v12 = vpop.eup %2595 }
 0x142   :  { %418 = vrot.lane.b32.xlu0 %v2596_v12, %s2979_s11  ;;  %v2310_v12 = vadd.f32 %v2309_v10, %v2308_v8 }
 0x143   :  { %v2598_v14 = vpop.eup %2597 }
 0x144   :  { %v412_v15 = vadd.f32 1.0, %v2598_v14  ;;  %v351_v14 = vpop.f32.mrb[3].mxu1 }
 0x145   :  { %v2369_v22 = vpop.f32.mrb[4].mxu1 }
 0x146   :  { %2599 = vrcp.f32 %v412_v15  ;;  %v2311_v15 = vpop.f32.mrb[8].mxu0  ;;  %v361_v26 = vpop.f32.mrb[5].mxu1 }
 0x147   :  { %v2372_v46 = vpop.f32.mrb[6].mxu1 }
 0x148   :  { %v371_v49 = vpop.f32.mrb[7].mxu1 }
 0x150   :  { %v3087_v16 = vpop.eup %2599 }
 0x151   :  { %v416_v19 = vmul.f32 0.0, %v3087_v16 }
 0x1b4   :  { %v419_v17 = vpop.permute.xlu0 %418 }
 0x1b5   :  { %v421_v18 = vmul.f32 %v3087_v16, %v419_v17  ;;  %v252_v17 = vadd.f32 %v2310_v12, %v3080_v3 }
 0x1b7   :  { %423 = vrot.lane.b32.xlu0 %v421_v18, %s2980_s2  ;;  %v3144_v18 = vadd.f32 %v351_v14, %v247_v9 }
 0x229   :  { %v424_v20 = vpop.permute.xlu0 %423 }
 0x22a   :  { %v3092_v21 = vadd.f32 %v424_v20, %v416_v19  ;;  %v2312_v19 = vpop.f32.mrb[9].mxu0 }
 0x22b   :  { %v2313_v20 = vadd.f32 %v2312_v19, %v2311_v15  ;;  %v2314_v23 = vpop.f32.mrb[10].mxu0 }
 0x22c   :  { %2601 = vtanh.f32 %v3092_v21  ;;  %v2315_v27 = vpop.f32.mrb[11].mxu0 }
 0x22d   :  { %v257_v24 = vadd.f32 %v2313_v20, %v3080_v3  ;;  %v2316_v28 = vadd.f32 %v2315_v27, %v2314_v23  ;;  %v2317_v30 = vpop.f32.mrb[12].mxu0 }
 0x22e   :  { %v2318_v34 = vpop.f32.mrb[13].mxu0 }
 0x22f   :  { %v3149_v29 = vadd.f32 %v361_v26, %v257_v24  ;;  %v262_v31 = vadd.f32 %v2316_v28, %v3080_v3  ;;  %v2319_v35 = vadd.f32 %v2318_v34, %v2317_v30  ;;  %v2320_v37 = vpop.f32.mrb[14].mxu0 }
 0x230   :  { %v2321_v39 = vpop.f32.mrb[15].mxu0 }
 0x231   :  { %v3152_v36 = vadd.f32 %v2369_v22, %v262_v31  ;;  %v2322_v40 = vadd.f32 %v2321_v39, %v2320_v37  ;;  %v267_v45 = vadd.f32 %v2319_v35, %v3080_v3 }
 0x233   :  { %v272_v43 = vadd.f32 %v2322_v40, %v3080_v3  ;;  %v3169_v50 = vadd.f32 %v371_v49, %v267_v45 }
 0x236   :  { %v2602_v48 = vpop.eup %2601 }
 0x237   :  { %429 = vrot.lane.b32.xlu1 %v2602_v48, %s2979_s11  ;;  %v3167_v48 = vadd.f32 %v2372_v46, %v272_v43 }
 0x2a9   :  { %v430_v2 = vpop.permute.xlu1 %429 }
 0x2aa   :  { %v432_v4 = vmul.f32 %v3087_v16, %v430_v2  ;;  %v3146_v16 = vadd.f32 %v2366_v13, %v252_v17 }
 0x2ac   :  { %434 = vrot.lane.b32.xlu1 %v432_v4, %s2980_s2 }
 0x31e   :  { %v435_v41 = vpop.permute.xlu1 %434 }
 0x31f   :  { %438 = vst.msk [vmem:[#allocation4] sm:$0xff] %vm437_vm5, %v435_v41 }
 0x326   :  { %v439_v42 = vld [vmem:[#allocation4] sm:$0xff] }
 0x327   :  { %2226 = vmatmul.mubr.msk.f32.vlgmr.msra.gmra.mrb[8].mxu1 %vm405_vm4, %v439_v42 }
 0x328   :  { %2458 = vmatpush1.bf16.msra.mxu1 %v3099_v33  ;;  %655 = vmatprep.mubr.f32.mxu1 %v2981_v25 }
 0x329   :  { %2460 = vmatprep.subr.bf16.mxu1 %v3103_v38 }
 0x32c   :  { %2462 = vmatpush1.bf16.msra.mxu1 %v3108_v44 }
 0x32d   :  { %2464 = vmatprep.subr.bf16.mxu1 %v3111_v47 }
 0x330   :  { %2466 = vmatpush1.bf16.msra.mxu1 %v3123_v57 }
 0x331   :  { %2468 = vmatprep.subr.bf16.mxu1 %v3128_v0 }
 0x334   :  { %2470 = vmatpush1.bf16.msra.mxu1 %v3130_v1 }
 0x335   :  { %2472 = vmatprep.subr.bf16.mxu1 %v3097_v32 }
 0x3fa   :  { %v509_v52 = vpop.f32.mrb[8].mxu1 }
 0x3fb   :  { %v557_v53 = vadd.f32 %v509_v52, %v3084_v11  ;;  %v511_v54 = vpop.f32.mrb[9].mxu1 }
 0x3fc   :  { %v520_v55 = vadd.f32 %v3174_v51, %v511_v54 }
 0x3fd   :  { %2603 = vtanh.f32 %v557_v53  ;;  %v2229_v58 = vmul.f32 -1.442695, %v557_v53 }
 0x3fe   :  { %2605 = vtanh.f32 %v520_v55  ;;  %v2228_v59 = vmul.f32 -1.442695, %v520_v55 }
 0x3ff   :  { %2607 = vpow2.f32 %v2229_v58 }
 0x400   :  { %2609 = vpow2.f32 %v2228_v59 }
 0x407   :  { %v2604_v3 = vpop.eup %2603 }
 0x408   :  { %v2606_v56 = vpop.eup %2605  ;;  %567 = vrot.lane.b32.xlu1 %v2604_v3, %s2979_s11 }
 0x409   :  { %530 = vrot.lane.b32.xlu0 %v2606_v56, %s2979_s11  ;;  %v2608_v60 = vpop.eup %2607 }
 0x40a   :  { %v2610_v61 = vpop.eup %2609  ;;  %v561_v62 = vadd.f32 1.0, %v2608_v60 }
 0x40b   :  { %v524_v63 = vadd.f32 1.0, %v2610_v61 }
 0x40c   :  { %2611 = vrcp.f32 %v561_v62 }
 0x40d   :  { %2613 = vrcp.f32 %v524_v63 }
 0x416   :  { %v2612_v11 = vpop.eup %2611 }
 0x417   :  { %v2614_v4 = vpop.eup %2613  ;;  %v565_v8 = vmul.f32 %v2612_v11, %v3092_v21 }
 0x418   :  { %v528_v10 = vmul.f32 0.0, %v2614_v4 }
 0x47a   :  { %v568_v2 = vpop.permute.xlu1 %567 }
 0x47b   :  { %v570_v5 = vmul.f32 %v2612_v11, %v568_v2  ;;  %v531_v6 = vpop.permute.xlu0 %530 }
 0x47c   :  { %v533_v7 = vmul.f32 %v2614_v4, %v531_v6 }
 0x47d   :  { %572 = vrot.lane.b32.xlu1 %v570_v5, %s2980_s2 }
 0x47e   :  { %535 = vrot.lane.b32.xlu0 %v533_v7, %s2980_s2 }
 0x4ef   :  { %v573_v9 = vpop.permute.xlu1 %572 }
 0x4f0   :  { %v575_v12 = vadd.f32 %v573_v9, %v565_v8  ;;  %v536_v13 = vpop.permute.xlu0 %535 }
 0x4f1   :  { %v538_v14 = vadd.f32 %v536_v13, %v528_v10 }
 0x4f2   :  { %2615 = vtanh.f32 %v575_v12 }
 0x4f3   :  { %2617 = vtanh.f32 %v538_v14 }
 0x4fc   :  { %v2616_v15 = vpop.eup %2615 }
 0x4fd   :  { %v2618_v17 = vpop.eup %2617  ;;  %578 = vrot.lane.b32.xlu1 %v2616_v15, %s2979_s11 }
 0x4fe   :  { %541 = vrot.lane.b32.xlu0 %v2618_v17, %s2979_s11 }
 0x56f   :  { %v579_v19 = vpop.permute.xlu1 %578 }
 0x570   :  { %v581_v20 = vmul.f32 %v2612_v11, %v579_v19  ;;  %v542_v22 = vpop.permute.xlu0 %541 }
 0x571   :  { %v3185_v23 = vmul.f32 %v2614_v4, %v542_v22 }
 0x572   :  { %583 = vrot.lane.b32.xlu1 %v581_v20, %s2980_s2 }
 0x573   :  { %546 = vrot.lane.b32.xlu0 %v3185_v23, %s2979_s11 }
 0x5e4   :  { %v584_v24 = vpop.permute.xlu1 %583 }
 0x5e5   :  { %v547_v21 = vpop.permute.xlu0 %546 }
 0x5e6   :  { %550 = vst.msk [vmem:[#allocation4] sm:$0xff] %vm549_vm6, %v547_v21 }
 0x5e7   :  { %586 = vst.msk [vmem:[#allocation4] sm:$0xff] %vm437_vm5, %v584_v24 }
 0x5ee   :  { %v587_v26 = vld [vmem:[#allocation4] sm:$0xff] }
 0x5ef   :  { %2230 = vmatmul.mubr.msk.f32.vlgmr.msra.gmra.mrb[10].mxu1 %vm405_vm4, %v587_v26 }
 0x5f0   :  { %2474 = vmatpush1.bf16.msra.mxu1 %v3099_v33  ;;  %797 = vmatprep.mubr.f32.mxu1 %v2981_v25 }
 0x5f1   :  { %2476 = vmatprep.subr.bf16.mxu1 %v3103_v38 }
 0x5f4   :  { %2478 = vmatpush1.bf16.msra.mxu1 %v3108_v44 }
 0x5f5   :  { %2480 = vmatprep.subr.bf16.mxu1 %v3111_v47 }
 0x5f8   :  { %2482 = vmatpush1.bf16.msra.mxu1 %v3123_v57 }
 0x5f9   :  { %2484 = vmatprep.subr.bf16.mxu1 %v3128_v0 }
 0x5fc   :  { %2486 = vmatpush1.bf16.msra.mxu1 %v3130_v1 }
 0x5fd   :  { %2504 = vmatprep.subr.bf16.mxu1 %v3097_v32 }
 0x6c2   :  { %v657_v27 = vpop.f32.mrb[10].mxu1 }
 0x6c3   :  { %v699_v28 = vadd.f32 %v657_v27, %v3144_v18  ;;  %v659_v30 = vpop.f32.mrb[11].mxu1 }
 0x6c4   :  { %v662_v31 = vadd.f32 %v3174_v51, %v659_v30 }
 0x6c5   :  { %2619 = vtanh.f32 %v699_v28  ;;  %v2232_v37 = vmul.f32 -1.442695, %v699_v28 }
 0x6c6   :  { %2621 = vtanh.f32 %v662_v31  ;;  %v2231_v39 = vmul.f32 -1.442695, %v662_v31 }
 0x6c7   :  { %2623 = vpow2.f32 %v2232_v37 }
 0x6c8   :  { %2625 = vpow2.f32 %v2231_v39 }
 0x6cf   :  { %v2620_v34 = vpop.eup %2619 }
 0x6d0   :  { %v2622_v35 = vpop.eup %2621  ;;  %709 = vrot.lane.b32.xlu1 %v2620_v34, %s2979_s11 }
 0x6d1   :  { %672 = vrot.lane.b32.xlu0 %v2622_v35, %s2979_s11  ;;  %v2624_v40 = vpop.eup %2623 }
 0x6d2   :  { %v2626_v41 = vpop.eup %2625  ;;  %v703_v42 = vadd.f32 1.0, %v2624_v40 }
 0x6d3   :  { %v666_v43 = vadd.f32 1.0, %v2626_v41 }
 0x6d4   :  { %2627 = vrcp.f32 %v703_v42 }
 0x6d5   :  { %2629 = vrcp.f32 %v666_v43 }
 0x6de   :  { %v2628_v18 = vpop.eup %2627 }
 0x6df   :  { %v2630_v46 = vpop.eup %2629  ;;  %v707_v54 = vmul.f32 %v2628_v18, %v575_v12 }
 0x6e0   :  { %v670_v3 = vmul.f32 %v2630_v46, %v538_v14 }
 0x742   :  { %v710_v45 = vpop.permute.xlu1 %709 }
 0x743   :  { %v712_v49 = vmul.f32 %v2628_v18, %v710_v45  ;;  %v673_v52 = vpop.permute.xlu0 %672 }
 0x744   :  { %v675_v53 = vmul.f32 %v2630_v46, %v673_v52 }
 0x745   :  { %714 = vrot.lane.b32.xlu1 %v712_v49, %s2980_s2 }
 0x746   :  { %677 = vrot.lane.b32.xlu0 %v675_v53, %s2980_s2 }
 0x7b7   :  { %v715_v55 = vpop.permute.xlu1 %714 }
 0x7b8   :  { %v717_v56 = vadd.f32 %v715_v55, %v707_v54  ;;  %v678_v58 = vpop.permute.xlu0 %677 }
 0x7b9   :  { %v680_v59 = vadd.f32 %v678_v58, %v670_v3 }
 0x7ba   :  { %2631 = vtanh.f32 %v717_v56 }
 0x7bb   :  { %2633 = vtanh.f32 %v680_v59 }
 0x7c4   :  { %v2632_v60 = vpop.eup %2631 }
 0x7c5   :  { %v2634_v61 = vpop.eup %2633  ;;  %720 = vrot.lane.b32.xlu1 %v2632_v60, %s2979_s11 }
 0x7c6   :  { %683 = vrot.lane.b32.xlu0 %v2634_v61, %s2979_s11 }
 0x837   :  { %v721_v62 = vpop.permute.xlu1 %720 }
 0x838   :  { %v723_v63 = vmul.f32 %v2628_v18, %v721_v62  ;;  %v684_v11 = vpop.permute.xlu0 %683 }
 0x839   :  { %v3210_v2 = vmul.f32 %v2630_v46, %v684_v11 }
 0x83a   :  { %725 = vrot.lane.b32.xlu1 %v723_v63, %s2980_s2 }
 0x83b   :  { %688 = vrot.lane.b32.xlu0 %v3210_v2, %s2979_s11 }
 0x8ac   :  { %v726_v5 = vpop.permute.xlu1 %725 }
 0x8ad   :  { %v689_v4 = vpop.permute.xlu0 %688 }
 0x8ae   :  { %691 = vst.msk [vmem:[#allocation4] sm:$0xff] %vm549_vm6, %v689_v4 }
 0x8af   :  { %728 = vst.msk [vmem:[#allocation4] sm:$0xff] %vm437_vm5, %v726_v5 }
 0x8b6   :  { %v729_v6 = vld [vmem:[#allocation4] sm:$0xff] }
 0x8b7   :  { %2233 = vmatmul.mubr.msk.f32.vlgmr.msra.gmra.mrb[12].mxu1 %vm405_vm4, %v729_v6 }
 0x8b8   :  { %2506 = vmatpush1.bf16.msra.mxu1 %v3099_v33  ;;  %1081 = vmatprep.mubr.f32.mxu1 %v2981_v25 }
 0x8b9   :  { %2508 = vmatprep.subr.bf16.mxu1 %v3103_v38 }
 0x8bc   :  { %2510 = vmatpush1.bf16.msra.mxu1 %v3108_v44 }
 0x8bd   :  { %2512 = vmatprep.subr.bf16.mxu1 %v3111_v47 }
 0x8c0   :  { %2514 = vmatpush1.bf16.msra.mxu1 %v3123_v57 }
 0x8c1   :  { %2516 = vmatprep.subr.bf16.mxu1 %v3128_v0 }
 0x8c4   :  { %2518 = vmatpush1.bf16.msra.mxu1 %v3130_v1 }
 0x8c5   :  { %2536 = vmatprep.subr.bf16.mxu1 %v3097_v32 }
 0x98a   :  { %v799_v7 = vpop.f32.mrb[12].mxu1 }
 0x98b   :  { %v841_v8 = vadd.f32 %v799_v7, %v3146_v16  ;;  %v801_v9 = vpop.f32.mrb[13].mxu1 }
 0x98c   :  { %v804_v10 = vadd.f32 %v3174_v51, %v801_v9 }
 0x98d   :  { %2635 = vtanh.f32 %v841_v8  ;;  %v2235_v14 = vmul.f32 -1.442695, %v841_v8 }
 0x98e   :  { %2637 = vtanh.f32 %v804_v10  ;;  %v2234_v15 = vmul.f32 -1.442695, %v804_v10 }
 0x98f   :  { %2639 = vpow2.f32 %v2235_v14 }
 0x990   :  { %2641 = vpow2.f32 %v2234_v15 }
 0x997   :  { %v2636_v12 = vpop.eup %2635 }
 0x998   :  { %v2638_v13 = vpop.eup %2637  ;;  %851 = vrot.lane.b32.xlu1 %v2636_v12, %s2979_s11 }
 0x999   :  { %814 = vrot.lane.b32.xlu0 %v2638_v13, %s2979_s11  ;;  %v2640_v17 = vpop.eup %2639 }
 0x99a   :  { %v2642_v19 = vpop.eup %2641  ;;  %v845_v20 = vadd.f32 1.0, %v2640_v17 }
 0x99b   :  { %v808_v22 = vadd.f32 1.0, %v2642_v19 }
 0x99c   :  { %2643 = vrcp.f32 %v845_v20 }
 0x99d   :  { %2645 = vrcp.f32 %v808_v22 }
 0x9a6   :  { %v2644_v16 = vpop.eup %2643 }
 0x9a7   :  { %v2646_v24 = vpop.eup %2645  ;;  %v849_v30 = vmul.f32 %v2644_v16, %v717_v56 }
 0x9a8   :  { %v812_v34 = vmul.f32 %v2646_v24, %v680_v59 }
 0xa0a   :  { %v852_v21 = vpop.permute.xlu1 %851 }
 0xa0b   :  { %v854_v26 = vmul.f32 %v2644_v16, %v852_v21  ;;  %v815_v27 = vpop.permute.xlu0 %814 }
 0xa0c   :  { %v817_v28 = vmul.f32 %v2646_v24, %v815_v27 }
 0xa0d   :  { %856 = vrot.lane.b32.xlu1 %v854_v26, %s2980_s2 }
 0xa0e   :  { %819 = vrot.lane.b32.xlu0 %v817_v28, %s2980_s2 }
 0xa7f   :  { %v857_v31 = vpop.permute.xlu1 %856 }
 0xa80   :  { %v859_v35 = vadd.f32 %v857_v31, %v849_v30  ;;  %v820_v37 = vpop.permute.xlu0 %819 }
 0xa81   :  { %v822_v39 = vadd.f32 %v820_v37, %v812_v34 }
 0xa82   :  { %2647 = vtanh.f32 %v859_v35 }
 0xa83   :  { %2649 = vtanh.f32 %v822_v39 }
 0xa8c   :  { %v2648_v40 = vpop.eup %2647 }
 0xa8d   :  { %v2650_v41 = vpop.eup %2649  ;;  %862 = vrot.lane.b32.xlu1 %v2648_v40, %s2979_s11 }
 0xa8e   :  { %825 = vrot.lane.b32.xlu0 %v2650_v41, %s2979_s11 }
 0xaff   :  { %v863_v42 = vpop.permute.xlu1 %862 }
 0xb00   :  { %v865_v43 = vmul.f32 %v2644_v16, %v863_v42  ;;  %v826_v18 = vpop.permute.xlu0 %825 }
 0xb01   :  { %v3235_v45 = vmul.f32 %v2646_v24, %v826_v18 }
 0xb02   :  { %867 = vrot.lane.b32.xlu1 %v865_v43, %s2980_s2 }
 0xb03   :  { %830 = vrot.lane.b32.xlu0 %v3235_v45, %s2979_s11 }
 0xb74   :  { %v868_v49 = vpop.permute.xlu1 %867 }
 0xb75   :  { %v831_v46 = vpop.permute.xlu0 %830 }
 0xb76   :  { %833 = vst.msk [vmem:[#allocation4] sm:$0xff] %vm549_vm6, %v831_v46 }
 0xb77   :  { %870 = vst.msk [vmem:[#allocation4] sm:$0xff] %vm437_vm5, %v868_v49 }
 0xb7e   :  { %v871_v52 = vld [vmem:[#allocation4] sm:$0xff] }
 0xb7f   :  { %2236 = vmatmul.mubr.msk.f32.vlgmr.msra.gmra.mrb[16].mxu0 %vm405_vm4, %v871_v52 }
 0xb80   :  { %2522 = vmatpush1.bf16.msra.mxu0 %v3099_v33  ;;  %1223 = vmatprep.mubr.f32.mxu0 %v2981_v25 }
 0xb81   :  { %2524 = vmatprep.subr.bf16.mxu0 %v3103_v38 }
 0xb84   :  { %2526 = vmatpush1.bf16.msra.mxu0 %v3108_v44 }
 0xb85   :  { %2528 = vmatprep.subr.bf16.mxu0 %v3111_v47 }
 0xb88   :  { %2530 = vmatpush1.bf16.msra.mxu0 %v3123_v57 }
 0xb89   :  { %2532 = vmatprep.subr.bf16.mxu0 %v3128_v0 }
 0xb8c   :  { %2534 = vmatpush1.bf16.msra.mxu0 %v3130_v1 }
 0xb8d   :  { %2552 = vmatprep.subr.bf16.mxu0 %v3097_v32 }
 0xc52   :  { %v941_v53 = vpop.f32.mrb[16].mxu0 }
 0xc53   :  { %v983_v54 = vadd.f32 %v941_v53, %v3149_v29  ;;  %v943_v55 = vpop.f32.mrb[17].mxu0 }
 0xc54   :  { %v946_v3 = vadd.f32 %v3174_v51, %v943_v55 }
 0xc55   :  { %2651 = vtanh.f32 %v983_v54  ;;  %v2238_v59 = vmul.f32 -1.442695, %v983_v54 }
 0xc56   :  { %2653 = vtanh.f32 %v946_v3  ;;  %v2237_v60 = vmul.f32 -1.442695, %v946_v3 }
 0xc57   :  { %2655 = vpow2.f32 %v2238_v59 }
 0xc58   :  { %2657 = vpow2.f32 %v2237_v60 }
 0xc5f   :  { %v2652_v56 = vpop.eup %2651 }
 0xc60   :  { %v2654_v58 = vpop.eup %2653  ;;  %993 = vrot.lane.b32.xlu1 %v2652_v56, %s2979_s11 }
 0xc61   :  { %956 = vrot.lane.b32.xlu0 %v2654_v58, %s2979_s11  ;;  %v2656_v61 = vpop.eup %2655 }
 0xc62   :  { %v2658_v32 = vpop.eup %2657  ;;  %v987_v62 = vadd.f32 1.0, %v2656_v61 }
 0xc63   :  { %v950_v63 = vadd.f32 1.0, %v2658_v32 }
 0xc64   :  { %2659 = vrcp.f32 %v987_v62 }
 0xc65   :  { %2661 = vrcp.f32 %v950_v63 }
 0xc6e   :  { %v2660_v29 = vpop.eup %2659 }
 0xc6f   :  { %v2662_v4 = vpop.eup %2661  ;;  %v991_v8 = vmul.f32 %v2660_v29, %v859_v35 }
 0xc70   :  { %v954_v10 = vmul.f32 %v2662_v4, %v822_v39 }
 0xcd2   :  { %v994_v11 = vpop.permute.xlu1 %993 }
 0xcd3   :  { %v996_v5 = vmul.f32 %v2660_v29, %v994_v11  ;;  %v957_v6 = vpop.permute.xlu0 %956 }
 0xcd4   :  { %v959_v7 = vmul.f32 %v2662_v4, %v957_v6 }
 0xcd5   :  { %998 = vrot.lane.b32.xlu1 %v996_v5, %s2980_s2 }
 0xcd6   :  { %961 = vrot.lane.b32.xlu0 %v959_v7, %s2980_s2 }
 0xd47   :  { %v999_v9 = vpop.permute.xlu1 %998 }
 0xd48   :  { %v1001_v12 = vadd.f32 %v999_v9, %v991_v8  ;;  %v962_v13 = vpop.permute.xlu0 %961 }
 0xd49   :  { %v964_v14 = vadd.f32 %v962_v13, %v954_v10 }
 0xd4a   :  { %2663 = vtanh.f32 %v1001_v12 }
 0xd4b   :  { %2665 = vtanh.f32 %v964_v14 }
 0xd54   :  { %v2664_v15 = vpop.eup %2663 }
 0xd55   :  { %v2666_v17 = vpop.eup %2665  ;;  %1004 = vrot.lane.b32.xlu1 %v2664_v15, %s2979_s11 }
 0xd56   :  { %967 = vrot.lane.b32.xlu0 %v2666_v17, %s2979_s11 }
 0xdc7   :  { %v1005_v19 = vpop.permute.xlu1 %1004 }
 0xdc8   :  { %v1007_v20 = vmul.f32 %v2660_v29, %v1005_v19  ;;  %v968_v22 = vpop.permute.xlu0 %967 }
 0xdc9   :  { %v3260_v16 = vmul.f32 %v2662_v4, %v968_v22 }
 0xdca   :  { %1009 = vrot.lane.b32.xlu1 %v1007_v20, %s2980_s2 }
 0xdcb   :  { %972 = vrot.lane.b32.xlu0 %v3260_v16, %s2979_s11 }
 0xe3c   :  { %v1010_v24 = vpop.permute.xlu1 %1009 }
 0xe3d   :  { %v973_v21 = vpop.permute.xlu0 %972 }
 0xe3e   :  { %975 = vst.msk [vmem:[#allocation4] sm:$0xff] %vm549_vm6, %v973_v21 }
 0xe3f   :  { %1012 = vst.msk [vmem:[#allocation4] sm:$0xff] %vm437_vm5, %v1010_v24 }
 0xe46   :  { %v1013_v26 = vld [vmem:[#allocation4] sm:$0xff] }
 0xe47   :  { %2239 = vmatmul.mubr.msk.f32.vlgmr.msra.gmra.mrb[14].mxu1 %vm405_vm4, %v1013_v26 }
 0xe48   :  { %2538 = vmatpush1.bf16.msra.mxu1 %v3099_v33  ;;  %1365 = vmatprep.mubr.f32.mxu1 %v2981_v25 }
 0xe49   :  { %2540 = vmatprep.subr.bf16.mxu1 %v3103_v38 }
 0xe4c   :  { %2542 = vmatpush1.bf16.msra.mxu1 %v3108_v44 }
 0xe4d   :  { %2544 = vmatprep.subr.bf16.mxu1 %v3111_v47 }
 0xe50   :  { %2546 = vmatpush1.bf16.msra.mxu1 %v3123_v57 }
 0xe51   :  { %2548 = vmatprep.subr.bf16.mxu1 %v3128_v0 }
 0xe54   :  { %2550 = vmatpush1.bf16.msra.mxu1 %v3130_v1 }
 0xf1a   :  { %v1083_v27 = vpop.f32.mrb[14].mxu1 }
 0xf1b   :  { %v1125_v28 = vadd.f32 %v1083_v27, %v3152_v36  ;;  %v1085_v30 = vpop.f32.mrb[15].mxu1 }
 0xf1c   :  { %v1088_v31 = vadd.f32 %v3174_v51, %v1085_v30 }
 0xf1d   :  { %2667 = vtanh.f32 %v1125_v28  ;;  %v2241_v37 = vmul.f32 -1.442695, %v1125_v28 }
 0xf1e   :  { %2669 = vtanh.f32 %v1088_v31  ;;  %v2240_v39 = vmul.f32 -1.442695, %v1088_v31 }
 0xf1f   :  { %2671 = vpow2.f32 %v2241_v37 }
 0xf20   :  { %2673 = vpow2.f32 %v2240_v39 }
 0xf27   :  { %v2668_v34 = vpop.eup %2667 }
 0xf28   :  { %v2670_v35 = vpop.eup %2669  ;;  %1135 = vrot.lane.b32.xlu1 %v2668_v34, %s2979_s11 }
 0xf29   :  { %1098 = vrot.lane.b32.xlu0 %v2670_v35, %s2979_s11  ;;  %v2672_v40 = vpop.eup %2671 }
 0xf2a   :  { %v2674_v41 = vpop.eup %2673  ;;  %v1129_v42 = vadd.f32 1.0, %v2672_v40 }
 0xf2b   :  { %v1092_v43 = vadd.f32 1.0, %v2674_v41 }
 0xf2c   :  { %2675 = vrcp.f32 %v1129_v42 }
 0xf2d   :  { %2677 = vrcp.f32 %v1092_v43 }
 0xf36   :  { %v2676_v36 = vpop.eup %2675 }
 0xf37   :  { %v2678_v46 = vpop.eup %2677  ;;  %v1133_v54 = vmul.f32 %v2676_v36, %v1001_v12 }
 0xf38   :  { %v1096_v3 = vmul.f32 %v2678_v46, %v964_v14 }
 0xf9a   :  { %v1136_v18 = vpop.permute.xlu1 %1135 }
 0xf9b   :  { %v1138_v49 = vmul.f32 %v2676_v36, %v1136_v18  ;;  %v1099_v52 = vpop.permute.xlu0 %1098 }
 0xf9c   :  { %v1101_v53 = vmul.f32 %v2678_v46, %v1099_v52 }
 0xf9d   :  { %1140 = vrot.lane.b32.xlu1 %v1138_v49, %s2980_s2 }
 0xf9e   :  { %1103 = vrot.lane.b32.xlu0 %v1101_v53, %s2980_s2 }
0x100f   :  { %v1141_v55 = vpop.permute.xlu1 %1140 }
0x1010   :  { %v1143_v56 = vadd.f32 %v1141_v55, %v1133_v54  ;;  %v1104_v58 = vpop.permute.xlu0 %1103 }
0x1011   :  { %v1106_v59 = vadd.f32 %v1104_v58, %v1096_v3 }
0x1012   :  { %2679 = vtanh.f32 %v1143_v56 }
0x1013   :  { %2681 = vtanh.f32 %v1106_v59 }
0x101c   :  { %v2680_v60 = vpop.eup %2679 }
0x101d   :  { %v2682_v61 = vpop.eup %2681  ;;  %1146 = vrot.lane.b32.xlu1 %v2680_v60, %s2979_s11 }
0x101e   :  { %1109 = vrot.lane.b32.xlu0 %v2682_v61, %s2979_s11 }
0x108f   :  { %v1147_v32 = vpop.permute.xlu1 %1146 }
0x1090   :  { %v1149_v62 = vmul.f32 %v2676_v36, %v1147_v32  ;;  %v1110_v63 = vpop.permute.xlu0 %1109 }
0x1091   :  { %v3284_v29 = vmul.f32 %v2678_v46, %v1110_v63 }
0x1092   :  { %1151 = vrot.lane.b32.xlu1 %v1149_v62, %s2980_s2 }
0x1093   :  { %1114 = vrot.lane.b32.xlu0 %v3284_v29, %s2979_s11 }
0x1104   :  { %v1152_v4 = vpop.permute.xlu1 %1151 }
0x1105   :  { %v1115_v11 = vpop.permute.xlu0 %1114 }
0x1106   :  { %1117 = vst.msk [vmem:[#allocation4] sm:$0xff] %vm549_vm6, %v1115_v11 }
0x1107   :  { %1154 = vst.msk [vmem:[#allocation4] sm:$0xff] %vm437_vm5, %v1152_v4 }
0x110e   :  { %v1155_v5 = vld [vmem:[#allocation4] sm:$0xff] }
0x110f   :  { %2242 = vmatmul.mubr.msk.f32.vlgmr.msra.gmra.mrb[18].mxu0 %vm405_vm4, %v1155_v5 }
0x1110   :  { %2554 = vmatpush1.bf16.msra.mxu0 %v3099_v33  ;;  %1507 = vmatprep.mubr.f32.mxu0 %v2981_v25 }
0x1111   :  { %2556 = vmatprep.subr.bf16.mxu0 %v3103_v38 }
0x1114   :  { %2558 = vmatpush1.bf16.msra.mxu0 %v3108_v44 }
0x1115   :  { %2560 = vmatprep.subr.bf16.mxu0 %v3111_v47 }
0x1118   :  { %2562 = vmatpush1.bf16.msra.mxu0 %v3123_v57 }
0x1119   :  { %2564 = vmatprep.subr.bf16.mxu0 %v3128_v0 }
0x111c   :  { %2566 = vmatpush1.bf16.msra.mxu0 %v3130_v1 }
0x11e2   :  { %v1225_v6 = vpop.f32.mrb[18].mxu0 }
0x11e3   :  { %v1267_v7 = vadd.f32 %v1225_v6, %v3169_v50  ;;  %v1227_v8 = vpop.f32.mrb[19].mxu0 }
0x11e4   :  { %v1230_v33 = vadd.f32 %v3174_v51, %v1227_v8 }
0x11e5   :  { %2683 = vtanh.f32 %v1267_v7  ;;  %v2244_v44 = vmul.f32 -1.442695, %v1267_v7 }
0x11e6   :  { %2685 = vtanh.f32 %v1230_v33  ;;  %v2243_v47 = vmul.f32 -1.442695, %v1230_v33 }
0x11e7   :  { %2687 = vpow2.f32 %v2244_v44 }
0x11e8   :  { %2689 = vpow2.f32 %v2243_v47 }
0x11ef   :  { %v2684_v25 = vpop.eup %2683 }
0x11f0   :  { %v2686_v38 = vpop.eup %2685  ;;  %1277 = vrot.lane.b32.xlu1 %v2684_v25, %s2979_s11 }
0x11f1   :  { %1240 = vrot.lane.b32.xlu0 %v2686_v38, %s2979_s11  ;;  %v2688_v57 = vpop.eup %2687 }
0x11f2   :  { %v2690_v0 = vpop.eup %2689  ;;  %v1271_v1 = vadd.f32 1.0, %v2688_v57 }
0x11f3   :  { %v1234_v9 = vadd.f32 1.0, %v2690_v0 }
0x11f4   :  { %2691 = vrcp.f32 %v1271_v1 }
0x11f5   :  { %2693 = vrcp.f32 %v1234_v9 }
0x11fe   :  { %v2692_v50 = vpop.eup %2691 }
0x11ff   :  { %v2694_v12 = vpop.eup %2693  ;;  %v1275_v17 = vmul.f32 %v2692_v50, %v1143_v56 }
0x1200   :  { %v1238_v20 = vmul.f32 %v2694_v12, %v1106_v59 }
0x1262   :  { %v1278_v10 = vpop.permute.xlu1 %1277 }
0x1263   :  { %v1280_v13 = vmul.f32 %v2692_v50, %v1278_v10  ;;  %v1241_v14 = vpop.permute.xlu0 %1240 }
0x1264   :  { %v1243_v15 = vmul.f32 %v2694_v12, %v1241_v14 }
0x1265   :  { %1282 = vrot.lane.b32.xlu1 %v1280_v13, %s2980_s2 }
0x1266   :  { %1245 = vrot.lane.b32.xlu0 %v1243_v15, %s2980_s2 }
0x12d7   :  { %v1283_v19 = vpop.permute.xlu1 %1282 }
0x12d8   :  { %v1285_v22 = vadd.f32 %v1283_v19, %v1275_v17  ;;  %v1246_v21 = vpop.permute.xlu0 %1245  ;;  %v1576_v17 = vld [vmem:[%s3889_s5] sm:$0xff] }
0x12d9   :  { %v1248_v24 = vadd.f32 %v1246_v21, %v1238_v20  ;;  %v1578_v20 = vld [vmem:[%s3889_s5 + $0x10] sm:$0xff] }
0x12da   :  { %2695 = vtanh.f32 %v1285_v22 }
0x12db   :  { %2697 = vtanh.f32 %v1248_v24 }
0x12e4   :  { %v2696_v26 = vpop.eup %2695 }
0x12e5   :  { %v2698_v27 = vpop.eup %2697  ;;  %1288 = vrot.lane.b32.xlu1 %v2696_v26, %s2979_s11 }
0x12e6   :  { %1251 = vrot.lane.b32.xlu0 %v2698_v27, %s2979_s11 }
0x1357   :  { %v1289_v28 = vpop.permute.xlu1 %1288 }
0x1358   :  { %v1291_v30 = vmul.f32 %v2692_v50, %v1289_v28  ;;  %v1252_v31 = vpop.permute.xlu0 %1251 }
0x1359   :  { %v3308_v34 = vmul.f32 %v2694_v12, %v1252_v31 }
0x135a   :  { %1293 = vrot.lane.b32.xlu1 %v1291_v30, %s2980_s2 }
0x135b   :  { %1256 = vrot.lane.b32.xlu0 %v3308_v34, %s2979_s11 }
0x13cc   :  { %v1294_v37 = vpop.permute.xlu1 %1293 }
0x13cd   :  { %v1257_v35 = vpop.permute.xlu0 %1256 }
0x13ce   :  { %1259 = vst.msk [vmem:[#allocation4] sm:$0xff] %vm549_vm6, %v1257_v35 }
0x13cf   :  { %1296 = vst.msk [vmem:[#allocation4] sm:$0xff] %vm437_vm5, %v1294_v37 }
0x13d6   :  { %v1297_v39 = vld [vmem:[#allocation4] sm:$0xff] }
0x13d7   :  { %2245 = vmatmul.mubr.msk.f32.vlgmr.msra.gmra.mrb[16].mxu1 %vm405_vm4, %v1297_v39 }
0x14aa   :  { %v1367_v40 = vpop.f32.mrb[16].mxu1 }
0x14ab   :  { %v1409_v41 = vadd.f32 %v1367_v40, %v3167_v48  ;;  %v1369_v42 = vpop.f32.mrb[17].mxu1 }
0x14ac   :  { %v1372_v43 = vadd.f32 %v3174_v51, %v1369_v42 }
0x14ad   :  { %2699 = vtanh.f32 %v1409_v41  ;;  %v2247_v46 = vmul.f32 -1.442695, %v1409_v41 }
0x14ae   :  { %2701 = vtanh.f32 %v1372_v43  ;;  %v2246_v49 = vmul.f32 -1.442695, %v1372_v43 }
0x14af   :  { %2703 = vpow2.f32 %v2247_v46 }
0x14b0   :  { %2705 = vpow2.f32 %v2246_v49  ;;  %v3393_v49 = vld [vmem:[%s3890_s6] ss:$0 sm:$0xff]  ;;  %s2982_s6 = smov 96  }
0x14b7   :  { %v2700_v36 = vpop.eup %2699 }
0x14b8   :  { %v2702_v18 = vpop.eup %2701  ;;  %1419 = vrot.lane.b32.xlu1 %v2700_v36, %s2979_s11 }
0x14b9   :  { %1382 = vrot.lane.b32.xlu0 %v2702_v18, %s2979_s11  ;;  %v2704_v52 = vpop.eup %2703  ;;  %v1716_v18 = vlaneseq }
0x14ba   :  { %v2706_v53 = vpop.eup %2705  ;;  %v1413_v54 = vadd.f32 1.0, %v2704_v52 }
0x14bb   :  { %v1376_v55 = vadd.f32 1.0, %v2706_v53  ;;  %v3386_v46 = vand.u32 127, %v1716_v18 }
0x14bc   :  { %2707 = vrcp.f32 %v1413_v54 }
0x14bd   :  { %2709 = vrcp.f32 %v1376_v55  ;;  %vm1718_vm7 = vcmp.ge.s32.totalorder %v3386_v46, 1  ;;  %vm1719_vm8 = vcmp.lt.s32.totalorder %v3386_v46, 3  ;;  %vm1834_vm11 = vcmp.ge.s32.totalorder %v3386_v46, 3 }
0x14be   :  { %vm3395_vm9 = vmand %vm1718_vm7, %vm1719_vm8  ;;  %vm1835_vm12 = vcmp.lt.s32.totalorder %v3386_v46, 7  ;;  %vm1949_vm14 = vcmp.ge.s32.totalorder %v3386_v46, 7  ;;  %vm1950_vm15 = vcmp.lt.s32.totalorder %v3386_v46, 20  ;;  %vm2104_vm1 = vcmp.eq.s32.totalorder %v3386_v46, 0 }
0x14bf   :  { %vm3437_vm13 = vmand %vm1834_vm11, %vm1835_vm12 }
0x14c0   :  { %vm3473_vm0 = vmand %vm1949_vm14, %vm1950_vm15 }
0x14c6   :  { %v2708_v48 = vpop.eup %2707 }
0x14c7   :  { %v2710_v56 = vpop.eup %2709  ;;  %v1417_v61 = vmul.f32 %v2708_v48, %v1285_v22  ;;  %v1579_v22 = vld [vmem:[%s3889_s5 + $0x18] sm:$0xff] }
0x14c8   :  { %v1380_v62 = vmul.f32 %v2710_v56, %v1248_v24  ;;  %v2571_v21 = vpack.c.bf16 %v1579_v22, %v1578_v20 }
0x152a   :  { %v1420_v3 = vpop.permute.xlu1 %1419 }
0x152b   :  { %v1422_v58 = vmul.f32 %v2708_v48, %v1420_v3  ;;  %v1383_v59 = vpop.permute.xlu0 %1382 }
0x152c   :  { %v1385_v60 = vmul.f32 %v2710_v56, %v1383_v59 }
0x152d   :  { %1424 = vrot.lane.b32.xlu1 %v1422_v58, %s2980_s2 }
0x152e   :  { %1387 = vrot.lane.b32.xlu0 %v1385_v60, %s2980_s2 }
0x159f   :  { %v1425_v32 = vpop.permute.xlu1 %1424 }
0x15a0   :  { %v3322_v63 = vadd.f32 %v1425_v32, %v1417_v61  ;;  %v1388_v11 = vpop.permute.xlu0 %1387 }
0x15a1   :  { %v1390_v4 = vadd.f32 %v1388_v11, %v1380_v62 }
0x15a2   :  { %2711 = vtanh.f32 %v3322_v63 }
0x15a3   :  { %2713 = vtanh.f32 %v1390_v4 }
0x15ac   :  { %v2712_v5 = vpop.eup %2711 }
0x15ad   :  { %v2714_v6 = vpop.eup %2713  ;;  %1430 = vrot.lane.b32.xlu1 %v2712_v5, %s2979_s11 }
0x15ae   :  { %1393 = vrot.lane.b32.xlu0 %v2714_v6, %s2979_s11 }
0x161f   :  { %v1431_v7 = vpop.permute.xlu1 %1430 }
0x1620   :  { %v1433_v8 = vmul.f32 %v2708_v48, %v1431_v7  ;;  %v1394_v33 = vpop.permute.xlu0 %1393 }
0x1621   :  { %v3327_v25 = vmul.f32 %v2710_v56, %v1394_v33 }
0x1622   :  { %1435 = vrot.lane.b32.xlu1 %v1433_v8, %s2980_s2 }
0x1623   :  { %1398 = vrot.lane.b32.xlu0 %v3327_v25, %s2979_s11 }
0x1694   :  { %v1436_v44 = vpop.permute.xlu1 %1435 }
0x1695   :  { %v1399_v38 = vpop.permute.xlu0 %1398 }
0x1696   :  { %1401 = vst.msk [vmem:[#allocation4] sm:$0xff] %vm549_vm6, %v1399_v38 }
0x1697   :  { %1438 = vst.msk [vmem:[#allocation4] sm:$0xff] %vm437_vm5, %v1436_v44 }
0x169e   :  { %v1439_v47 = vld [vmem:[#allocation4] sm:$0xff] }
0x169f   :  { %2248 = vmatmul.mubr.msk.f32.vlgmr.msra.gmra.mrb[20].mxu0 %vm405_vm4, %v1439_v47 }
0x1772   :  { %v1509_v57 = vpop.f32.mrb[20].mxu0 }
0x1773   :  { %v1510_v0 = vpop.f32.mrb[21].mxu0 }
0x1774   :  { %v1513_v1 = vadd.f32 %v3174_v51, %v1510_v0  ;;  %v1577_v51 = vld [vmem:[%s3889_s5 + $0x8] sm:$0xff] }
0x1775   :  { %v2567_v19 = vpack.c.bf16 %v1577_v51, %v1576_v17 }
0x1776   :  { %2715 = vtanh.f32 %v1513_v1  ;;  %v2249_v50 = vmul.f32 -1.442695, %v1513_v1 }
0x1777   :  { %2568 = vmatprep.subr.bf16.mxu0 %v2567_v19  ;;  %2575 = vmatprep.subr.bf16.mxu1 %v2567_v19 }
0x1778   :  { %2717 = vpow2.f32 %v2249_v50  ;;  %2570 = vmatpush3.bf16.msra.mxu0 %v2567_v19  ;;  %2577 = vmatpush3.bf16.msra.mxu1 %v2567_v19 }
0x1779   :  { %2572 = vmatprep.subr.bf16.mxu0 %v2571_v21  ;;  %2576 = vmatprep.subr.bf16.mxu1 %v2571_v21 }
0x177c   :  { %2574 = vmatpush3.bf16.msra.mxu0 %v2571_v21  ;;  %2578 = vmatpush3.bf16.msra.mxu1 %v2571_v21 }
0x1780   :  { %v2716_v9 = vpop.eup %2715 }
0x1781   :  { %1523 = vrot.lane.b32.xlu0 %v2716_v9, %s2979_s11 }
0x1782   :  { %v2718_v10 = vpop.eup %2717 }
0x1783   :  { %v1517_v12 = vadd.f32 1.0, %v2718_v10 }
0x1785   :  { %2719 = vrcp.f32 %v1517_v12 }
0x178f   :  { %v2720_v13 = vpop.eup %2719 }
0x17f3   :  { %v1524_v14 = vpop.permute.xlu0 %1523 }
0x17f4   :  { %v1526_v15 = vmul.f32 %v2720_v13, %v1524_v14 }
0x17f6   :  { %1528 = vrot.lane.b32.xlu1 %v1526_v15, %s2980_s2 }
0x17fa   :  { %834 = vrot.lane.b32.xlu1 %v3235_v45, %s2980_s2  ;;  %v1521_v45 = vmul.f32 %v2720_v13, %v1390_v4 }
0x17fe   :  { %1118 = vrot.lane.b32.xlu1 %v3284_v29, %s2980_s2 }
0x1802   :  { %551 = vrot.lane.b32.xlu1 %v3185_v23, %s2980_s2 }
0x1806   :  { %692 = vrot.lane.b32.xlu1 %v3210_v2, %s2980_s2 }
0x1868   :  { %v1529_v24 = vpop.permute.xlu1 %1528 }
0x1869   :  { %v3358_v26 = vadd.f32 %v1529_v24, %v1521_v45 }
0x186b   :  { %2721 = vtanh.f32 %v3358_v26 }
0x186c   :  { %v835_v27 = vpop.permute.xlu1 %834 }
0x186d   :  { %838 = vst.msk [vmem:[#allocation3 + $0x10] sm:$0xff] %vm437_vm5, %v835_v27 }
0x1870   :  { %v1119_v28 = vpop.permute.xlu1 %1118 }
0x1871   :  { %1122 = vst.msk [vmem:[#allocation3 + $0x20] sm:$0xff] %vm437_vm5, %v1119_v28 }
0x1874   :  { %v552_v29 = vpop.permute.xlu1 %551  ;;  %v1570_v30 = vld [vmem:[#allocation3 + $0x10] sm:$0xff] }
0x1875   :  { %v2722_v31 = vpop.eup %2721  ;;  %554 = vst.msk [vmem:[#allocation3] sm:$0xff] %vm437_vm5, %v552_v29  ;;  %2384 = vmatprep.mubr.msk.f32.mxu1 %vm437_vm5, %v1570_v30 }
0x1876   :  { %1534 = vrot.lane.b32.xlu0 %v2722_v31, %s2979_s11 }
0x1878   :  { %v693_v23 = vpop.permute.xlu1 %692  ;;  %v1572_v42 = vld [vmem:[#allocation3 + $0x20] sm:$0xff] }
0x1879   :  { %696 = vst.msk [vmem:[#allocation3 + $0x8] sm:$0xff] %vm437_vm5, %v693_v23 }
0x187a   :  { %976 = vrot.lane.b32.xlu0 %v3260_v16, %s2980_s2 }
0x187c   :  { %v1568_v2 = vld [vmem:[#allocation3] sm:$0xff] }
0x187d   :  { %2381 = vmatprep.mubr.msk.f32.mxu0 %vm437_vm5, %v1568_v2 }
0x187e   :  { %1260 = vrot.lane.b32.xlu0 %v3308_v34, %s2980_s2 }
0x1880   :  { %v1569_v35 = vld [vmem:[#allocation3 + $0x8] sm:$0xff] }
0x1881   :  { %2382 = vmatmul.mubr.msk.f32.vlgmr.msra.gmra.mrb[22].mxu0 %vm437_vm5, %v1569_v35 }
0x1882   :  { %1402 = vrot.lane.b32.xlu0 %v3327_v25, %s2980_s2 }
0x18e8   :  { %v1535_v37 = vpop.permute.xlu0 %1534 }
0x18e9   :  { %v3375_v39 = vmul.f32 %v2720_v13, %v1535_v37 }
0x18eb   :  { %1543 = vrot.lane.b32.xlu0 %v3375_v39, %s2980_s2  ;;  %s2983_s2 = smov [#allocation11]  }
0x18ec   :  { %v977_v40 = vpop.permute.xlu0 %976  ;;  %s2184_s12 = sshll.u32 %s2983_s2, 4  ;;  %s2185_s12 = int_to_ptr.vmem [resolvable:$true] %s2184_s12 }
0x18ed   :  { %980 = vst.msk [vmem:[#allocation3 + $0x18] sm:$0xff] %vm437_vm5, %v977_v40  ;;  %s2917_s10 = scalar_lea.vmem %s2185_s12, 256  ;;  %p2922_p11 = scmp.lt.s32.totalorder %s2185_s12, %s2185_s12 }
0x18ee   :  { %p2918_p10 = scmp.ne.s32.totalorder %s2185_s12, %s2917_s10  ;;  %p2923_p12 = scmp.lt.s32.totalorder %s2917_s10, %s2917_s10 }
0x18f0   :  { %v1261_v16 = vpop.permute.xlu0 %1260  ;;  %p2924_p13 = por %p2923_p12, %p2922_p11 }
0x18f1   :  { %1264 = vst.msk [vmem:[#allocation3 + $0x28] sm:$0xff] %vm437_vm5, %v1261_v16 }
0x18f2   :  { %p2925_p0 = pnand %p2924_p13, %p2918_p10 }
0x18f4   :  { %v1403_v41 = vpop.permute.xlu0 %1402  ;;  %v1571_v34 = vld [vmem:[#allocation3 + $0x18] sm:$0xff] }
0x18f5   :  { %1406 = vst.msk [vmem:[#allocation3 + $0x30] sm:$0xff] %vm437_vm5, %v1403_v41  ;;  %2385 = vmatmul.mubr.msk.f32.vlgmr.msra.gmra.mrb[18].mxu1 %vm437_vm5, %v1571_v34 }
0x18f6   :  { %2387 = vmatprep.mubr.msk.f32.mxu1 %vm437_vm5, %v1572_v42 }
0x18f8   :  { %v1573_v43 = vld [vmem:[#allocation3 + $0x28] sm:$0xff] }
0x18f9   :  { %2388 = vmatmul.mubr.msk.f32.gmra.mrb[20].mxu1 %vm437_vm5, %v1573_v43 }
0x18fc   :  { %v1574_v36 = vld [vmem:[#allocation3 + $0x30] sm:$0xff] }
0x18fd   :  { %2390 = vmatprep.mubr.msk.f32.mxu1 %vm437_vm5, %v1574_v36 }
0x1954   :  { %v2383_v52 = vpop.f32.mrb[22].mxu0 }
0x1955   :  { %v3400_v54 = vadd.f32 %v2383_v52, %v3393_v49  ;;  %v1677_v55 = vpop.f32.mrb[23].mxu0 }
0x1956   :  { %v3403_v48 = vadd.f32 %v3393_v49, %v1677_v55 }
0x1957   :  { %v1722_v3 = vsel %vm3395_vm9, %v3400_v54, -1e+30  ;;  %v1838_v50 = vsel %vm3437_vm13, %v3400_v54, -1e+30  ;;  %v1953_v24 = vsel %vm3473_vm0, %v3400_v54, -1e+30 }
0x1958   :  { %v1733_v56 = vsel %vm1729_vm10, %v1722_v3, -inf  ;;  %v1721_v58 = vsel %vm3395_vm9, %v3403_v48, -1e+30  ;;  %v1837_v10 = vsel %vm3437_vm13, %v3403_v48, -1e+30  ;;  %v1848_v12 = vsel %vm1729_vm10, %v1838_v50, -inf }
0x1959   :  { %1734 = vmax.xlane.f32.xlu0 %v1733_v56  ;;  %v1730_v59 = vsel %vm1729_vm10, %v1721_v58, -inf  ;;  %v1845_v13 = vsel %vm1729_vm10, %v1837_v10, -inf  ;;  %v1952_v27 = vsel %vm3473_vm0, %v3403_v48, -1e+30  ;;  %v1963_v28 = vsel %vm1729_vm10, %v1953_v24, -inf }
0x195a   :  { %1731 = vmax.xlane.f32.xlu1 %v1730_v59  ;;  %v1960_v29 = vsel %vm1729_vm10, %v1952_v27, -inf }
0x195d   :  { %v1544_v60 = vpop.permute.xlu0 %1543 }
0x195e   :  { %1547 = vst.msk [vmem:[#allocation3 + $0x38] sm:$0xff] %vm437_vm5, %v1544_v60 }
0x1965   :  { %v1575_v61 = vld [vmem:[#allocation3 + $0x38] sm:$0xff] }
0x1966   :  { %2391 = vmatmul.mubr.msk.f32.gmra.mrb[22].mxu1 %vm437_vm5, %v1575_v61 }
0x19c8   :  { %v2386_v32 = vpop.f32.mrb[18].mxu1 }
0x19c9   :  { %v3416_v62 = vadd.f32 %v2386_v32, %v3393_v49  ;;  %v1687_v11 = vpop.f32.mrb[19].mxu1 }
0x19ca   :  { %v3419_v4 = vadd.f32 %v3393_v49, %v1687_v11 }
0x19cb   :  { %v1724_v5 = vsel %vm3395_vm9, %v3416_v62, -1e+30  ;;  %v1840_v14 = vsel %vm3437_vm13, %v3416_v62, -1e+30  ;;  %v1955_v30 = vsel %vm3473_vm0, %v3416_v62, -1e+30 }
0x19cc   :  { %v2389_v6 = vpop.f32.mrb[20].mxu1  ;;  %v1739_v7 = vsel %vm1729_vm10, %v1724_v5, -inf  ;;  %v1723_v8 = vsel %vm3395_vm9, %v3419_v4, -1e+30  ;;  %v1839_v15 = vsel %vm3437_vm13, %v3419_v4, -1e+30 }
0x19cd   :  { %v3431_v33 = vadd.f32 %v2389_v6, %v3393_v49  ;;  %1740 = vmax.xlane.f32.xlu1 %v1739_v7  ;;  %v1697_v25 = vpop.f32.mrb[21].mxu1  ;;  %v1736_v38 = vsel %vm1729_vm10, %v1723_v8, -inf  ;;  %v1854_v17 = vsel %vm1729_vm10, %v1840_v14, -inf  ;;  %v1851_v51 = vsel %vm1729_vm10, %v1839_v15, -inf }
0x19ce   :  { %v3435_v44 = vadd.f32 %v3393_v49, %v1697_v25  ;;  %1737 = vmax.xlane.f32.xlu0 %v1736_v38  ;;  %v1954_v31 = vsel %vm3473_vm0, %v3419_v4, -1e+30  ;;  %v1969_v23 = vsel %vm1729_vm10, %v1955_v30, -inf }
0x19cf   :  { %v1726_v57 = vsel %vm3395_vm9, %v3431_v33, -1e+30  ;;  %v1842_v19 = vsel %vm3437_vm13, %v3431_v33, -1e+30  ;;  %v1966_v2 = vsel %vm1729_vm10, %v1954_v31, -inf }
0x19d0   :  { %v1745_v0 = vsel %vm1729_vm10, %v1726_v57, -inf  ;;  %v1725_v1 = vsel %vm3395_vm9, %v3435_v44, -1e+30  ;;  %v1841_v20 = vsel %vm3437_vm13, %v3435_v44, -1e+30  ;;  %v1860_v21 = vsel %vm1729_vm10, %v1842_v19, -inf }
0x19d1   :  { %1746 = vmax.xlane.f32.xlu1 %v1745_v0  ;;  %v1742_v9 = vsel %vm1729_vm10, %v1725_v1, -inf  ;;  %v1857_v45 = vsel %vm1729_vm10, %v1841_v20, -inf  ;;  %v1957_v35 = vsel %vm3473_vm0, %v3431_v33, -1e+30  ;;  %v1956_v37 = vsel %vm3473_vm0, %v3435_v44, -1e+30 }
0x19d2   :  { %1743 = vmax.xlane.f32.xlu0 %v1742_v9  ;;  %v1975_v40 = vsel %vm1729_vm10, %v1957_v35, -inf  ;;  %v1972_v16 = vsel %vm1729_vm10, %v1956_v37, -inf }
0x19d5   :  { %1849 = vmax.xlane.f32.xlu1 %v1848_v12 }
0x19d6   :  { %1846 = vmax.xlane.f32.xlu0 %v1845_v13 }
0x19d9   :  { %1855 = vmax.xlane.f32.xlu1 %v1854_v17 }
0x19da   :  { %1852 = vmax.xlane.f32.xlu0 %v1851_v51 }
0x19dd   :  { %1861 = vmax.xlane.f32.xlu1 %v1860_v21 }
0x19de   :  { %1858 = vmax.xlane.f32.xlu0 %v1857_v45 }
0x19e1   :  { %1964 = vmax.xlane.f32.xlu1 %v1963_v28 }
0x19e2   :  { %1961 = vmax.xlane.f32.xlu0 %v1960_v29 }
0x19e5   :  { %1970 = vmax.xlane.f32.xlu1 %v1969_v23 }
0x19e6   :  { %1967 = vmax.xlane.f32.xlu0 %v1966_v2  ;;  %v3507_v42 = vpop.xlane.xlu0 %1734 }
0x19e7   :  { %v3503_v41 = vpop.xlane.xlu1 %1731  ;;  %v1755_v43 = vsub.f32 %v3400_v54, %v3507_v42 }
0x19e8   :  { %v1754_v34 = vsub.f32 %v3403_v48, %v3503_v41 }
0x19e9   :  { %1976 = vmax.xlane.f32.xlu1 %v1975_v40  ;;  %v1763_v52 = vsel %vm3395_vm9, %v1755_v43, -1e+30 }
0x19ea   :  { %1973 = vmax.xlane.f32.xlu0 %v1972_v16  ;;  %v1762_v36 = vsel %vm3395_vm9, %v1754_v34, -1e+30  ;;  %v1772_v59 = vmul.f32 1.442695, %v1763_v52 }
0x19eb   :  { %v1770_v18 = vmul.f32 1.442695, %v1762_v36 }
0x19ed   :  { %2723 = vpow2.f32 %v1770_v18 }
0x19ee   :  { %2725 = vpow2.f32 %v1772_v59 }
0x19f7   :  { %v2724_v57 = vpop.eup %2723 }
0x19f8   :  { %v1786_v1 = vsel %vm1729_vm10, %v2724_v57, 0.0  ;;  %v2726_v9 = vpop.eup %2725 }
0x19f9   :  { %v1789_v50 = vsel %vm1729_vm10, %v2726_v9, 0.0 }
0x1a39   :  { %v2392_v55 = vpop.f32.mrb[22].mxu1 }
0x1a3a   :  { %v3516_v3 = vadd.f32 %v2392_v55, %v3393_v49  ;;  %v1707_v56 = vpop.f32.mrb[23].mxu1 }
0x1a3b   :  { %v3519_v58 = vadd.f32 %v3393_v49, %v1707_v56 }
0x1a3c   :  { %v1728_v60 = vsel %vm3395_vm9, %v3516_v3, -1e+30  ;;  %v1844_v49 = vsel %vm3437_vm13, %v3516_v3, -1e+30  ;;  %v1959_v8 = vsel %vm3473_vm0, %v3516_v3, -1e+30 }
0x1a3d   :  { %v1751_v61 = vsel %vm1729_vm10, %v1728_v60, -inf  ;;  %v1727_v32 = vsel %vm3395_vm9, %v3519_v58, -1e+30  ;;  %v1843_v5 = vsel %vm3437_vm13, %v3519_v58, -1e+30  ;;  %v1866_v6 = vsel %vm1729_vm10, %v1844_v49, -inf }
0x1a3e   :  { %1752 = vmax.xlane.f32.xlu1 %v1751_v61  ;;  %v1748_v11 = vsel %vm1729_vm10, %v1727_v32, -inf  ;;  %v1863_v7 = vsel %vm1729_vm10, %v1843_v5, -inf  ;;  %v1958_v25 = vsel %vm3473_vm0, %v3519_v58, -1e+30  ;;  %v1981_v38 = vsel %vm1729_vm10, %v1959_v8, -inf }
0x1a3f   :  { %1749 = vmax.xlane.f32.xlu0 %v1748_v11  ;;  %v1978_v0 = vsel %vm1729_vm10, %v1958_v25, -inf }
0x1a42   :  { %1867 = vmax.xlane.f32.xlu1 %v1866_v6 }
0x1a43   :  { %1864 = vmax.xlane.f32.xlu0 %v1863_v7 }
0x1a46   :  { %1982 = vmax.xlane.f32.xlu1 %v1981_v38 }
0x1a47   :  { %1979 = vmax.xlane.f32.xlu0 %v1978_v0 }
0x1a4a   :  { %1787 = vadd.xlane.f32.xlu1 %v1786_v1 }
0x1a4e   :  { %1790 = vadd.xlane.f32.xlu1 %v1789_v50 }
0x1a5a   :  { %v3547_v10 = vpop.xlane.xlu1 %1740 }
0x1a5b   :  { %v1757_v12 = vsub.f32 %v3416_v62, %v3547_v10  ;;  %v3551_v13 = vpop.xlane.xlu0 %1737 }
0x1a5c   :  { %v1756_v14 = vsub.f32 %v3419_v4, %v3551_v13 }
0x1a5d   :  { %v1765_v15 = vsel %vm3395_vm9, %v1757_v12, -1e+30  ;;  %1539 = vrot.lane.b32.xlu0 %v3375_v39, %s2979_s11 }
0x1a5e   :  { %v1764_v17 = vsel %vm3395_vm9, %v1756_v14, -1e+30  ;;  %v3561_v51 = vpop.xlane.xlu1 %1746  ;;  %v1776_v19 = vmul.f32 1.442695, %v1765_v15 }
0x1a5f   :  { %v1774_v20 = vmul.f32 1.442695, %v1764_v17  ;;  %v3563_v21 = vpop.xlane.xlu0 %1743  ;;  %v1759_v45 = vsub.f32 %v3431_v33, %v3561_v51 }
0x1a60   :  { %v1758_v24 = vsub.f32 %v3435_v44, %v3563_v21 }
0x1a61   :  { %2727 = vpow2.f32 %v1774_v20  ;;  %v1767_v30 = vsel %vm3395_vm9, %v1759_v45, -1e+30 }
0x1a62   :  { %v1766_v27 = vsel %vm3395_vm9, %v1758_v24, -1e+30  ;;  %2729 = vpow2.f32 %v1776_v19  ;;  %v3571_v28 = vpop.xlane.xlu1 %1849  ;;  %v1780_v23 = vmul.f32 1.442695, %v1767_v30 }
0x1a63   :  { %v1778_v39 = vmul.f32 1.442695, %v1766_v27  ;;  %v3573_v29 = vpop.xlane.xlu0 %1846  ;;  %v1870_v35 = vsub.f32 %v3400_v54, %v3571_v28 }
0x1a64   :  { %v1869_v31 = vsub.f32 %v3403_v48, %v3573_v29 }
0x1a65   :  { %2731 = vpow2.f32 %v1778_v39  ;;  %v1878_v36 = vsel %vm3437_vm13, %v1870_v35, -1e+30 }
0x1a66   :  { %v1877_v37 = vsel %vm3437_vm13, %v1869_v31, -1e+30  ;;  %v3585_v40 = vpop.xlane.xlu1 %1855  ;;  %2733 = vpow2.f32 %v1780_v23  ;;  %v1887_v56 = vmul.f32 1.442695, %v1878_v36 }
0x1a67   :  { %v3579_v2 = vpop.xlane.xlu0 %1852  ;;  %v1885_v34 = vmul.f32 1.442695, %v1877_v37  ;;  %v1872_v61 = vsub.f32 %v3416_v62, %v3585_v40 }
0x1a68   :  { %v1871_v18 = vsub.f32 %v3419_v4, %v3579_v2 }
0x1a69   :  { %2735 = vpow2.f32 %v1885_v34  ;;  %v1880_v38 = vsel %vm3437_vm13, %v1872_v61, -1e+30 }
0x1a6a   :  { %v3594_v59 = vpop.xlane.xlu1 %1861  ;;  %v1879_v32 = vsel %vm3437_vm13, %v1871_v18, -1e+30  ;;  %2737 = vpow2.f32 %v1887_v56  ;;  %v1891_v14 = vmul.f32 1.442695, %v1880_v38 }
0x1a6b   :  { %v2728_v16 = vpop.eup %2727  ;;  %v3587_v43 = vpop.xlane.xlu0 %1858  ;;  %v1889_v7 = vmul.f32 1.442695, %v1879_v32  ;;  %v1874_v19 = vsub.f32 %v3431_v33, %v3594_v59 }
0x1a6c   :  { %v1792_v52 = vsel %vm1729_vm10, %v2728_v16, 0.0  ;;  %v2730_v55 = vpop.eup %2729  ;;  %v1873_v57 = vsub.f32 %v3435_v44, %v3587_v43 }
0x1a6d   :  { %1793 = vadd.xlane.f32.xlu1 %v1792_v52  ;;  %v1795_v49 = vsel %vm1729_vm10, %v2730_v55, 0.0  ;;  %v1882_v35 = vsel %vm3437_vm13, %v1874_v19, -1e+30 }
0x1a6e   :  { %v3616_v50 = vpop.xlane.xlu1 %1964  ;;  %v1881_v20 = vsel %vm3437_vm13, %v1873_v57, -1e+30  ;;  %v1895_v18 = vmul.f32 1.442695, %v1882_v35 }
0x1a6f   :  { %v3596_v60 = vpop.xlane.xlu0 %1961  ;;  %v2732_v5 = vpop.eup %2731  ;;  %v1893_v30 = vmul.f32 1.442695, %v1881_v20  ;;  %v1985_v37 = vsub.f32 %v3400_v54, %v3616_v50 }
0x1a70   :  { %v1984_v11 = vsub.f32 %v3403_v48, %v3596_v60  ;;  %v1798_v1 = vsel %vm1729_vm10, %v2732_v5, 0.0  ;;  %v2734_v9 = vpop.eup %2733 }
0x1a71   :  { %1796 = vadd.xlane.f32.xlu1 %v1795_v49  ;;  %v1801_v24 = vsel %vm1729_vm10, %v2734_v9, 0.0  ;;  %v1993_v52 = vsel %vm3473_vm0, %v1985_v37, -1e+30 }
0x1a72   :  { %v1992_v6 = vsel %vm3473_vm0, %v1984_v11, -1e+30  ;;  %v3631_v31 = vpop.xlane.xlu1 %1970  ;;  %v2002_v5 = vmul.f32 1.442695, %v1993_v52 }
0x1a73   :  { %v2000_v8 = vmul.f32 1.442695, %v1992_v6  ;;  %v3607_v25 = vpop.xlane.xlu0 %1967  ;;  %v2736_v27 = vpop.eup %2735  ;;  %v1987_v55 = vsub.f32 %v3416_v62, %v3631_v31 }
0x1a74   :  { %v1986_v0 = vsub.f32 %v3419_v4, %v3607_v25  ;;  %v1901_v16 = vsel %vm1729_vm10, %v2736_v27, 0.0  ;;  %v2738_v34 = vpop.eup %2737 }
0x1a75   :  { %2739 = vpow2.f32 %v2000_v8  ;;  %1799 = vadd.xlane.f32.xlu1 %v1798_v1  ;;  %v1904_v56 = vsel %vm1729_vm10, %v2738_v34, 0.0  ;;  %v1995_v6 = vsel %vm3473_vm0, %v1987_v55, -1e+30 }
0x1a76   :  { %v1994_v12 = vsel %vm3473_vm0, %v1986_v0, -1e+30  ;;  %2741 = vpow2.f32 %v1889_v7  ;;  %v3644_v11 = vpop.xlane.xlu1 %1976  ;;  %v2006_v1 = vmul.f32 1.442695, %v1995_v6 }
0x1a77   :  { %v2004_v15 = vmul.f32 1.442695, %v1994_v12  ;;  %v3620_v17 = vpop.xlane.xlu0 %1973  ;;  %v1989_v7 = vsub.f32 %v3431_v33, %v3644_v11 }
0x1a78   :  { %v1988_v45 = vsub.f32 %v3435_v44, %v3620_v17 }
0x1a79   :  { %2743 = vpow2.f32 %v2004_v15  ;;  %1802 = vadd.xlane.f32.xlu1 %v1801_v24  ;;  %v1997_v9 = vsel %vm3473_vm0, %v1989_v7, -1e+30 }
0x1a7a   :  { %v1996_v39 = vsel %vm3473_vm0, %v1988_v45, -1e+30  ;;  %2745 = vpow2.f32 %v1891_v14  ;;  %v2010_v19 = vmul.f32 1.442695, %v1997_v9 }
0x1a7b   :  { %v2008_v23 = vmul.f32 1.442695, %v1996_v39 }
0x1a7d   :  { %2747 = vpow2.f32 %v2008_v23  ;;  %1902 = vadd.xlane.f32.xlu1 %v1901_v16 }
0x1a7e   :  { %2749 = vpow2.f32 %v1893_v30 }
0x1a7f   :  { %v2740_v36 = vpop.eup %2739  ;;  %2751 = vpow2.f32 %v1895_v18 }
0x1a80   :  { %v2016_v61 = vsel %vm1729_vm10, %v2740_v36, 0.0  ;;  %v2742_v32 = vpop.eup %2741  ;;  %2753 = vpow2.f32 %v2002_v5 }
0x1a81   :  { %1905 = vadd.xlane.f32.xlu1 %v1904_v56  ;;  %2017 = vadd.xlane.f32.xlu0 %v2016_v61  ;;  %v1907_v8 = vsel %vm1729_vm10, %v2742_v32, 0.0  ;;  %2755 = vpow2.f32 %v2006_v1 }
0x1a82   :  { %2757 = vpow2.f32 %v2010_v19 }
0x1a83   :  { %v2744_v49 = vpop.eup %2743 }
0x1a84   :  { %v2022_v38 = vsel %vm1729_vm10, %v2744_v49, 0.0  ;;  %v2746_v57 = vpop.eup %2745 }
0x1a85   :  { %1908 = vadd.xlane.f32.xlu1 %v1907_v8  ;;  %2023 = vadd.xlane.f32.xlu0 %v2022_v38  ;;  %v1910_v12 = vsel %vm1729_vm10, %v2746_v57, 0.0 }
0x1a87   :  { %v2748_v0 = vpop.eup %2747 }
0x1a88   :  { %v2028_v14 = vsel %vm1729_vm10, %v2748_v0, 0.0  ;;  %v2750_v15 = vpop.eup %2749 }
0x1a89   :  { %1911 = vadd.xlane.f32.xlu1 %v1910_v12  ;;  %2029 = vadd.xlane.f32.xlu0 %v2028_v14  ;;  %v1913_v20 = vsel %vm1729_vm10, %v2750_v15, 0.0  ;;  %v2752_v45 = vpop.eup %2751 }
0x1a8a   :  { %v1916_v24 = vsel %vm1729_vm10, %v2752_v45, 0.0  ;;  %v2754_v27 = vpop.eup %2753 }
0x1a8b   :  { %v2019_v39 = vsel %vm1729_vm10, %v2754_v27, 0.0  ;;  %v2756_v30 = vpop.eup %2755 }
0x1a8c   :  { %v2025_v23 = vsel %vm1729_vm10, %v2756_v30, 0.0  ;;  %v2758_v35 = vpop.eup %2757 }
0x1a8d   :  { %1914 = vadd.xlane.f32.xlu1 %v1913_v20  ;;  %v2031_v37 = vsel %vm1729_vm10, %v2758_v35, 0.0 }
0x1a91   :  { %1917 = vadd.xlane.f32.xlu1 %v1916_v24 }
0x1a95   :  { %2020 = vadd.xlane.f32.xlu1 %v2019_v39 }
0x1a99   :  { %2026 = vadd.xlane.f32.xlu1 %v2025_v23 }
0x1a9d   :  { %2032 = vadd.xlane.f32.xlu1 %v2031_v37 }
0x1acb   :  { %v3661_v16 = vpop.xlane.xlu1 %1752 }
0x1acc   :  { %v1761_v34 = vsub.f32 %v3516_v3, %v3661_v16  ;;  %v3665_v36 = vpop.xlane.xlu0 %1749 }
0x1acd   :  { %v1760_v18 = vsub.f32 %v3519_v58, %v3665_v36 }
0x1ace   :  { %v1769_v52 = vsel %vm3395_vm9, %v1761_v34, -1e+30 }
0x1acf   :  { %v1784_v55 = vmul.f32 1.442695, %v1769_v52  ;;  %v1768_v56 = vsel %vm3395_vm9, %v1760_v18, -1e+30  ;;  %v3673_v61 = vpop.xlane.xlu1 %1867 }
0x1ad0   :  { %v1782_v32 = vmul.f32 1.442695, %v1768_v56  ;;  %v1876_v49 = vsub.f32 %v3516_v3, %v3673_v61  ;;  %v3677_v5 = vpop.xlane.xlu0 %1864 }
0x1ad1   :  { %2759 = vpow2.f32 %v1784_v55  ;;  %v1875_v6 = vsub.f32 %v3519_v58, %v3677_v5 }
0x1ad2   :  { %2761 = vpow2.f32 %v1782_v32  ;;  %v1884_v7 = vsel %vm3437_vm13, %v1876_v49, -1e+30 }
0x1ad3   :  { %v1899_v8 = vmul.f32 1.442695, %v1884_v7  ;;  %v1883_v38 = vsel %vm3437_vm13, %v1875_v6, -1e+30  ;;  %v3685_v57 = vpop.xlane.xlu1 %1982 }
0x1ad4   :  { %v1897_v0 = vmul.f32 1.442695, %v1883_v38  ;;  %v1991_v1 = vsub.f32 %v3516_v3, %v3685_v57  ;;  %v3689_v9 = vpop.xlane.xlu0 %1979  ;;  %v2259_v38 = vmul.f32 -1.442695, %v3403_v48 }
0x1ad5   :  { %2763 = vpow2.f32 %v1899_v8  ;;  %v1990_v12 = vsub.f32 %v3519_v58, %v3689_v9 }
0x1ad6   :  { %2765 = vpow2.f32 %v1897_v0  ;;  %v1999_v14 = vsel %vm3473_vm0, %v1991_v1, -1e+30 }
0x1ad7   :  { %v2014_v15 = vmul.f32 1.442695, %v1999_v14  ;;  %v1998_v19 = vsel %vm3473_vm0, %v1990_v12, -1e+30  ;;  %v1788_v49 = vpop.xlane.xlu1 %1787  ;;  %v2261_v12 = vmul.f32 -1.442695, %v3419_v4 }
0x1ad8   :  { %v2012_v20 = vmul.f32 1.442695, %v1998_v19  ;;  %v1540_v45 = vpop.permute.xlu0 %1539 }
0x1ad9   :  { %2767 = vpow2.f32 %v2014_v15  ;;  %1542 = vst.msk [vmem:[#allocation4] sm:$0xff] %vm549_vm6, %v1540_v45  ;;  %v2260_v15 = vmul.f32 -1.442695, %v3400_v54 }
0x1ada   :  { %2769 = vpow2.f32 %v2012_v20 }
0x1adb   :  { %v2760_v24 = vpop.eup %2759  ;;  %v1791_v6 = vpop.xlane.xlu1 %1790  ;;  %2771 = vpow2.f32 %v2259_v38 }
0x1adc   :  { %v2762_v27 = vpop.eup %2761  ;;  %v1807_v39 = vsel %vm1729_vm10, %v2760_v24, 0.0  ;;  %2773 = vlog2.f32 %v1788_v49 }
0x1add   :  { %1808 = vadd.xlane.f32.xlu1 %v1807_v39  ;;  %v1804_v30 = vsel %vm1729_vm10, %v2762_v27, 0.0 }
0x1ade   :  { %1805 = vadd.xlane.f32.xlu0 %v1804_v30  ;;  %v2262_v30 = vmul.f32 -1.442695, %v3416_v62 }
0x1adf   :  { %v2764_v23 = vpop.eup %2763 }
0x1ae0   :  { %v2766_v35 = vpop.eup %2765  ;;  %v1922_v37 = vsel %vm1729_vm10, %v2764_v23, 0.0  ;;  %v1550_v34 = vld [vmem:[#allocation4] sm:$0xff] }
0x1ae1   :  { %1923 = vadd.xlane.f32.xlu1 %v1922_v37  ;;  %v1919_v18 = vsel %vm1729_vm10, %v2766_v35, 0.0  ;;  %1549 = vst.msk [vmem:[#allocation11] sm:$0xff] %vm437_vm5, %v1550_v34 }
0x1ae2   :  { %1920 = vadd.xlane.f32.xlu0 %v1919_v18 }
0x1ae3   :  { %v2768_v52 = vpop.eup %2767 }
0x1ae4   :  { %v2770_v55 = vpop.eup %2769  ;;  %v2037_v56 = vsel %vm1729_vm10, %v2768_v52, 0.0 }
0x1ae5   :  { %2038 = vadd.xlane.f32.xlu1 %v2037_v56  ;;  %v2034_v32 = vsel %vm1729_vm10, %v2770_v55, 0.0  ;;  %v2772_v20 = vpop.eup %2771  ;;  %v2264_v56 = vmul.f32 -1.442695, %v3431_v33 }
0x1ae6   :  { %2035 = vadd.xlane.f32.xlu0 %v2034_v32  ;;  %v2774_v45 = vpop.eup %2773  ;;  %v2129_v24 = vadd.f32 1.0, %v2772_v20 }
0x1ae7   :  { %v1811_v35 = vmul.f32 0.6931472, %v2774_v45 }
0x1ae9   :  { %v1826_v49 = vadd.f32 %v1811_v35, %v3503_v41 }
0x1af6   :  { %1558 = vrot.lane.b32.xlu1 %v3322_v63, %s2982_s6  ;;  %v2263_v63 = vmul.f32 -1.442695, %v3435_v44 }
0x1afa   :  { %v1794_v7 = vpop.xlane.xlu1 %1793  ;;  %1563 = vrot.lane.b32.xlu1 %v3358_v26, %s2982_s6 }
0x1afc   :  { %1552 = vrot.lane.b32.xlu0 %v1550_v34, %s2982_s6 }
0x1afe   :  { %v1797_v8 = vpop.xlane.xlu1 %1796 }
0x1b02   :  { %v1800_v0 = vpop.xlane.xlu1 %1799 }
0x1b06   :  { %v1803_v1 = vpop.xlane.xlu1 %1802 }
0x1b0a   :  { %v1903_v14 = vpop.xlane.xlu1 %1902 }
0x1b0b   :  { %2775 = vlog2.f32 %v1903_v14 }
0x1b0c   :  { %2777 = vpow2.f32 %v2261_v12 }
0x1b0d   :  { %2779 = vlog2.f32 %v1794_v7 }
0x1b0e   :  { %v1906_v19 = vpop.xlane.xlu1 %1905  ;;  %v2018_v26 = vpop.xlane.xlu0 %2017 }
0x1b0f   :  { %2781 = vlog2.f32 %v2018_v26 }
0x1b10   :  { %2783 = vpow2.f32 %v2260_v15 }
0x1b11   :  { %2785 = vpow2.f32 %v2263_v63 }
0x1b12   :  { %v1909_v27 = vpop.xlane.xlu1 %1908  ;;  %v2024_v39 = vpop.xlane.xlu0 %2023 }
0x1b13   :  { %2787 = vlog2.f32 %v1909_v27 }
0x1b14   :  { %2789 = vlog2.f32 %v2024_v39 }
0x1b15   :  { %v2776_v23 = vpop.eup %2775  ;;  %2791 = vlog2.f32 %v1800_v0 }
0x1b16   :  { %v2778_v37 = vpop.eup %2777  ;;  %2793 = vrcp.f32 %v2129_v24  ;;  %v1926_v34 = vmul.f32 0.6931472, %v2776_v23  ;;  %v1912_v18 = vpop.xlane.xlu1 %1911 }
0x1b17   :  { %v2030_v52 = vpop.xlane.xlu0 %2029  ;;  %v2780_v55 = vpop.eup %2779  ;;  %2795 = vpow2.f32 %v2262_v30  ;;  %v2131_v38 = vadd.f32 1.0, %v2778_v37 }
0x1b18   :  { %v1941_v32 = vadd.f32 %v1926_v34, %v3573_v29  ;;  %2797 = vlog2.f32 %v2030_v52  ;;  %v1815_v12 = vmul.f32 0.6931472, %v2780_v55  ;;  %v2064_v29 = vsel %vm3395_vm9, %v1826_v49, 0.0 }
0x1b19   :  { %2799 = vlog2.f32 %v1906_v19  ;;  %v2782_v7 = vpop.eup %2781 }
0x1b1a   :  { %2801 = vlog2.f32 %v1791_v6  ;;  %v1915_v0 = vpop.xlane.xlu1 %1914  ;;  %v2784_v14 = vpop.eup %2783  ;;  %v2072_v15 = vsel %vm3437_vm13, %v1941_v32, 0.0  ;;  %v2041_v63 = vmul.f32 0.6931472, %v2782_v7  ;;  %v1828_v6 = vadd.f32 %v1815_v12, %v3551_v13 }
0x1b1b   :  { %2803 = vlog2.f32 %v1915_v0  ;;  %v2786_v26 = vpop.eup %2785  ;;  %v2080_v45 = vadd.f32 %v2072_v15, %v2064_v29 }
0x1b1c   :  { %2805 = vpow2.f32 %v2264_v56  ;;  %v2056_v41 = vadd.f32 %v2041_v63, %v3596_v60 }
0x1b1d   :  { %v2788_v20 = vpop.eup %2787  ;;  %2807 = vlog2.f32 %v1912_v18  ;;  %v2133_v18 = vadd.f32 1.0, %v2786_v26 }
0x1b1e   :  { %v2790_v19 = vpop.eup %2789  ;;  %2809 = vrcp.f32 %v2131_v38  ;;  %v1930_v24 = vmul.f32 0.6931472, %v2788_v20  ;;  %v1918_v27 = vpop.xlane.xlu1 %1917  ;;  %v2088_v30 = vsel %vm3473_vm0, %v2056_v41, 0.0 }
0x1b1f   :  { %v2792_v39 = vpop.eup %2791  ;;  %2811 = vlog2.f32 %v1797_v8  ;;  %v2045_v23 = vmul.f32 0.6931472, %v2790_v19  ;;  %v2096_v37 = vadd.f32 %v2088_v30, %v2080_v45  ;;  %v2066_v8 = vsel %vm3395_vm9, %v1828_v6, 0.0 }
0x1b20   :  { %v2794_v35 = vpop.eup %2793  ;;  %2813 = vlog2.f32 %v1803_v1  ;;  %v1943_v34 = vadd.f32 %v1930_v24, %v3579_v2  ;;  %v1819_v55 = vmul.f32 0.6931472, %v2792_v39  ;;  %v2130_v45 = vadd.f32 1.0, %v2784_v14 }
0x1b21   :  { %v2796_v60 = vpop.eup %2795  ;;  %v2058_v13 = vadd.f32 %v2045_v23, %v3607_v25  ;;  %2815 = vlog2.f32 %v1918_v27  ;;  %v2153_v56 = vsub.f32 %v3403_v48, %v2096_v37 }
0x1b22   :  { %v2798_v52 = vpop.eup %2797  ;;  %v2074_v1 = vsel %vm3437_vm13, %v1943_v34, 0.0  ;;  %v2021_v32 = vpop.xlane.xlu1 %2020  ;;  %v1830_v63 = vadd.f32 %v1819_v55, %v3563_v21  ;;  %v2132_v34 = vadd.f32 1.0, %v2796_v60 }
0x1b23   :  { %v2800_v49 = vpop.eup %2799  ;;  %v2082_v2 = vadd.f32 %v2074_v1, %v2066_v8  ;;  %2817 = vlog2.f32 %v2021_v32  ;;  %v2161_v38 = vsel %vm2104_vm1, %v2794_v35, %v2153_v56  ;;  %v2090_v25 = vsel %vm3473_vm0, %v2058_v13, 0.0 }
0x1b24   :  { %v2802_v7 = vpop.eup %2801  ;;  %v2049_v12 = vmul.f32 0.6931472, %v2798_v52  ;;  %2169 = vst.msk [vmem:[%s3891_s7] sm:$0xff] %vm1729_vm10, %v2161_v38  ;;  %2819 = vrcp.f32 %v2133_v18  ;;  %v1928_v26 = vmul.f32 0.6931472, %v2800_v49  ;;  %v2068_v21 = vsel %vm3395_vm9, %v1830_v63, 0.0 }
0x1b25   :  { %v2804_v0 = vpop.eup %2803  ;;  %v2098_v48 = vadd.f32 %v2090_v25, %v2082_v2  ;;  %v1813_v24 = vmul.f32 0.6931472, %v2802_v7 }
0x1b26   :  { %v2806_v15 = vpop.eup %2805  ;;  %v1934_v20 = vmul.f32 0.6931472, %v2804_v0  ;;  %v2027_v29 = vpop.xlane.xlu1 %2026  ;;  %v2060_v27 = vadd.f32 %v2049_v12, %v3620_v17  ;;  %v1942_v37 = vadd.f32 %v1928_v26, %v3571_v28 }
0x1b27   :  { %v2808_v41 = vpop.eup %2807  ;;  %v2155_v19 = vsub.f32 %v3419_v4, %v2098_v48  ;;  %2821 = vlog2.f32 %v2027_v29  ;;  %v1827_v13 = vadd.f32 %v1813_v24, %v3507_v42  ;;  %v2134_v60 = vadd.f32 1.0, %v2806_v15 }
0x1b28   :  { %v2810_v6 = vpop.eup %2809  ;;  %v1945_v39 = vadd.f32 %v1934_v20, %v3587_v43  ;;  %v1932_v4 = vmul.f32 0.6931472, %v2808_v41  ;;  %v2092_v28 = vsel %vm3473_vm0, %v2060_v27, 0.0  ;;  %v2073_v56 = vsel %vm3437_vm13, %v1942_v37, 0.0 }
0x1b29   :  { %v2812_v30 = vpop.eup %2811  ;;  %v2163_v23 = vsel %vm2104_vm1, %v2810_v6, %v2155_v19  ;;  %v2065_v42 = vsel %vm3395_vm9, %v1827_v13, 0.0 }
0x1b2a   :  { %v2814_v35 = vpop.eup %2813  ;;  %2171 = vst.msk [vmem:[%s3891_s7 + $0x10] sm:$0xff] %vm1729_vm10, %v2163_v23  ;;  %v2076_v17 = vsel %vm3437_vm13, %v1945_v39, 0.0  ;;  %v2033_v43 = vpop.xlane.xlu1 %2032  ;;  %v1817_v52 = vmul.f32 0.6931472, %v2812_v30  ;;  %v1944_v1 = vadd.f32 %v1932_v4, %v3585_v40  ;;  %v2081_v48 = vadd.f32 %v2073_v56, %v2065_v42 }
0x1b2b   :  { %v2816_v14 = vpop.eup %2815  ;;  %v2084_v18 = vadd.f32 %v2076_v17, %v2068_v21  ;;  %2823 = vlog2.f32 %v2033_v43  ;;  %v1821_v25 = vmul.f32 0.6931472, %v2814_v35 }
0x1b2c   :  { %2825 = vrcp.f32 %v2130_v45  ;;  %v1936_v32 = vmul.f32 0.6931472, %v2816_v14  ;;  %v1829_v38 = vadd.f32 %v1817_v52, %v3547_v10  ;;  %v2075_v63 = vsel %vm3437_vm13, %v1944_v1, 0.0 }
0x1b2d   :  { %v2818_v8 = vpop.eup %2817  ;;  %v2100_v55 = vadd.f32 %v2092_v28, %v2084_v18  ;;  %2827 = vrcp.f32 %v2132_v34  ;;  %v1831_v20 = vadd.f32 %v1821_v25, %v3561_v51  ;;  %v2265_v14 = vmul.f32 -1.442695, %v3519_v58 }
0x1b2e   :  { %v2043_v49 = vmul.f32 0.6931472, %v2818_v8  ;;  %v2820_v7 = vpop.eup %2819  ;;  %2829 = vrcp.f32 %v2134_v60  ;;  %v2067_v26 = vsel %vm3395_vm9, %v1829_v38, 0.0 }
0x1b2f   :  { %v2157_v2 = vsub.f32 %v3435_v44, %v2100_v55  ;;  %v1946_v44 = vadd.f32 %v1936_v32, %v3594_v59  ;;  %v2083_v19 = vadd.f32 %v2075_v63, %v2067_v26  ;;  %v2069_v51 = vsel %vm3395_vm9, %v1831_v20, 0.0 }
0x1b30   :  { %v2057_v12 = vadd.f32 %v2043_v49, %v3616_v50 }
0x1b31   :  { %v2822_v0 = vpop.eup %2821  ;;  %v2165_v40 = vsel %vm2104_vm1, %v2820_v7, %v2157_v2  ;;  %v2077_v59 = vsel %vm3437_vm13, %v1946_v44, 0.0 }
0x1b32   :  { %2173 = vst.msk [vmem:[%s3891_s7 + $0x20] sm:$0xff] %vm1729_vm10, %v2165_v40  ;;  %v2089_v10 = vsel %vm3473_vm0, %v2057_v12, 0.0  ;;  %v2047_v15 = vmul.f32 0.6931472, %v2822_v0  ;;  %v2085_v23 = vadd.f32 %v2077_v59, %v2069_v51 }
0x1b33   :  { %v2097_v50 = vadd.f32 %v2089_v10, %v2081_v48 }
0x1b34   :  { %v2059_v29 = vadd.f32 %v2047_v15, %v3631_v31 }
0x1b35   :  { %v2824_v41 = vpop.eup %2823  ;;  %v2154_v6 = vsub.f32 %v3400_v54, %v2097_v50 }
0x1b36   :  { %v2826_v45 = vpop.eup %2825  ;;  %v2091_v24 = vsel %vm3473_vm0, %v2059_v29, 0.0  ;;  %v2051_v27 = vmul.f32 0.6931472, %v2824_v41 }
0x1b37   :  { %v2162_v39 = vsel %vm2104_vm1, %v2826_v45, %v2154_v6  ;;  %v2099_v30 = vadd.f32 %v2091_v24, %v2083_v19  ;;  %v2828_v31 = vpop.eup %2827 }
0x1b38   :  { %2170 = vst.msk [vmem:[%s3891_s7 + $0x8] sm:$0xff] %vm1729_vm10, %v2162_v39  ;;  %v2061_v54 = vadd.f32 %v2051_v27, %v3644_v11  ;;  %v2830_v43 = vpop.eup %2829 }
0x1b39   :  { %v2156_v35 = vsub.f32 %v3416_v62, %v2099_v30  ;;  %v2266_v62 = vmul.f32 -1.442695, %v3516_v3 }
0x1b3a   :  { %v2093_v21 = vsel %vm3473_vm0, %v2061_v54, 0.0 }
0x1b3b   :  { %v2164_v37 = vsel %vm2104_vm1, %v2828_v31, %v2156_v35  ;;  %v2101_v4 = vadd.f32 %v2093_v21, %v2085_v23  ;;  %2831 = vpow2.f32 %v2266_v62 }
0x1b3c   :  { %2172 = vst.msk [vmem:[%s3891_s7 + $0x18] sm:$0xff] %vm1729_vm10, %v2164_v37  ;;  %2833 = vpow2.f32 %v2265_v14 }
0x1b3d   :  { %v2158_v17 = vsub.f32 %v3431_v33, %v2101_v4 }
0x1b3f   :  { %v2166_v11 = vsel %vm2104_vm1, %v2830_v43, %v2158_v17 }
0x1b40   :  { %2174 = vst.msk [vmem:[%s3891_s7 + $0x28] sm:$0xff] %vm1729_vm10, %v2166_v11 }
0x1b45   :  { %v2832_v28 = vpop.eup %2831 }
0x1b46   :  { %v2834_v55 = vpop.eup %2833  ;;  %v2136_v60 = vadd.f32 1.0, %v2832_v28 }
0x1b47   :  { %v2135_v42 = vadd.f32 1.0, %v2834_v55 }
0x1b6a   :  { %v1809_v34 = vpop.xlane.xlu1 %1808 }
0x1b6b   :  { %2835 = vlog2.f32 %v1809_v34  ;;  %v1806_v18 = vpop.xlane.xlu0 %1805 }
0x1b6c   :  { %2837 = vlog2.f32 %v1806_v18 }
0x1b6e   :  { %v1924_v33 = vpop.xlane.xlu1 %1923 }
0x1b6f   :  { %2839 = vlog2.f32 %v1924_v33  ;;  %v1921_v13 = vpop.xlane.xlu0 %1920 }
0x1b70   :  { %2841 = vlog2.f32 %v1921_v13 }
0x1b72   :  { %v2039_v52 = vpop.xlane.xlu1 %2038 }
0x1b73   :  { %2843 = vlog2.f32 %v2039_v52  ;;  %v2036_v8 = vpop.xlane.xlu0 %2035 }
0x1b74   :  { %2845 = vlog2.f32 %v2036_v8 }
0x1b75   :  { %v2836_v56 = vpop.eup %2835 }
0x1b76   :  { %v2838_v1 = vpop.eup %2837  ;;  %v1559_v32 = vpop.permute.xlu1 %1558  ;;  %v1825_v2 = vmul.f32 0.6931472, %v2836_v56 }
0x1b77   :  { %1561 = vst.msk [vmem:[#allocation12] sm:$0xff] %vm437_vm5, %v1559_v32  ;;  %v1553_v49 = vpop.permute.xlu0 %1552  ;;  %v1823_v38 = vmul.f32 0.6931472, %v2838_v1 }
0x1b78   :  { %1556 = vst.msk [vmem:[#allocation11 + $0x8] sm:$0xff] %vm437_vm5, %v1553_v49 }
0x1b79   :  { %v2840_v7 = vpop.eup %2839 }
0x1b7a   :  { %2928 = shalt.err (!%p2925_p0)
}
0x1b7b   :  { %s2929_s15 = scalar_lea.hbm %s3892_s8, 256 }
0x1b7c   :  { %p2930_p1 = scmp.ne.s32.totalorder %s3892_s8, %s2929_s15  ;;  %p2933_p2 = scmp.lt.u32.totalorder %s2929_s15, %s3892_s8 }
0x1b7e   :  { %p2935_p3 = pnand %p2933_p2, %p2930_p1 }
0x1b80   :  { %2938 = shalt.err (!%p2935_p3)
}
0x1b81   :  { %2190 = dma.vmem_to_hbm [thread:$0]  %s2185_s12, 256, %s3892_s8, [#allocation7], %s2970_s19, %s2970_s19, %s2971_s20   ;;  %v2842_v25 = vpop.eup %2841  ;;  %v1940_v12 = vmul.f32 0.6931472, %v2840_v7  ;;  %v1564_v0 = vpop.permute.xlu1 %1563  ;;  %2847 = vrcp.f32 %v2136_v60  ;;  %v1833_v40 = vadd.f32 %v1825_v2, %v3661_v16 }
0x1b82   :  { %v1938_v48 = vmul.f32 0.6931472, %v2842_v25  ;;  %1567 = vst.msk [vmem:[#allocation12 + $0x8] sm:$0xff] %vm437_vm5, %v1564_v0  ;;  %s2939_s22 = scalar_lea.vmem %s3814_s4, 256  ;;  %p2944_p5 = scmp.lt.s32.totalorder %s3814_s4, %s3814_s4 }
0x1b83   :  { %v1948_v63 = vadd.f32 %v1940_v12, %v3673_v61  ;;  %p2940_p4 = scmp.ne.s32.totalorder %s3814_s4, %s2939_s22  ;;  %p2945_p6 = scmp.lt.s32.totalorder %s2939_s22, %s2939_s22 }
0x1b85   :  { %p2946_p7 = por %p2945_p6, %p2944_p5 }
0x1b87   :  { %p2947_p8 = pnand %p2946_p7, %p2940_p4 }
0x1b89   :  { %2950 = shalt.err (!%p2947_p8)
}
0x1b8a   :  { %s2951_s25 = scalar_lea.hbm %s3893_s9, 256 }
0x1b8b   :  { %p2952_p9 = scmp.ne.s32.totalorder %s3893_s9, %s2951_s25  ;;  %p2955_p10 = scmp.lt.u32.totalorder %s2951_s25, %s3893_s9 }
0x1b8d   :  { %p2957_p11 = pnand %p2955_p10, %p2952_p9 }
0x1b8f   :  { %2960 = shalt.err (!%p2957_p11)
}
0x1b90   :  { %2202 = dma.vmem_to_hbm [thread:$0]  %s3814_s4, 256, %s3893_s9, [#allocation13], %s2970_s19, %s2970_s19, %s2971_s20   ;;  %v2844_v16 = vpop.eup %2843  ;;  %2849 = vrcp.f32 %v2135_v42  ;;  %v1832_v61 = vadd.f32 %v1823_v38, %v3665_v36  ;;  %v1947_v44 = vadd.f32 %v1938_v48, %v3677_v5  ;;  %v2079_v15 = vsel %vm3437_vm13, %v1948_v63, 0.0 }
0x1b91   :  { %v2846_v10 = vpop.eup %2845  ;;  %v2055_v50 = vmul.f32 0.6931472, %v2844_v16  ;;  %v2071_v29 = vsel %vm3395_vm9, %v1833_v40, 0.0 }
0x1b92   :  { %v2078_v26 = vsel %vm3437_vm13, %v1947_v44, 0.0  ;;  %v2053_v20 = vmul.f32 0.6931472, %v2846_v10  ;;  %v2070_v19 = vsel %vm3395_vm9, %v1832_v61, 0.0  ;;  %v2087_v36 = vadd.f32 %v2079_v15, %v2071_v29  ;;  %v2848_v39 = vpop.eup %2847 }
0x1b93   :  { %v2063_v41 = vadd.f32 %v2055_v50, %v3685_v57  ;;  %v2086_v6 = vadd.f32 %v2078_v26, %v2070_v19 }
0x1b94   :  { %v2062_v5 = vadd.f32 %v2053_v20, %v3689_v9 }
0x1b95   :  { %v2095_v45 = vsel %vm3473_vm0, %v2063_v41, 0.0 }
0x1b96   :  { %v2103_v59 = vadd.f32 %v2095_v45, %v2087_v36  ;;  %v2094_v47 = vsel %vm3473_vm0, %v2062_v5, 0.0 }
0x1b97   :  { %v2102_v24 = vadd.f32 %v2094_v47, %v2086_v6 }
0x1b98   :  { %v2160_v27 = vsub.f32 %v3516_v3, %v2103_v59 }
0x1b99   :  { %v2159_v57 = vsub.f32 %v3519_v58, %v2102_v24 }
0x1b9a   :  { %v2850_v30 = vpop.eup %2849  ;;  %v2168_v53 = vsel %vm2104_vm1, %v2848_v39, %v2160_v27 }
0x1b9b   :  { %2176 = vst.msk [vmem:[%s3891_s7 + $0x38] sm:$0xff] %vm1729_vm10, %v2168_v53  ;;  %v2167_v9 = vsel %vm2104_vm1, %v2850_v30, %v2159_v57 }
0x1b9c   :  { %2175 = vst.msk [vmem:[%s3891_s7 + $0x30] sm:$0xff] %vm1729_vm10, %v2167_v9 }
0x1b9d   :  { %2965 = dma.done.wait [#allocation7], 256  }
0x1b9e   :  { %2966 = vsyncadd [#allocation7], 4294967040 }
0x1b9f   :  { %2967 = dma.done.wait [#allocation13], 256  }
0x1ba0   :  { %2968 = vsyncadd [#allocation13], 4294967040 }
0x1ba1   :  { %2211 = vsyncpa [#allocation6], 1 }
0x1ba2   :  { %2212 = vsyncpa [#allocation9], 1 }
0x1ba3   :  { %2213 = vsyncpa [#allocation7], 1 }
0x1ba4   :  { %2214 = vsyncpa [#allocation13], 1 }

</bundles_post_ra>
